<compile_context>
chip_gen: v7x
topology: tpu7x:2x2x1
jax: 0.10.0
libtpu: 0.0.40
codegen_flags: <defaults>
</compile_context>

<pallas_src>
from functools import partial
import math

import jax
import jax.numpy as jnp
import numpy as np
from jax.experimental import pallas as pl
from jax.experimental.pallas import tpu as pltpu

THRESH = 0.5          # ActFun threshold (lens only matters for backward)

# sizes implied by cfg_cnn / cfg_kernel
H1, C1 = 36, 10       # conv1 output 36x36x10
H2, C2 = 18, 10       # pool1 / conv2 output 18x18x10
H3 = 9                # pool2 output 9x9x10
HP1 = 40              # per-image row stride of stage-1 input  (38 padded rows + 2 filler)
HP2 = 24              # per-image row stride of stage-2 input  (20 padded rows + 4 filler)
HP3 = 16              # per-image row stride of stage-2 output (9 data rows + 7 filler)
# (filler rows keep every row-block a multiple of 8 for any batch tile size)


# ----------------------------------------------------------------------------
# Pallas kernels
# ----------------------------------------------------------------------------
def _conv_stage_kernel(x_ref, w_ref, b_ref, p_ref, q_ref, o_ref, *, interior):
    """Fused 3x3 conv (pad=1) + bias + spike(>0.5) + 2x2 avg-pool for one batch tile.

    x_ref : (tb*HpIn, Wp*Cin)      flattened, padded input rows
    w_ref : (3, Wp*Cin, Wout*Co)   banded conv matrices, one per kernel row dy
    b_ref : (1, Wout*Co)           bias tiled over the (w, co) lanes
    p_ref : (Wout*Co, W2*Co)       width-direction pool (0.25 folded in)
    q_ref : (tb*HpOut, tb*HpIn-2)  height-direction pool + per-image row extraction/placement
    o_ref : (tb*HpOut, LanesOut)
    """
    rows = x_ref.shape[0] - 2
    acc = jnp.dot(x_ref[0:rows, :], w_ref[0], preferred_element_type=jnp.float32)
    acc = acc + jnp.dot(x_ref[1:rows + 1, :], w_ref[1], preferred_element_type=jnp.float32)
    acc = acc + jnp.dot(x_ref[2:rows + 2, :], w_ref[2], preferred_element_type=jnp.float32)
    # ReLU + ActFun: (relu(y) > 0.5) == (y > 0.5) since THRESH > 0 -> single compare.
    spk = jnp.where(acc + b_ref[...] > THRESH, 1.0, 0.0)
    wpool = jnp.dot(spk, p_ref[...], preferred_element_type=jnp.float32)       # width pool
    pooled = jnp.dot(q_ref[...], wpool, preferred_element_type=jnp.float32)    # height pool
    if interior is None:
        o_ref[...] = pooled
    else:                                  # place data into the lane-padded interior
        lo, hi = interior
        o_ref[...] = jnp.zeros(o_ref.shape, jnp.float32)
        o_ref[:, lo:hi] = pooled


def _fc_heads_kernel(x_ref, wf_ref, bf_ref, wt_ref, bt_ref, o_ref):
    """Fused fc + all task heads: out = (x @ Wfc + bfc) @ Wt + bt (no HBM intermediate)."""
    h = jnp.dot(x_ref[...], wf_ref[...], preferred_element_type=jnp.float32) + bf_ref[...]
    o_ref[...] = jnp.dot(h, wt_ref[...], preferred_element_type=jnp.float32) + bt_ref[...]


# ----------------------------------------------------------------------------
# Host-side constant / weight preparation (plain JAX / numpy, runs once per trace)
# ----------------------------------------------------------------------------
def _round_up(x, m):
    return ((x + m - 1) // m) * m


def _banded_conv_mats(w_torch, wout):
    """torch (Co,Cin,3,3) conv weight -> (3, (wout+2)*Cin, wout*Co) banded matmul weights."""
    co, cin, kh, kw = w_torch.shape
    wp = wout + 2
    # E[dx, u, w] = 1 iff u == w + dx
    E = (jnp.arange(wp)[:, None] ==
         (jnp.arange(wout)[None, :] + jnp.arange(kw)[:, None, None])).astype(jnp.float32)
    mats = []
    for dy in range(kh):
        t = jnp.einsum('xuw,ocx->ucwo', E, w_torch[:, :, dy, :])   # (Wp, Cin, Wout, Co)
        mats.append(t.reshape(wp * cin, wout * co))
    return jnp.stack(mats, axis=0)


def _wpool_mat(wout, co):
    """Right-multiply matrix: average adjacent width pairs (0.25 of the 2x2 pool folded in)."""
    w2 = wout // 2
    sel = (jnp.arange(wout)[:, None] // 2 == jnp.arange(w2)[None, :]).astype(jnp.float32) * 0.25
    return jnp.einsum('wj,cd->wcjd', sel, jnp.eye(co, dtype=jnp.float32)).reshape(wout * co, w2 * co)


def _hpool_mat(tb, hp_in, hout, hp_out, row_off):
    """Left-multiply matrix: sum adjacent row pairs, pick valid rows per image, place them."""
    q = np.zeros((tb * hp_out, tb * hp_in - 2), np.float32)
    for im in range(tb):
        for i in range(hout // 2):
            q[im * hp_out + row_off + i, im * hp_in + 2 * i] = 1.0
            q[im * hp_out + row_off + i, im * hp_in + 2 * i + 1] = 1.0
    return jnp.asarray(q)


def init_params(key, n_tasks):
    """Torch-layout parameters (conv: OIHW, Linear: (out, in)), uniform(-1/sqrt(fan_in), ...)."""
    ks = jax.random.split(key, 8)

    def u(k, shape, fan_in):
        b = 1.0 / math.sqrt(fan_in)
        return jax.random.uniform(k, shape, jnp.float32, -b, b)

    return dict(
        conv1_w=u(ks[0], (10, 1, 3, 3), 1 * 9),
        conv1_b=u(ks[1], (10,), 1 * 9),
        conv2_w=u(ks[2], (10, 10, 3, 3), 10 * 9),
        conv2_b=u(ks[3], (10,), 10 * 9),
        fc_w=u(ks[4], (50, 810), 810),              # fc in-index is torch flatten: c*81 + h*9 + w
        fc_b=u(ks[5], (50,), 810),
        task_w=u(ks[6], (n_tasks, 10, 50), 50),
        task_b=u(ks[7], (n_tasks, 10), 50),
    )


def _prepare(params, n_tasks):
    """Build kernel-ready weight forms from torch-layout params (explicit layout mapping)."""
    wd1 = _banded_conv_mats(params["conv1_w"], H1)                      # (3, 38, 360)
    b1f = jnp.tile(params["conv1_b"], H1).reshape(1, H1 * C1)           # (1, 360)
    wd2 = _banded_conv_mats(params["conv2_w"], H2)                      # (3, 200, 180)
    b2f = jnp.tile(params["conv2_b"], H2).reshape(1, H2 * C2)           # (1, 180)
    # fc: permute weight rows from torch flatten order (c, h, w) to our lane order (h, w, c)
    hh, ww, cc = np.meshgrid(np.arange(H3), np.arange(H3), np.arange(C2), indexing='ij')
    perm = (cc * (H3 * H3) + hh * H3 + ww).reshape(-1)
    wfc = params["fc_w"].T[perm, :]                                     # (810, 50)
    bfc = params["fc_b"].reshape(1, 50)
    wt = jnp.transpose(params["task_w"], (2, 0, 1)).reshape(50, n_tasks * 10)
    bt = params["task_b"].reshape(1, n_tasks * 10)
    return wd1, b1f, wd2, b2f, wfc, bfc, wt, bt


# ----------------------------------------------------------------------------
# Forward pass
# ----------------------------------------------------------------------------
def cnn_model_forward(params, x_nchw, n_tasks):
    B = x_nchw.shape[0]
    assert x_nchw.shape[1:] == (1, 36, 36), x_nchw.shape   # fc expects 9*9*10 = 810 features
    wd1, b1f, wd2, b2f, wfc, bfc, wt, bt = _prepare(params, n_tasks)

    # batch tile: keep >=2 grid steps when B > 1 (v7x has 2 TensorCores, axis is "parallel")
    tb = max(1, min(8, B // 2)) if B > 1 else 1
    b_pad = _round_up(B, tb)
    grid = b_pad // tb
    cp = pltpu.CompilerParams(dimension_semantics=("parallel",))

    # ---- stage 1: conv1 + spike + pool  ->  padded, flattened stage-2 input ----
    x = jnp.pad(x_nchw[:, 0, :, :], ((0, b_pad - B), (1, 3), (1, 1)))   # (b_pad, 40, 38)
    x = x.reshape(b_pad * HP1, 38)                                      # rows=(img,row) lanes=w
    p1 = _wpool_mat(H1, C1)                                             # (360, 180)
    q1 = _hpool_mat(tb, HP1, H1, HP2, row_off=1)                        # (tb*24, tb*40-2)
    y1 = pl.pallas_call(
        partial(_conv_stage_kernel, interior=(C1, (H2 + 1) * C1)),      # data lanes 10:190
        out_shape=jax.ShapeDtypeStruct((b_pad * HP2, (H2 + 2) * C1), jnp.float32),
        grid=(grid,),
        in_specs=[
            pl.BlockSpec((tb * HP1, 38), lambda i: (i, 0)),
            pl.BlockSpec((3, 38, H1 * C1), lambda i: (0, 0, 0)),
            pl.BlockSpec((1, H1 * C1), lambda i: (0, 0)),
            pl.BlockSpec((H1 * C1, H2 * C1), lambda i: (0, 0)),
            pl.BlockSpec((tb * HP2, tb * HP1 - 2), lambda i: (0, 0)),
        ],
        out_specs=pl.BlockSpec((tb * HP2, (H2 + 2) * C1), lambda i: (i, 0)),
        compiler_params=cp,
    )(x, wd1, b1f, p1, q1)

    # ---- stage 2: conv2 + spike + pool  ->  lane-dense (rows=(img,h), lanes=(w,c)) ----
    p2 = _wpool_mat(H2, C2)                                             # (180, 90)
    q2 = _hpool_mat(tb, HP2, H2, HP3, row_off=0)                        # (tb*16, tb*24-2)
    y2 = pl.pallas_call(
        partial(_conv_stage_kernel, interior=None),
        out_shape=jax.ShapeDtypeStruct((b_pad * HP3, H3 * C2), jnp.float32),
        grid=(grid,),
        in_specs=[
            pl.BlockSpec((tb * HP2, (H2 + 2) * C1), lambda i: (i, 0)),
            pl.BlockSpec((3, (H2 + 2) * C1, H2 * C2), lambda i: (0, 0, 0)),
            pl.BlockSpec((1, H2 * C2), lambda i: (0, 0)),
            pl.BlockSpec((H2 * C2, H3 * C2), lambda i: (0, 0)),
            pl.BlockSpec((tb * HP3, tb * HP2 - 2), lambda i: (0, 0)),
        ],
        out_specs=pl.BlockSpec((tb * HP3, H3 * C2), lambda i: (i, 0)),
        compiler_params=cp,
    )(y1, wd2, b2f, p2, q2)

    # ---- stage 3: fc + all task heads fused (pure linear chain in the PyTorch module) ----
    flat = y2.reshape(b_pad, HP3, H3 * C2)[:, :H3, :].reshape(b_pad, H3 * H3 * C2)  # (b_pad, 810)
    nt10 = n_tasks * 10
    b3 = _round_up(b_pad, 8)
    tm = min(256, b3)
    b3 = _round_up(b3, tm)
    flat = jnp.pad(flat, ((0, b3 - b_pad), (0, 0)))
    out = pl.pallas_call(
        _fc_heads_kernel,
        out_shape=jax.ShapeDtypeStruct((b3, nt10), jnp.float32),
        grid=(b3 // tm,),
        in_specs=[
            pl.BlockSpec((tm, H3 * H3 * C2), lambda i: (i, 0)),
            pl.BlockSpec((H3 * H3 * C2, 50), lambda i: (0, 0)),
            pl.BlockSpec((1, 50), lambda i: (0, 0)),
            pl.BlockSpec((50, nt10), lambda i: (0, 0)),
            pl.BlockSpec((1, nt10), lambda i: (0, 0)),
        ],
        out_specs=pl.BlockSpec((tm, nt10), lambda i: (i, 0)),
        compiler_params=cp,
    )(flat, wfc, bfc, wt, bt)

    return out[:B].reshape(B, n_tasks, 10)       # == torch.stack(output, dim=1)


# ----------------------------------------------------------------------------
# Pure-JAX reference (for a sanity check in main)
# ----------------------------------------------------------------------------
def _reference_forward(params, x, n_tasks):
    def conv(a, w, b):
        y = jax.lax.conv_general_dilated(a, w, (1, 1), ((1, 1), (1, 1)),
                                         dimension_numbers=('NCHW', 'OIHW', 'NCHW'))
        return y + b[None, :, None, None]

    def pool(a):
        return jax.lax.reduce_window(a, 0.0, jax.lax.add, (1, 1, 2, 2), (1, 1, 2, 2), 'VALID') * 0.25

    a = conv(x, params["conv1_w"], params["conv1_b"])
    a = pool((a > THRESH).astype(jnp.float32))          # relu then >0.5  ==  >0.5
    a = conv(a, params["conv2_w"], params["conv2_b"])
    a = pool((a > THRESH).astype(jnp.float32))
    flat = a.reshape(x.shape[0], -1)                    # NCHW flatten, like torch .view
    outs = flat @ params["fc_w"].T + params["fc_b"]
    heads = outs @ jnp.transpose(params["task_w"], (2, 0, 1)).reshape(50, -1) + params["task_b"].reshape(-1)
    return heads.reshape(x.shape[0], n_tasks, 10)


if __name__ == "__main__":
    key = jax.random.PRNGKey(0)
    kx, kp = jax.random.split(key)
    n_tasks = 3
    # Input spatial size must be 36x36 so fc sees 9*9*10 = 810 features.
    x = jax.random.normal(kx, (2, 1, 36, 36), jnp.float32)
    params = init_params(kp, n_tasks)

    fwd = jax.jit(partial(cnn_model_forward, n_tasks=n_tasks))
    out = fwd(params, x)
    jax.block_until_ready(out)
    assert out.shape == (2, n_tasks, 10), out.shape
    assert out.dtype == jnp.float32

    ref = jax.jit(partial(_reference_forward, n_tasks=n_tasks))(params, x)
    err = float(jnp.max(jnp.abs(out - ref)))
    assert err < 5e-2, f"mismatch vs pure-JAX reference: max abs err = {err}"
    print("KERNEL_OK")
</pallas_src>

<mosaic_0001>
module attributes {stable_mosaic.version = 11 : i64} {
  func.func @_conv_stage_kernel(%arg0: i32, %arg1: memref<40x38xf32, #tpu.memory_space<vmem>>, %arg2: memref<3x38x360xf32, #tpu.memory_space<vmem>>, %arg3: memref<1x360xf32, #tpu.memory_space<vmem>>, %arg4: memref<360x180xf32, #tpu.memory_space<vmem>>, %arg5: memref<24x38xf32, #tpu.memory_space<vmem>>, %arg6: memref<24x200xf32, #tpu.memory_space<vmem>>) attributes {dimension_semantics = [#tpu.dimension_semantics<parallel>], iteration_bounds = array<i64: 2>, scalar_prefetch = 0 : i64, scratch_operands = 0 : i64, tpu.core_type = #tpu.core_type<tc>, window_params = [{transform_indices = @transform_0, window_bounds = array<i64: 40, 38>}, {pipeline_mode = #tpu.pipeline_mode<synchronous>, transform_indices = @transform_1, window_bounds = array<i64: 3, 38, 360>}, {pipeline_mode = #tpu.pipeline_mode<synchronous>, transform_indices = @transform_2, window_bounds = array<i64: 1, 360>}, {pipeline_mode = #tpu.pipeline_mode<synchronous>, transform_indices = @transform_3, window_bounds = array<i64: 360, 180>}, {pipeline_mode = #tpu.pipeline_mode<synchronous>, transform_indices = @transform_4, window_bounds = array<i64: 24, 38>}, {transform_indices = @transform_5, window_bounds = array<i64: 24, 200>}]} {
    %c0 = arith.constant 0 : index
    %c0_0 = arith.constant 0 : index
    %0 = vector.load %arg1[%c0, %c0_0] : memref<40x38xf32, #tpu.memory_space<vmem>>, vector<38x38xf32>
    %c0_1 = arith.constant 0 : index
    %c0_2 = arith.constant 0 : index
    %c0_3 = arith.constant 0 : index
    %1 = vector.load %arg2[%c0_1, %c0_2, %c0_3] : memref<3x38x360xf32, #tpu.memory_space<vmem>>, vector<1x38x360xf32>
    %2 = vector.shape_cast %1 : vector<1x38x360xf32> to vector<38x360xf32>
    %cst = arith.constant dense<0.000000e+00> : vector<38x360xf32>
    %3 = tpu.matmul %0, %2, %cst {dimension_numbers = #tpu.dot_dimension_numbers<[1], [0], [0], [1], [0, 0, 1, 1], [], []>} : vector<38x38xf32>, vector<38x360xf32>, vector<38x360xf32> -> vector<38x360xf32>
    %c1 = arith.constant 1 : index
    %c0_4 = arith.constant 0 : index
    %4 = vector.load %arg1[%c1, %c0_4] : memref<40x38xf32, #tpu.memory_space<vmem>>, vector<38x38xf32>
    %c1_5 = arith.constant 1 : index
    %c0_6 = arith.constant 0 : index
    %c0_7 = arith.constant 0 : index
    %5 = vector.load %arg2[%c1_5, %c0_6, %c0_7] : memref<3x38x360xf32, #tpu.memory_space<vmem>>, vector<1x38x360xf32>
    %6 = vector.shape_cast %5 : vector<1x38x360xf32> to vector<38x360xf32>
    %cst_8 = arith.constant dense<0.000000e+00> : vector<38x360xf32>
    %7 = tpu.matmul %4, %6, %cst_8 {dimension_numbers = #tpu.dot_dimension_numbers<[1], [0], [0], [1], [0, 0, 1, 1], [], []>} : vector<38x38xf32>, vector<38x360xf32>, vector<38x360xf32> -> vector<38x360xf32>
    %8 = arith.addf %3, %7 : vector<38x360xf32>
    %c2 = arith.constant 2 : index
    %c0_9 = arith.constant 0 : index
    %9 = vector.load %arg1[%c2, %c0_9] : memref<40x38xf32, #tpu.memory_space<vmem>>, vector<38x38xf32>
    %c2_10 = arith.constant 2 : index
    %c0_11 = arith.constant 0 : index
    %c0_12 = arith.constant 0 : index
    %10 = vector.load %arg2[%c2_10, %c0_11, %c0_12] : memref<3x38x360xf32, #tpu.memory_space<vmem>>, vector<1x38x360xf32>
    %11 = vector.shape_cast %10 : vector<1x38x360xf32> to vector<38x360xf32>
    %cst_13 = arith.constant dense<0.000000e+00> : vector<38x360xf32>
    %12 = tpu.matmul %9, %11, %cst_13 {dimension_numbers = #tpu.dot_dimension_numbers<[1], [0], [0], [1], [0, 0, 1, 1], [], []>} : vector<38x38xf32>, vector<38x360xf32>, vector<38x360xf32> -> vector<38x360xf32>
    %13 = arith.addf %8, %12 : vector<38x360xf32>
    %c0_14 = arith.constant 0 : index
    %c0_15 = arith.constant 0 : index
    %14 = vector.load %arg3[%c0_14, %c0_15] : memref<1x360xf32, #tpu.memory_space<vmem>>, vector<1x360xf32>
    %15 = vector.broadcast %14 : vector<1x360xf32> to vector<38x360xf32>
    %16 = arith.addf %13, %15 : vector<38x360xf32>
    %cst_16 = arith.constant 5.000000e-01 : f32
    %17 = vector.broadcast %cst_16 : f32 to vector<38x360xf32>
    %18 = arith.cmpf ogt, %16, %17 : vector<38x360xf32>
    %cst_17 = arith.constant 1.000000e+00 : f32
    %cst_18 = arith.constant 0.000000e+00 : f32
    %19 = vector.broadcast %cst_17 : f32 to vector<38x360xf32>
    %20 = vector.broadcast %cst_18 : f32 to vector<38x360xf32>
    %21 = arith.select %18, %19, %20 : vector<38x360xi1>, vector<38x360xf32>
    %c0_19 = arith.constant 0 : index
    %c0_20 = arith.constant 0 : index
    %22 = vector.load %arg4[%c0_19, %c0_20] : memref<360x180xf32, #tpu.memory_space<vmem>>, vector<360x180xf32>
    %cst_21 = arith.constant dense<0.000000e+00> : vector<38x180xf32>
    %23 = tpu.matmul %21, %22, %cst_21 {dimension_numbers = #tpu.dot_dimension_numbers<[1], [0], [0], [1], [0, 0, 1, 1], [], []>} : vector<38x360xf32>, vector<360x180xf32>, vector<38x180xf32> -> vector<38x180xf32>
    %c0_22 = arith.constant 0 : index
    %c0_23 = arith.constant 0 : index
    %24 = vector.load %arg5[%c0_22, %c0_23] : memref<24x38xf32, #tpu.memory_space<vmem>>, vector<24x38xf32>
    %cst_24 = arith.constant dense<0.000000e+00> : vector<24x180xf32>
    %25 = tpu.matmul %24, %23, %cst_24 {dimension_numbers = #tpu.dot_dimension_numbers<[1], [0], [0], [1], [0, 0, 1, 1], [], []>} : vector<24x38xf32>, vector<38x180xf32>, vector<24x180xf32> -> vector<24x180xf32>
    %cst_25 = arith.constant 0.000000e+00 : f32
    %26 = vector.broadcast %cst_25 : f32 to vector<24x200xf32>
    %c0_26 = arith.constant 0 : index
    %c0_27 = arith.constant 0 : index
    %27 = vector.load %arg6[%c0_26, %c0_27] : memref<24x200xf32, #tpu.memory_space<vmem>>, vector<24x200xf32>
    tpu.vector_store %arg6[%c0_26, %c0_27], %26 {strides = array<i32>} : memref<24x200xf32, #tpu.memory_space<vmem>>, vector<24x200xf32>,
    %c0_28 = arith.constant 0 : index
    %c10 = arith.constant 10 : index
    %28 = vector.load %arg6[%c0_28, %c10] : memref<24x200xf32, #tpu.memory_space<vmem>>, vector<24x180xf32>
    tpu.vector_store %arg6[%c0_28, %c10], %25 {strides = array<i32>} : memref<24x200xf32, #tpu.memory_space<vmem>>, vector<24x180xf32>,
    return
  }
  func.func @transform_0(%arg0: i32) -> (i32, i32) {
    %c0_i32 = arith.constant 0 : i32
    %c0_i32_0 = arith.constant 0 : i32
    return %arg0, %c0_i32 : i32, i32
  }
  func.func @transform_1(%arg0: i32) -> (i32, i32, i32) {
    %c0_i32 = arith.constant 0 : i32
    %c0_i32_0 = arith.constant 0 : i32
    %c0_i32_1 = arith.constant 0 : i32
    %c0_i32_2 = arith.constant 0 : i32
    return %c0_i32, %c0_i32_0, %c0_i32_1 : i32, i32, i32
  }
  func.func @transform_2(%arg0: i32) -> (i32, i32) {
    %c0_i32 = arith.constant 0 : i32
    %c0_i32_0 = arith.constant 0 : i32
    %c0_i32_1 = arith.constant 0 : i32
    return %c0_i32, %c0_i32_0 : i32, i32
  }
  func.func @transform_3(%arg0: i32) -> (i32, i32) {
    %c0_i32 = arith.constant 0 : i32
    %c0_i32_0 = arith.constant 0 : i32
    %c0_i32_1 = arith.constant 0 : i32
    return %c0_i32, %c0_i32_0 : i32, i32
  }
  func.func @transform_4(%arg0: i32) -> (i32, i32) {
    %c0_i32 = arith.constant 0 : i32
    %c0_i32_0 = arith.constant 0 : i32
    %c0_i32_1 = arith.constant 0 : i32
    return %c0_i32, %c0_i32_0 : i32, i32
  }
  func.func @transform_5(%arg0: i32) -> (i32, i32) {
    %c0_i32 = arith.constant 0 : i32
    %c0_i32_0 = arith.constant 0 : i32
    return %arg0, %c0_i32 : i32, i32
  }
}

module attributes {stable_mosaic.version = 11 : i64} {
  func.func @_conv_stage_kernel(%arg0: i32, %arg1: memref<24x200xf32, #tpu.memory_space<vmem>>, %arg2: memref<3x200x180xf32, #tpu.memory_space<vmem>>, %arg3: memref<1x180xf32, #tpu.memory_space<vmem>>, %arg4: memref<180x90xf32, #tpu.memory_space<vmem>>, %arg5: memref<16x22xf32, #tpu.memory_space<vmem>>, %arg6: memref<16x90xf32, #tpu.memory_space<vmem>>) attributes {dimension_semantics = [#tpu.dimension_semantics<parallel>], iteration_bounds = array<i64: 2>, scalar_prefetch = 0 : i64, scratch_operands = 0 : i64, tpu.core_type = #tpu.core_type<tc>, window_params = [{transform_indices = @transform_0, window_bounds = array<i64: 24, 200>}, {pipeline_mode = #tpu.pipeline_mode<synchronous>, transform_indices = @transform_1, window_bounds = array<i64: 3, 200, 180>}, {pipeline_mode = #tpu.pipeline_mode<synchronous>, transform_indices = @transform_2, window_bounds = array<i64: 1, 180>}, {pipeline_mode = #tpu.pipeline_mode<synchronous>, transform_indices = @transform_3, window_bounds = array<i64: 180, 90>}, {pipeline_mode = #tpu.pipeline_mode<synchronous>, transform_indices = @transform_4, window_bounds = array<i64: 16, 22>}, {transform_indices = @transform_5, window_bounds = array<i64: 16, 90>}]} {
    %c0 = arith.constant 0 : index
    %c0_0 = arith.constant 0 : index
    %0 = vector.load %arg1[%c0, %c0_0] : memref<24x200xf32, #tpu.memory_space<vmem>>, vector<22x200xf32>
    %c0_1 = arith.constant 0 : index
    %c0_2 = arith.constant 0 : index
    %c0_3 = arith.constant 0 : index
    %1 = vector.load %arg2[%c0_1, %c0_2, %c0_3] : memref<3x200x180xf32, #tpu.memory_space<vmem>>, vector<1x200x180xf32>
    %2 = vector.shape_cast %1 : vector<1x200x180xf32> to vector<200x180xf32>
    %cst = arith.constant dense<0.000000e+00> : vector<22x180xf32>
    %3 = tpu.matmul %0, %2, %cst {dimension_numbers = #tpu.dot_dimension_numbers<[1], [0], [0], [1], [0, 0, 1, 1], [], []>} : vector<22x200xf32>, vector<200x180xf32>, vector<22x180xf32> -> vector<22x180xf32>
    %c1 = arith.constant 1 : index
    %c0_4 = arith.constant 0 : index
    %4 = vector.load %arg1[%c1, %c0_4] : memref<24x200xf32, #tpu.memory_space<vmem>>, vector<22x200xf32>
    %c1_5 = arith.constant 1 : index
    %c0_6 = arith.constant 0 : index
    %c0_7 = arith.constant 0 : index
    %5 = vector.load %arg2[%c1_5, %c0_6, %c0_7] : memref<3x200x180xf32, #tpu.memory_space<vmem>>, vector<1x200x180xf32>
    %6 = vector.shape_cast %5 : vector<1x200x180xf32> to vector<200x180xf32>
    %cst_8 = arith.constant dense<0.000000e+00> : vector<22x180xf32>
    %7 = tpu.matmul %4, %6, %cst_8 {dimension_numbers = #tpu.dot_dimension_numbers<[1], [0], [0], [1], [0, 0, 1, 1], [], []>} : vector<22x200xf32>, vector<200x180xf32>, vector<22x180xf32> -> vector<22x180xf32>
    %8 = arith.addf %3, %7 : vector<22x180xf32>
    %c2 = arith.constant 2 : index
    %c0_9 = arith.constant 0 : index
    %9 = vector.load %arg1[%c2, %c0_9] : memref<24x200xf32, #tpu.memory_space<vmem>>, vector<22x200xf32>
    %c2_10 = arith.constant 2 : index
    %c0_11 = arith.constant 0 : index
    %c0_12 = arith.constant 0 : index
    %10 = vector.load %arg2[%c2_10, %c0_11, %c0_12] : memref<3x200x180xf32, #tpu.memory_space<vmem>>, vector<1x200x180xf32>
    %11 = vector.shape_cast %10 : vector<1x200x180xf32> to vector<200x180xf32>
    %cst_13 = arith.constant dense<0.000000e+00> : vector<22x180xf32>
    %12 = tpu.matmul %9, %11, %cst_13 {dimension_numbers = #tpu.dot_dimension_numbers<[1], [0], [0], [1], [0, 0, 1, 1], [], []>} : vector<22x200xf32>, vector<200x180xf32>, vector<22x180xf32> -> vector<22x180xf32>
    %13 = arith.addf %8, %12 : vector<22x180xf32>
    %c0_14 = arith.constant 0 : index
    %c0_15 = arith.constant 0 : index
    %14 = vector.load %arg3[%c0_14, %c0_15] : memref<1x180xf32, #tpu.memory_space<vmem>>, vector<1x180xf32>
    %15 = vector.broadcast %14 : vector<1x180xf32> to vector<22x180xf32>
    %16 = arith.addf %13, %15 : vector<22x180xf32>
    %cst_16 = arith.constant 5.000000e-01 : f32
    %17 = vector.broadcast %cst_16 : f32 to vector<22x180xf32>
    %18 = arith.cmpf ogt, %16, %17 : vector<22x180xf32>
    %cst_17 = arith.constant 1.000000e+00 : f32
    %cst_18 = arith.constant 0.000000e+00 : f32
    %19 = vector.broadcast %cst_17 : f32 to vector<22x180xf32>
    %20 = vector.broadcast %cst_18 : f32 to vector<22x180xf32>
    %21 = arith.select %18, %19, %20 : vector<22x180xi1>, vector<22x180xf32>
    %c0_19 = arith.constant 0 : index
    %c0_20 = arith.constant 0 : index
    %22 = vector.load %arg4[%c0_19, %c0_20] : memref<180x90xf32, #tpu.memory_space<vmem>>, vector<180x90xf32>
    %cst_21 = arith.constant dense<0.000000e+00> : vector<22x90xf32>
    %23 = tpu.matmul %21, %22, %cst_21 {dimension_numbers = #tpu.dot_dimension_numbers<[1], [0], [0], [1], [0, 0, 1, 1], [], []>} : vector<22x180xf32>, vector<180x90xf32>, vector<22x90xf32> -> vector<22x90xf32>
    %c0_22 = arith.constant 0 : index
    %c0_23 = arith.constant 0 : index
    %24 = vector.load %arg5[%c0_22, %c0_23] : memref<16x22xf32, #tpu.memory_space<vmem>>, vector<16x22xf32>
    %cst_24 = arith.constant dense<0.000000e+00> : vector<16x90xf32>
    %25 = tpu.matmul %24, %23, %cst_24 {dimension_numbers = #tpu.dot_dimension_numbers<[1], [0], [0], [1], [0, 0, 1, 1], [], []>} : vector<16x22xf32>, vector<22x90xf32>, vector<16x90xf32> -> vector<16x90xf32>
    %c0_25 = arith.constant 0 : index
    %c0_26 = arith.constant 0 : index
    %26 = vector.load %arg6[%c0_25, %c0_26] : memref<16x90xf32, #tpu.memory_space<vmem>>, vector<16x90xf32>
    tpu.vector_store %arg6[%c0_25, %c0_26], %25 {strides = array<i32>} : memref<16x90xf32, #tpu.memory_space<vmem>>, vector<16x90xf32>,
    return
  }
  func.func @transform_0(%arg0: i32) -> (i32, i32) {
    %c0_i32 = arith.constant 0 : i32
    %c0_i32_0 = arith.constant 0 : i32
    return %arg0, %c0_i32 : i32, i32
  }
  func.func @transform_1(%arg0: i32) -> (i32, i32, i32) {
    %c0_i32 = arith.constant 0 : i32
    %c0_i32_0 = arith.constant 0 : i32
    %c0_i32_1 = arith.constant 0 : i32
    %c0_i32_2 = arith.constant 0 : i32
    return %c0_i32, %c0_i32_0, %c0_i32_1 : i32, i32, i32
  }
  func.func @transform_2(%arg0: i32) -> (i32, i32) {
    %c0_i32 = arith.constant 0 : i32
    %c0_i32_0 = arith.constant 0 : i32
    %c0_i32_1 = arith.constant 0 : i32
    return %c0_i32, %c0_i32_0 : i32, i32
  }
  func.func @transform_3(%arg0: i32) -> (i32, i32) {
    %c0_i32 = arith.constant 0 : i32
    %c0_i32_0 = arith.constant 0 : i32
    %c0_i32_1 = arith.constant 0 : i32
    return %c0_i32, %c0_i32_0 : i32, i32
  }
  func.func @transform_4(%arg0: i32) -> (i32, i32) {
    %c0_i32 = arith.constant 0 : i32
    %c0_i32_0 = arith.constant 0 : i32
    %c0_i32_1 = arith.constant 0 : i32
    return %c0_i32, %c0_i32_0 : i32, i32
  }
  func.func @transform_5(%arg0: i32) -> (i32, i32) {
    %c0_i32 = arith.constant 0 : i32
    %c0_i32_0 = arith.constant 0 : i32
    return %arg0, %c0_i32 : i32, i32
  }
}

module attributes {stable_mosaic.version = 11 : i64} {
  func.func @_fc_heads_kernel(%arg0: i32, %arg1: memref<8x810xf32, #tpu.memory_space<vmem>>, %arg2: memref<810x50xf32, #tpu.memory_space<vmem>>, %arg3: memref<1x50xf32, #tpu.memory_space<vmem>>, %arg4: memref<50x30xf32, #tpu.memory_space<vmem>>, %arg5: memref<1x30xf32, #tpu.memory_space<vmem>>, %arg6: memref<8x30xf32, #tpu.memory_space<vmem>>) attributes {dimension_semantics = [#tpu.dimension_semantics<parallel>], iteration_bounds = array<i64: 1>, scalar_prefetch = 0 : i64, scratch_operands = 0 : i64, tpu.core_type = #tpu.core_type<tc>, window_params = [{transform_indices = @transform_0, window_bounds = array<i64: 8, 810>}, {pipeline_mode = #tpu.pipeline_mode<synchronous>, transform_indices = @transform_1, window_bounds = array<i64: 810, 50>}, {pipeline_mode = #tpu.pipeline_mode<synchronous>, transform_indices = @transform_2, window_bounds = array<i64: 1, 50>}, {pipeline_mode = #tpu.pipeline_mode<synchronous>, transform_indices = @transform_3, window_bounds = array<i64: 50, 30>}, {pipeline_mode = #tpu.pipeline_mode<synchronous>, transform_indices = @transform_4, window_bounds = array<i64: 1, 30>}, {transform_indices = @transform_5, window_bounds = array<i64: 8, 30>}]} {
    %c0 = arith.constant 0 : index
    %c0_0 = arith.constant 0 : index
    %0 = vector.load %arg1[%c0, %c0_0] : memref<8x810xf32, #tpu.memory_space<vmem>>, vector<8x810xf32>
    %c0_1 = arith.constant 0 : index
    %c0_2 = arith.constant 0 : index
    %1 = vector.load %arg2[%c0_1, %c0_2] : memref<810x50xf32, #tpu.memory_space<vmem>>, vector<810x50xf32>
    %cst = arith.constant dense<0.000000e+00> : vector<8x50xf32>
    %2 = tpu.matmul %0, %1, %cst {dimension_numbers = #tpu.dot_dimension_numbers<[1], [0], [0], [1], [0, 0, 1, 1], [], []>} : vector<8x810xf32>, vector<810x50xf32>, vector<8x50xf32> -> vector<8x50xf32>
    %c0_3 = arith.constant 0 : index
    %c0_4 = arith.constant 0 : index
    %3 = vector.load %arg3[%c0_3, %c0_4] : memref<1x50xf32, #tpu.memory_space<vmem>>, vector<1x50xf32>
    %4 = vector.broadcast %3 : vector<1x50xf32> to vector<8x50xf32>
    %5 = arith.addf %2, %4 : vector<8x50xf32>
    %c0_5 = arith.constant 0 : index
    %c0_6 = arith.constant 0 : index
    %6 = vector.load %arg4[%c0_5, %c0_6] : memref<50x30xf32, #tpu.memory_space<vmem>>, vector<50x30xf32>
    %cst_7 = arith.constant dense<0.000000e+00> : vector<8x30xf32>
    %7 = tpu.matmul %5, %6, %cst_7 {dimension_numbers = #tpu.dot_dimension_numbers<[1], [0], [0], [1], [0, 0, 1, 1], [], []>} : vector<8x50xf32>, vector<50x30xf32>, vector<8x30xf32> -> vector<8x30xf32>
    %c0_8 = arith.constant 0 : index
    %c0_9 = arith.constant 0 : index
    %8 = vector.load %arg5[%c0_8, %c0_9] : memref<1x30xf32, #tpu.memory_space<vmem>>, vector<1x30xf32>
    %9 = vector.broadcast %8 : vector<1x30xf32> to vector<8x30xf32>
    %10 = arith.addf %7, %9 : vector<8x30xf32>
    %c0_10 = arith.constant 0 : index
    %c0_11 = arith.constant 0 : index
    %11 = vector.load %arg6[%c0_10, %c0_11] : memref<8x30xf32, #tpu.memory_space<vmem>>, vector<8x30xf32>
    tpu.vector_store %arg6[%c0_10, %c0_11], %10 {strides = array<i32>} : memref<8x30xf32, #tpu.memory_space<vmem>>, vector<8x30xf32>,
    return
  }
  func.func @transform_0(%arg0: i32) -> (i32, i32) {
    %c0_i32 = arith.constant 0 : i32
    %c0_i32_0 = arith.constant 0 : i32
    return %arg0, %c0_i32 : i32, i32
  }
  func.func @transform_1(%arg0: i32) -> (i32, i32) {
    %c0_i32 = arith.constant 0 : i32
    %c0_i32_0 = arith.constant 0 : i32
    %c0_i32_1 = arith.constant 0 : i32
    return %c0_i32, %c0_i32_0 : i32, i32
  }
  func.func @transform_2(%arg0: i32) -> (i32, i32) {
    %c0_i32 = arith.constant 0 : i32
    %c0_i32_0 = arith.constant 0 : i32
    %c0_i32_1 = arith.constant 0 : i32
    return %c0_i32, %c0_i32_0 : i32, i32
  }
  func.func @transform_3(%arg0: i32) -> (i32, i32) {
    %c0_i32 = arith.constant 0 : i32
    %c0_i32_0 = arith.constant 0 : i32
    %c0_i32_1 = arith.constant 0 : i32
    return %c0_i32, %c0_i32_0 : i32, i32
  }
  func.func @transform_4(%arg0: i32) -> (i32, i32) {
    %c0_i32 = arith.constant 0 : i32
    %c0_i32_0 = arith.constant 0 : i32
    %c0_i32_1 = arith.constant 0 : i32
    return %c0_i32, %c0_i32_0 : i32, i32
  }
  func.func @transform_5(%arg0: i32) -> (i32, i32) {
    %c0_i32 = arith.constant 0 : i32
    %c0_i32_0 = arith.constant 0 : i32
    return %arg0, %c0_i32 : i32, i32
  }
}

</mosaic_0001>

<bundles_post_ra>
// kernel: tile.13
= control target key start
LH: loop header
LB: loop body
LE: loop exit
PB: predicated region body
PF: predicated region fallthrough
CT: control target
= control target key end

     0   :  { %s46_s0 = inlined_call_operand.vmem [shape: f32[10], index: 0, kind: input, shape index: {}]   ;;  %s47_s1 = inlined_call_operand.vmem [shape: f32[36,10], index: 1, kind: output, shape index: {}]  }
   0x1   :  { %v4_v0 = vld [vmem:[%s46_s0] ss:$0 sm:$0xff] }
   0x2   :  { %5 = vst [vmem:[%s47_s1] sm:$0xff] %v4_v0  ;;  %14 = vst [vmem:[%s47_s1 + $0x8] sm:$0xff] %v4_v0 }
   0x3   :  { %15 = vst [vmem:[%s47_s1 + $0x10] sm:$0xff] %v4_v0  ;;  %16 = vst [vmem:[%s47_s1 + $0x18] sm:$0xff] %v4_v0 }
   0x4   :  { %17 = vst [vmem:[%s47_s1 + $0x20] sm:$0xff] %v4_v0 }

// kernel: tile.14
= control target key start
LH: loop header
LB: loop body
LE: loop exit
PB: predicated region body
PF: predicated region fallthrough
CT: control target
= control target key end

     0   :  { %vm9_vm0 = vcmask 48128   ;;  %vm23_vm1 = vcmask 64512   ;;  %s344_s14 = smov 122   ;;  %s345_s15 = smov 112   ;;  %vm3_vm2 = vcmask 80896   ;;  %vm13_vm3 = vcmask 31744   ;;  %s512_s0 = inlined_call_operand.vmem [shape: f32[36,10], index: 0, kind: input, shape index: {}]   ;;  %s513_s1 = inlined_call_operand.vmem [shape: f32[1,360], index: 1, kind: output, shape index: {}]  }
   0x1   :  { %v270_v0 = vld [vmem:[%s512_s0 + $0x19] sm:$0x1]   ;;  %v274_v3 = vld [vmem:[%s512_s0 + $0x18] sm:$0x1]   ;;  %v272_v4 = vld [vmem:[%s512_s0 + $0xc] sm:$0x1]  }
   0x2   :  { %v271_v1 = vld [vmem:[%s512_s0 + $0x19] sm:$0x1]   ;;  %34 = vrot.lane.b32.xlu1 %v274_v3, %s345_s15  ;;  %v273_v5 = vld [vmem:[%s512_s0 + $0xc] sm:$0x1]   ;;  %v275_v7 = vld [vmem:[%s512_s0 + $0xb] sm:$0x1]  }
   0x3   :  { %v10_v2 = vsel %vm9_vm0, %v271_v1, %v270_v0  ;;  %v24_v6 = vsel %vm23_vm1, %v273_v5, %v272_v4  ;;  %s346_s20 = smov 120   ;;  %s347_s21 = smov 110   ;;  %v276_v8 = vld [vmem:[%s512_s0 + $0x17] sm:$0x1]   ;;  %v277_v9 = vld [vmem:[%s512_s0 + $0xa] sm:$0x1]  }
   0x4   :  { %11 = vrot.lane.b32.xlu0 %v10_v2, %s344_s14  ;;  %s348_s26 = smov 102   ;;  %s349_s27 = smov 100   ;;  %v278_v10 = vld [vmem:[%s512_s0 + $0x23] sm:$0x1]   ;;  %v279_v11 = vld [vmem:[%s512_s0 + $0x16] sm:$0x1]  }
   0x5   :  { %s350_s3 = smov 94   ;;  %s351_s4 = smov 92   ;;  %v280_v12 = vld [vmem:[%s512_s0 + $0x9] sm:$0x1]   ;;  %v281_v13 = vld [vmem:[%s512_s0 + $0x22] sm:$0x1]  }
   0x6   :  { %41 = vrot.lane.b32.xlu1 %v275_v7, %s347_s21  ;;  %s352_s9 = smov 90   ;;  %s353_s10 = smov 84   ;;  %v282_v14 = vld [vmem:[%s512_s0 + $0x15] sm:$0x1]   ;;  %v283_v15 = vld [vmem:[%s512_s0 + $0x8] sm:$0x1]  }
   0x7   :  { %v2_v16 = vld [vmem:[%s512_s0] sm:$0x1]   ;;  %s354_s17 = smov 82   ;;  %s355_s18 = smov 80   ;;  %v284_v17 = vld [vmem:[%s512_s0 + $0x21] sm:$0x1]  }
   0x8   :  { %25 = vrot.lane.b32.xlu0 %v24_v6, %s346_s20  ;;  %4 = vst.msk [vmem:[#allocation0] sm:$0x1] %vm3_vm2, %v2_v16   ;;  %v285_v18 = vld [vmem:[%s512_s0 + $0x14] sm:$0x1]   ;;  %s356_s23 = smov 74   ;;  %s357_s24 = smov 72  }
   0x9   :  { %v286_v19 = vld [vmem:[%s512_s0 + $0x7] sm:$0x1]   ;;  %v287_v20 = vld [vmem:[%s512_s0 + $0x20] sm:$0x1]   ;;  %s358_s29 = smov 70   ;;  %s359_s30 = smov 64  }
   0xa   :  { %54 = vrot.lane.b32.xlu1 %v277_v9, %s349_s27  ;;  %v288_v21 = vld [vmem:[%s512_s0 + $0x13] sm:$0x1]   ;;  %v289_v22 = vld [vmem:[%s512_s0 + $0x6] sm:$0x1]   ;;  %s360_s6 = smov 62   ;;  %s361_s7 = smov 60  }
   0xb   :  { %v290_v23 = vld [vmem:[%s512_s0 + $0x1f] sm:$0x1]   ;;  %v291_v24 = vld [vmem:[%s512_s0 + $0x12] sm:$0x1]   ;;  %s362_s12 = smov 54   ;;  %s363_s13 = smov 52  }
   0xc   :  { %47 = vrot.lane.b32.xlu0 %v276_v8, %s348_s26  ;;  %v292_v25 = vld [vmem:[%s512_s0 + $0x5] sm:$0x1]   ;;  %v293_v26 = vld [vmem:[%s512_s0 + $0x1e] sm:$0x1]   ;;  %s365_s19 = smov 44   ;;  %s367_s25 = smov 40  }
   0xd   :  { %v294_v27 = vld [vmem:[%s512_s0 + $0x11] sm:$0x1]   ;;  %v295_v28 = vld [vmem:[%s512_s0 + $0x4] sm:$0x1]   ;;  %v296_v29 = vld [vmem:[%s512_s0 + $0x1d] sm:$0x1]  }
   0xe   :  { %67 = vrot.lane.b32.xlu1 %v279_v11, %s351_s4  ;;  %v297_v30 = vld [vmem:[%s512_s0 + $0x10] sm:$0x1]   ;;  %s369_s2 = smov 32   ;;  %v298_v31 = vld [vmem:[%s512_s0 + $0x3] sm:$0x1]   ;;  %s371_s8 = smov 24  }
   0xf   :  { %v299_v32 = vld [vmem:[%s512_s0 + $0x1c] sm:$0x1]   ;;  %v300_v33 = vld [vmem:[%s512_s0 + $0xf] sm:$0x1]   ;;  %v301_v34 = vld [vmem:[%s512_s0 + $0x2] sm:$0x1]  }
  0x10   :  { %60 = vrot.lane.b32.xlu0 %v278_v10, %s350_s3  ;;  %s373_s14 = smov 20   ;;  %v302_v35 = vld [vmem:[%s512_s0 + $0x1b] sm:$0x1]   ;;  %v303_v36 = vld [vmem:[%s512_s0 + $0xe] sm:$0x1]   ;;  %s375_s20 = smov 12  }
  0x11   :  { %v304_v37 = vld [vmem:[%s512_s0 + $0x1] sm:$0x1]   ;;  %v305_v38 = vld [vmem:[%s512_s0 + $0x1a] sm:$0x1]   ;;  %s377_s26 = smov 4   ;;  %vm16_vm4 = vcmask 1048528  }
  0x12   :  { %80 = vrot.lane.b32.xlu1 %v281_v13, %s353_s10  ;;  %v306_v39 = vld [vmem:[%s512_s0 + $0xd] sm:$0x1]   ;;  %s378_s0 = smov 2   ;;  %vm27_vm5 = vcmask 15360   ;;  %vm30_vm6 = vcmask 1048512   ;;  %vm36_vm7 = vcmask 999296  }
  0x13   :  { %vm43_vm8 = vcmask 982896   ;;  %vm49_vm9 = vcmask 917296   ;;  %vm56_vm10 = vcmask 900896   ;;  %vm62_vm11 = vcmask 851696  }
  0x14   :  { %74 = vrot.lane.b32.xlu0 %v280_v12, %s352_s9  ;;  %vm69_vm12 = vcmask 835296   ;;  %vm76_vm13 = vcmask 818896   ;;  %vm82_vm14 = vcmask 769696   ;;  %vm89_vm15 = vcmask 753296  }
  0x15   :  { %vm96_vm0 = vcmask 736896   ;;  %vm102_vm1 = vcmask 687696   ;;  %vm109_vm2 = vcmask 671296  }
  0x16   :  { %94 = vrot.lane.b32.xlu1 %v283_v15, %s355_s18  ;;  %s364_s18 = smov 50  }
  0x18   :  { %87 = vrot.lane.b32.xlu0 %v282_v14, %s354_s17 }
  0x1a   :  { %107 = vrot.lane.b32.xlu1 %v285_v18, %s357_s24  ;;  %s366_s24 = smov 42  }
  0x1c   :  { %100 = vrot.lane.b32.xlu0 %v284_v17, %s356_s23 }
  0x1e   :  { %120 = vrot.lane.b32.xlu1 %v287_v20, %s359_s30  ;;  %s368_s30 = smov 34  }
  0x20   :  { %114 = vrot.lane.b32.xlu0 %v286_v19, %s358_s29 }
  0x22   :  { %134 = vrot.lane.b32.xlu1 %v289_v22, %s361_s7  ;;  %s370_s7 = smov 30  }
  0x24   :  { %127 = vrot.lane.b32.xlu0 %v288_v21, %s360_s6 }
  0x26   :  { %147 = vrot.lane.b32.xlu1 %v291_v24, %s363_s13  ;;  %s372_s13 = smov 22  }
  0x28   :  { %140 = vrot.lane.b32.xlu0 %v290_v23, %s362_s12 }
  0x2a   :  { %160 = vrot.lane.b32.xlu1 %v293_v26, %s365_s19  ;;  %s374_s19 = smov 14  }
  0x2c   :  { %154 = vrot.lane.b32.xlu0 %v292_v25, %s364_s18 }
  0x2e   :  { %174 = vrot.lane.b32.xlu1 %v295_v28, %s367_s25  ;;  %s376_s25 = smov 10  }
  0x30   :  { %167 = vrot.lane.b32.xlu0 %v294_v27, %s366_s24 }
  0x32   :  { %187 = vrot.lane.b32.xlu1 %v297_v30, %s369_s2 }
  0x34   :  { %180 = vrot.lane.b32.xlu0 %v296_v29, %s368_s30 }
  0x36   :  { %200 = vrot.lane.b32.xlu1 %v299_v32, %s371_s8 }
  0x38   :  { %194 = vrot.lane.b32.xlu0 %v298_v31, %s370_s7 }
  0x3a   :  { %214 = vrot.lane.b32.xlu1 %v301_v34, %s373_s14 }
  0x3c   :  { %207 = vrot.lane.b32.xlu0 %v300_v33, %s372_s13 }
  0x3e   :  { %227 = vrot.lane.b32.xlu1 %v303_v36, %s375_s20 }
  0x40   :  { %220 = vrot.lane.b32.xlu0 %v302_v35, %s374_s19 }
  0x42   :  { %240 = vrot.lane.b32.xlu1 %v305_v38, %s377_s26 }
  0x44   :  { %234 = vrot.lane.b32.xlu0 %v304_v37, %s376_s25 }
  0x48   :  { %247 = vrot.lane.b32.xlu0 %v306_v39, %s378_s0 }
  0x74   :  { %v35_v41 = vpop.permute.xlu1 %34  }
  0x76   :  { %v12_v40 = vpop.permute.xlu0 %11  }
  0x77   :  { %15 = vst.msk [vmem:[#allocation0 + $0x10] sm:$0x1] %vm13_vm3, %v12_v40   ;;  %vm116_vm3 = vcmask 654896  }
  0x78   :  { %18 = vst.msk [vmem:[#allocation0 + $0x8] sm:$0x1] %vm16_vm4, %v12_v40   ;;  %v42_v43 = vpop.permute.xlu1 %41   ;;  %vm122_vm4 = vcmask 605696  }
  0x7a   :  { %v26_v42 = vpop.permute.xlu0 %25  }
  0x7b   :  { %29 = vst.msk [vmem:[#allocation0 + $0x8] sm:$0x1] %vm27_vm5, %v26_v42   ;;  %vm129_vm5 = vcmask 589296  }
  0x7c   :  { %31 = vst.msk [vmem:[#allocation0] sm:$0x1] %vm30_vm6, %v26_v42   ;;  %v55_v45 = vpop.permute.xlu1 %54   ;;  %vm136_vm6 = vcmask 572896  }
  0x7d   :  { %38 = vst.msk [vmem:[#allocation0 + $0x8] sm:$0x1] %vm36_vm7, %v35_v41   ;;  %vm142_vm7 = vcmask 523696  }
  0x7e   :  { %44 = vst.msk [vmem:[#allocation0] sm:$0x1] %vm43_vm8, %v42_v43   ;;  %v48_v44 = vpop.permute.xlu0 %47   ;;  %vm149_vm8 = vcmask 507296  }
  0x7f   :  { %51 = vst.msk [vmem:[#allocation0 + $0x8] sm:$0x1] %vm49_vm9, %v48_v44   ;;  %vm156_vm9 = vcmask 490896  }
  0x80   :  { %57 = vst.msk [vmem:[#allocation0] sm:$0x1] %vm56_vm10, %v55_v45   ;;  %v68_v47 = vpop.permute.xlu1 %67   ;;  %vm162_vm10 = vcmask 441696  }
  0x81   :  { %71 = vst.msk [vmem:[#allocation0 + $0x8] sm:$0x1] %vm69_vm12, %v68_v47   ;;  %vm176_vm12 = vcmask 408896  }
  0x82   :  { %v61_v46 = vpop.permute.xlu0 %60  }
  0x83   :  { %64 = vst.msk [vmem:[#allocation0 + $0x10] sm:$0x1] %vm62_vm11, %v61_v46   ;;  %vm169_vm11 = vcmask 425296  }
  0x84   :  { %v81_v49 = vpop.permute.xlu1 %80  }
  0x85   :  { %84 = vst.msk [vmem:[#allocation0 + $0x10] sm:$0x1] %vm82_vm14, %v81_v49   ;;  %vm189_vm14 = vcmask 343296  }
  0x86   :  { %v75_v48 = vpop.permute.xlu0 %74  }
  0x87   :  { %77 = vst.msk [vmem:[#allocation0] sm:$0x1] %vm76_vm13, %v75_v48   ;;  %vm182_vm13 = vcmask 359696  }
  0x88   :  { %v95_v51 = vpop.permute.xlu1 %94  }
  0x89   :  { %97 = vst.msk [vmem:[#allocation0] sm:$0x1] %vm96_vm0, %v95_v51   ;;  %vm202_vm0 = vcmask 277696  }
  0x8a   :  { %v88_v50 = vpop.permute.xlu0 %87  }
  0x8b   :  { %91 = vst.msk [vmem:[#allocation0 + $0x8] sm:$0x1] %vm89_vm15, %v88_v50   ;;  %vm196_vm15 = vcmask 326896  }
  0x8c   :  { %v108_v53 = vpop.permute.xlu1 %107  }
  0x8d   :  { %111 = vst.msk [vmem:[#allocation0 + $0x8] sm:$0x1] %vm109_vm2, %v108_v53   ;;  %vm216_vm2 = vcmask 244896  }
  0x8e   :  { %v101_v52 = vpop.permute.xlu0 %100  }
  0x8f   :  { %104 = vst.msk [vmem:[#allocation0 + $0x10] sm:$0x1] %vm102_vm1, %v101_v52   ;;  %vm209_vm1 = vcmask 261296  }
  0x90   :  { %v121_v55 = vpop.permute.xlu1 %120  }
  0x91   :  { %124 = vst.msk [vmem:[#allocation0 + $0x10] sm:$0x1] %vm122_vm4, %v121_v55   ;;  %vm229_vm4 = vcmask 179296  }
  0x92   :  { %v115_v54 = vpop.permute.xlu0 %114  }
  0x93   :  { %117 = vst.msk [vmem:[#allocation0] sm:$0x1] %vm116_vm3, %v115_v54   ;;  %vm222_vm3 = vcmask 195696  }
  0x94   :  { %v135_v57 = vpop.permute.xlu1 %134  }
  0x95   :  { %137 = vst.msk [vmem:[#allocation0] sm:$0x1] %vm136_vm6, %v135_v57   ;;  %vm242_vm6 = vcmask 113696  }
  0x96   :  { %v128_v56 = vpop.permute.xlu0 %127  }
  0x97   :  { %131 = vst.msk [vmem:[#allocation0 + $0x8] sm:$0x1] %vm129_vm5, %v128_v56   ;;  %vm236_vm5 = vcmask 162896  }
  0x98   :  { %v148_v59 = vpop.permute.xlu1 %147  }
  0x99   :  { %151 = vst.msk [vmem:[#allocation0 + $0x8] sm:$0x1] %vm149_vm8, %v148_v59  }
  0x9a   :  { %v141_v58 = vpop.permute.xlu0 %140  }
  0x9b   :  { %144 = vst.msk [vmem:[#allocation0 + $0x10] sm:$0x1] %vm142_vm7, %v141_v58   ;;  %vm249_vm7 = vcmask 97296  }
  0x9c   :  { %v161_v61 = vpop.permute.xlu1 %160  }
  0x9d   :  { %164 = vst.msk [vmem:[#allocation0 + $0x10] sm:$0x1] %vm162_vm10, %v161_v61  }
  0x9e   :  { %v155_v60 = vpop.permute.xlu0 %154  }
  0x9f   :  { %157 = vst.msk [vmem:[#allocation0] sm:$0x1] %vm156_vm9, %v155_v60  }
  0xa0   :  { %v175_v63 = vpop.permute.xlu1 %174  }
  0xa1   :  { %177 = vst.msk [vmem:[#allocation0] sm:$0x1] %vm176_vm12, %v175_v63  }
  0xa2   :  { %v168_v62 = vpop.permute.xlu0 %167  }
  0xa3   :  { %171 = vst.msk [vmem:[#allocation0 + $0x8] sm:$0x1] %vm169_vm11, %v168_v62  }
  0xa4   :  { %v188_v1 = vpop.permute.xlu1 %187  }
  0xa5   :  { %191 = vst.msk [vmem:[#allocation0 + $0x8] sm:$0x1] %vm189_vm14, %v188_v1  }
  0xa6   :  { %v181_v0 = vpop.permute.xlu0 %180  }
  0xa7   :  { %184 = vst.msk [vmem:[#allocation0 + $0x10] sm:$0x1] %vm182_vm13, %v181_v0  }
  0xa8   :  { %v201_v3 = vpop.permute.xlu1 %200  }
  0xa9   :  { %204 = vst.msk [vmem:[#allocation0 + $0x10] sm:$0x1] %vm202_vm0, %v201_v3  }
  0xaa   :  { %v195_v2 = vpop.permute.xlu0 %194  }
  0xab   :  { %197 = vst.msk [vmem:[#allocation0] sm:$0x1] %vm196_vm15, %v195_v2  }
  0xac   :  { %v215_v5 = vpop.permute.xlu1 %214  }
  0xad   :  { %217 = vst.msk [vmem:[#allocation0] sm:$0x1] %vm216_vm2, %v215_v5  }
  0xae   :  { %v208_v4 = vpop.permute.xlu0 %207  }
  0xaf   :  { %211 = vst.msk [vmem:[#allocation0 + $0x8] sm:$0x1] %vm209_vm1, %v208_v4  }
  0xb0   :  { %v228_v7 = vpop.permute.xlu1 %227  }
  0xb1   :  { %231 = vst.msk [vmem:[#allocation0 + $0x8] sm:$0x1] %vm229_vm4, %v228_v7  }
  0xb2   :  { %v221_v6 = vpop.permute.xlu0 %220  }
  0xb3   :  { %224 = vst.msk [vmem:[#allocation0 + $0x10] sm:$0x1] %vm222_vm3, %v221_v6  }
  0xb4   :  { %v241_v9 = vpop.permute.xlu1 %240  }
  0xb5   :  { %244 = vst.msk [vmem:[#allocation0 + $0x10] sm:$0x1] %vm242_vm6, %v241_v9  }
  0xb6   :  { %v235_v8 = vpop.permute.xlu0 %234  }
  0xb7   :  { %237 = vst.msk [vmem:[#allocation0] sm:$0x1] %vm236_vm5, %v235_v8  }
  0xba   :  { %v248_v10 = vpop.permute.xlu0 %247  }
  0xbb   :  { %251 = vst.msk [vmem:[#allocation0 + $0x8] sm:$0x1] %vm249_vm7, %v248_v10  }
  0xbc   :  { %v264_v12 = vld [vmem:[#allocation0 + $0x10] sm:$0x1] }
  0xbd   :  { %308 = vst [vmem:[%s513_s1 + $0x2] sm:$0x1] %v264_v12 }
  0xbe   :  { %v255_v11 = vld [vmem:[#allocation0] sm:$0x1] }
  0xbf   :  { %257 = vst [vmem:[%s513_s1] sm:$0x1] %v255_v11 }
  0xc2   :  { %v259_v13 = vld [vmem:[#allocation0 + $0x8] sm:$0x1] }
  0xc3   :  { %307 = vst [vmem:[%s513_s1 + $0x1] sm:$0x1] %v259_v13 }

// kernel: cnn_model_forward.3
= control target key start
LH: loop header
LB: loop body
LE: loop exit
PB: predicated region body
PF: predicated region fallthrough
CT: control target
= control target key end

     0   :  { %s1931_s18 = smov 0   ;;  %s2571_s0 = inlined_call_operand.vmem [shape: f32[80,38], index: 0, kind: input, shape index: {}]   ;;  %s2572_s1 = inlined_call_operand.vmem [shape: f32[3,38,360], index: 1, kind: input, shape index: {}]   ;;  %s2573_s2 = inlined_call_operand.vmem [shape: f32[1,360], index: 2, kind: input, shape index: {}]   ;;  %s2574_s3 = inlined_call_operand.vmem [shape: f32[360,180], index: 3, kind: input, shape index: {}]   ;;  %s2575_s4 = inlined_call_operand.vmem [shape: f32[24,38], index: 4, kind: input, shape index: {}]   ;;  %s2576_s5 = inlined_call_operand.vmem [shape: f32[48,200], index: 5, kind: output, shape index: {}]  }
   0x1 LB: > { %s1496_s19 = sadd.s32 4294967295, %s1894_s18   ;;  %p1500_p0 = scmp.ge.s32.totalorder %s1894_s18, 1  ;;  %s1894_s18 = sphi %s1931_s18, %s15_s18  }
   0x2   : > { %p188_p1 = scmp.lt.s32.totalorder %s1894_s18, 3 }
   0x4   : > { %p189_p2 = pnand %p1500_p0, %p188_p1 }
   0x5   : > { %v1505_v0 = vld [vmem:[%s2572_s1 + $0x80] sm:$0xff] (!%p189_p2)  ;;  %v1508_v1 = vld [vmem:[%s2572_s1 + $0x98] sm:$0xff] (!%p189_p2)  ;;  %s217_s26 = smul.u32 (!%p189_p2), 5, %s1496_s19  ;;  %v1507_v4 = vld [vmem:[%s2572_s1 + $0x90] sm:$0xff] (!%p189_p2)  ;;  %v1896_v7 = vmov (!%p189_p2), 0.0   ;;  %vm287_vm0 = vcmask (!%p189_p2), 1045504  }
   0x6   : > { %192 = sbr.rel (%p189_p2) target bundleno = 863 (0x35f), region = 40  ;;  %v1504_v2 = vld [vmem:[%s2572_s1 + $0x78] sm:$0xff] (!%p189_p2)  ;;  %v1701_v3 = vpack.c.bf16 (!%p189_p2), %v1508_v1, %v1505_v0  ;;  %v1511_v5 = vld [vmem:[%s2572_s1 + $0xb0] sm:$0xff] (!%p189_p2)  ;;  %v1514_v6 = vld [vmem:[%s2572_s1 + $0xc8] sm:$0xff] (!%p189_p2)  ;;  %361 = vmatprep.mubr.f32.mxu0 (!%p189_p2), %v1896_v7  ;;  %379 = vmatprep.mubr.f32.mxu1 (!%p189_p2), %v1896_v7  ;;  %vm271_vm1 = vcmask (!%p189_p2), 310272   ;;  %v1897_v32 = vmov (!%p189_p2), 0.0|0.0  }
   0x7   : > { %v1703_v8 = vpack.c.bf16 (!%p189_p2), %v1507_v4, %v1504_v2  ;;  %v1705_v9 = vpack.c.bf16 (!%p189_p2), %v1514_v6, %v1511_v5  ;;  %v1510_v10 = vld [vmem:[%s2572_s1 + $0xa8] sm:$0xff] (!%p189_p2)  ;;  %v1513_v11 = vld [vmem:[%s2572_s1 + $0xc0] sm:$0xff] (!%p189_p2)  ;;  %p218_p3 = scmp.lt.s32.totalorder (!%p189_p2), %s217_s26, 9  ;;  %v1516_v18 = vld [vmem:[%s2572_s1 + $0xd8] sm:$0x3f] (!%p189_p2)  ;;  %vm1898_vm2 = vmmov (!%p189_p2), 0  }
   0x8   : > { %1702 = vmatprep.subr.bf16.mxu0 (!%p189_p2), %v1701_v3  ;;  %1839 = vmatprep.subr.bf16.mxu1 (!%p189_p2), %v1701_v3  ;;  %v1707_v12 = vpack.c.bf16 (!%p189_p2), %v1513_v11, %v1510_v10  ;;  %v1517_v13 = vld [vmem:[%s2572_s1 + $0xe0] sm:$0x3f] (!%p189_p2)  ;;  %v236_v14 = vld [vmem:[%s2572_s1 + $0x8] sm:$0xff] (!%p189_p2)  ;;  %v238_v20 = vld [vmem:[%s2572_s1 + $0x18] sm:$0xff] (!%p189_p2)  ;;  %vm1088_vm13 = vcmask (!%p189_p2), 850944   ;;  %s223_s6 = smul.u32 (!%p189_p2), 3, %s1496_s19 }
   0x9   : > { %1704 = vmatpush1.bf16.msra.mxu0 (!%p189_p2), %v1703_v8  ;;  %1842 = vmatpush1.bf16.msra.mxu1 (!%p189_p2), %v1703_v8  ;;  %v239_v15 = vld [vmem:[%s2572_s1 + $0x20] sm:$0xff] (!%p189_p2)  ;;  %v1506_v16 = vld [vmem:[%s2572_s1 + $0x88] sm:$0xff] (!%p189_p2)  ;;  %v242_v25 = vld [vmem:[%s2572_s1 + $0x38] sm:$0xff] (!%p189_p2)  ;;  %s1900_s19 = smov (!%p189_p2), 10  }
   0xa   : > { %1706 = vmatprep.subr.bf16.mxu0 (!%p189_p2), %v1705_v9  ;;  %1840 = vmatprep.subr.bf16.mxu1 (!%p189_p2), %v1705_v9  ;;  %v1509_v17 = vld [vmem:[%s2572_s1 + $0xa0] sm:$0xff] (!%p189_p2)  ;;  %v1715_v23 = vpack.c.bf16 (!%p189_p2), %v239_v15, %v236_v14  ;;  %v245_v26 = vld [vmem:[%s2572_s1 + $0x50] sm:$0xff] (!%p189_p2)  ;;  %v1512_v28 = vld [vmem:[%s2572_s1 + $0xb8] sm:$0xff] (!%p189_p2)  ;;  %p224_p4 = scmp.lt.s32.totalorder (!%p189_p2), %s223_s6, 5 }
   0xb   : > { %v235_v19 = vld [vmem:[%s2572_s1] sm:$0xff] (!%p189_p2)  ;;  %v1710_v24 = vpack.c.bf16 (!%p189_p2), %v1509_v17, %v1506_v16  ;;  %v1515_v29 = vld [vmem:[%s2572_s1 + $0xd0] sm:$0xff] (!%p189_p2)  ;;  %v244_v31 = vld [vmem:[%s2572_s1 + $0x48] sm:$0xff] (!%p189_p2)  ;;  %v1719_v34 = vpack.c.bf16 (!%p189_p2), %v245_v26, %v242_v25 }
   0xc   : > { %v1717_v27 = vpack.c.bf16 (!%p189_p2), %v238_v20, %v235_v19  ;;  %v241_v30 = vld [vmem:[%s2572_s1 + $0x30] sm:$0xff] (!%p189_p2)  ;;  %v1713_v36 = vpack.c.bf16 (!%p189_p2), %v1515_v29, %v1512_v28  ;;  %v1518_v39 = vld [vmem:[%s2572_s1 + $0xe8] sm:$0x3f] (!%p189_p2)  ;;  %v1546_v43 = vld [vmem:[%s2572_s1 + $0xf8] sm:$0xff] (!%p189_p2) }
   0xd   : > { %s2578_s26 = smov (!%p218_p3, %s217_s26), 9  ;;  %1708 = vmatpush1.bf16.msra.mxu0 %v1707_v12  ;;  %1843 = vmatpush1.bf16.msra.mxu1 %v1707_v12  ;;  %v1721_v37 = vpack.c.bf16 %v244_v31, %v241_v30  ;;  %v248_v40 = vld [vmem:[%s2572_s1 + $0x68] sm:$0x3f]  ;;  %v237_v41 = vld [vmem:[%s2572_s1 + $0x10] sm:$0xff]  ;;  %v247_v45 = vld [vmem:[%s2572_s1 + $0x60] sm:$0x3f] }
   0xe   : > { %s1501_s14 = sshll.u32 %s2578_s26, 3  ;;  %1519 = vmatprep.subr.msk.mxu0 %vm287_vm0, %v1517_v13  ;;  %1841 = vmatprep.subr.msk.mxu1 %vm287_vm0, %v1517_v13  ;;  %v240_v42 = vld [vmem:[%s2572_s1 + $0x28] sm:$0xff]  ;;  %v1549_v44 = vld [vmem:[%s2572_s1 + $0x110] sm:$0xff]  ;;  %v243_v51 = vld [vmem:[%s2572_s1 + $0x40] sm:$0xff]  ;;  %s2580_s6 = smov (!%p224_p4, %s223_s6), 5 }
   0xf   : > { %s1973_s17 = scalar_lea.vmem %s2571_s0, %s1501_s14  ;;  %v1545_v46 = vld [vmem:[%s2572_s1 + $0xf0] sm:$0xff]  ;;  %v1548_v47 = vld [vmem:[%s2572_s1 + $0x108] sm:$0xff]  ;;  %v1724_v49 = vpack.c.bf16 %v240_v42, %v237_v41  ;;  %v1729_v50 = vpack.c.bf16 %v1549_v44, %v1546_v43  ;;  %v246_v53 = vld [vmem:[%s2572_s1 + $0x58] sm:$0xff]  ;;  %s1595_s7 = sshll.u32 %s2580_s6, 4 }
  0x10   : > { %v250_v21 = vld [vmem:[%s1973_s17 + $0x1] sm:$0xff]  ;;  %v2000_v22 = vld [vmem:[%s1973_s17 + $0x19] sm:$0xff]  ;;  %v251_v33 = vld [vmem:[%s1973_s17 + $0x9] sm:$0xff]  ;;  %v1731_v52 = vpack.c.bf16 %v1548_v47, %v1545_v46  ;;  %v1727_v59 = vpack.c.bf16 %v246_v53, %v243_v51  ;;  %s2548_s10 = scalar_lea.vmem %s2576_s5, %s1595_s7 }
  0x11   : > { %1520 = vmatpush1.msk.msra.mxu0 %vm287_vm0, %v1516_v18  ;;  %1844 = vmatpush1.msk.msra.mxu1 %vm287_vm0, %v1516_v18  ;;  %v2029_v35 = vld [vmem:[%s1973_s17 + $0x21] sm:$0x3f]  ;;  %v252_v38 = vld [vmem:[%s1973_s17 + $0x11] sm:$0xff]  ;;  %v1552_v54 = vld [vmem:[%s2572_s1 + $0x128] sm:$0xff]  ;;  %1395 = vst [vmem:[%s2548_s10] sm:$0xff] %v1896_v7 }
  0x12   : > { %1521 = vmatmul.mubr.msk.f32.vlgmr.msra.gmra.mrb[0].mxu0 %vm271_vm1, %v250_v21  ;;  %1524 = vmatmul.mubr.msk.f32.vlgmr.msra.gmra.mrb[0].mxu1 %vm271_vm1, %v2000_v22  ;;  %v2072_v48 = vld [vmem:[%s1973_s17] sm:$0xff]  ;;  %v1554_v57 = vld [vmem:[%s2572_s1 + $0x138] sm:$0xff]  ;;  %v2101_v58 = vld [vmem:[%s1973_s17 + $0x8] sm:$0xff]  ;;  %1398 = vst [vmem:[%s2548_s10 + $0x10] sm:$0xff] %v1896_v7 }
  0x13   : > { %1709 = vmatprep.subr.bf16.mxu1 %v1897_v32  ;;  %1716 = vmatprep.subr.bf16.mxu0 %v1715_v23  ;;  %v1555_v55 = vld [vmem:[%s2572_s1 + $0x140] sm:$0xff]  ;;  %v2111_v62 = vld [vmem:[%s1973_s17 + $0x10] sm:$0xff]  ;;  %v1558_v0 = vld [vmem:[%s2572_s1 + $0x158] sm:$0x3f]  ;;  %1400 = vst [vmem:[%s2548_s10 + $0x20] sm:$0xff] %v1896_v7 }
  0x14   : > { %1711 = vmatpush3.bf16.msra.mxu1 %v1710_v24  ;;  %367 = vmatprep.mubr.f32.mxu0 %v1896_v7  ;;  %v1551_v56 = vld [vmem:[%s2572_s1 + $0x120] sm:$0xff]  ;;  %v1733_v60 = vpack.c.bf16 %v1555_v55, %v1552_v54  ;;  %v249_v63 = vld [vmem:[%s2572_s1 + $0x70] sm:$0x3f]  ;;  %v999_v1 = vld [vmem:[%s2574_s3 + $0x8] sm:$0xff] }
  0x15   : > { %1718 = vmatpush1.bf16.msra.mxu0 %v1717_v27  ;;  %385 = vmatprep.mubr.f32.mxu1 %v1896_v7  ;;  %v1735_v61 = vpack.c.bf16 %v1554_v57, %v1551_v56  ;;  %v1001_v2 = vld [vmem:[%s2574_s3 + $0x18] sm:$0xff]  ;;  %v1557_v3 = vld [vmem:[%s2572_s1 + $0x150] sm:$0x3f]  ;;  %v2150_v6 = vld [vmem:[%s1973_s17 + $0x20] sm:$0x3f] }
  0x16   : > { %1522 = vmatmul.mubr.msk.f32.gmra.mrb[2].mxu0 %vm271_vm1, %v251_v33  ;;  %1712 = vmatprep.subr.bf16.mxu1 %v1897_v32  ;;  %v2136_v4 = vld [vmem:[%s1973_s17 + $0x18] sm:$0xff]  ;;  %v1743_v5 = vpack.c.bf16 %v1001_v2, %v999_v1  ;;  %v1547_v8 = vld [vmem:[%s2572_s1 + $0x100] sm:$0xff]  ;;  %v1000_v11 = vld [vmem:[%s2574_s3 + $0x10] sm:$0xff] }
  0x17   : > { %1525 = vmatmul.mubr.msk.f32.gmra.mrb[2].mxu1 %vm271_vm1, %v2029_v35  ;;  %1720 = vmatprep.subr.bf16.mxu0 %v1719_v34  ;;  %v1550_v9 = vld [vmem:[%s2572_s1 + $0x118] sm:$0xff]  ;;  %v998_v10 = vld [vmem:[%s2574_s3] sm:$0xff]  ;;  %v1003_v12 = vld [vmem:[%s2574_s3 + $0x28] sm:$0xff] }
  0x18   : > { %1714 = vmatpush3.bf16.msra.mxu1 %v1713_v36  ;;  %373 = vmatprep.mubr.f32.mxu0 %v1896_v7  ;;  %v1005_v13 = vld [vmem:[%s2574_s3 + $0x38] sm:$0xff]  ;;  %v2179_v14 = vld [vmem:[%s1973_s17 + $0x2] sm:$0xff]  ;;  %v1738_v15 = vpack.c.bf16 %v1550_v9, %v1547_v8  ;;  %v1553_v16 = vld [vmem:[%s2572_s1 + $0x130] sm:$0xff]  ;;  %v1745_v18 = vpack.c.bf16 %v1000_v11, %v998_v10 }
  0x19   : > { %1722 = vmatpush1.bf16.msra.mxu0 %v1721_v37  ;;  %1634 = vmatprep.subr.mxu1 %v1896_v7  ;;  %v1556_v17 = vld [vmem:[%s2572_s1 + $0x148] sm:$0xff]  ;;  %v1747_v19 = vpack.c.bf16 %v1005_v13, %v1003_v12  ;;  %v1002_v20 = vld [vmem:[%s2574_s3 + $0x20] sm:$0xff]  ;;  %v1009_v23 = vld [vmem:[%s2574_s3 + $0x58] sm:$0xff] }
  0x1a   : > { %1523 = vmatmul.mubr.msk.f32.gmra.mrb[4].mxu0 %vm271_vm1, %v252_v38  ;;  %1636 = vmatprep.mubr.msk.f32.mxu1 %vm1898_vm2, %v1896_v7  ;;  %v2207_v24 = vld [vmem:[%s1973_s17 + $0xa] sm:$0xff]  ;;  %v1741_v25 = vpack.c.bf16 %v1556_v17, %v1553_v16  ;;  %v1006_v28 = vld [vmem:[%s2574_s3 + $0x40] sm:$0xff]  ;;  %v1013_v31 = vld [vmem:[%s2574_s3 + $0x78] sm:$0xff] }
  0x1b   : > { %1532 = vmatprep.subr.msk.mxu0 %vm287_vm0, %v248_v40  ;;  %570 = vmatprep.mubr.f32.mxu0 %v1896_v7  ;;  %v1008_v29 = vld [vmem:[%s2574_s3 + $0x50] sm:$0xff]  ;;  %v1011_v30 = vld [vmem:[%s2574_s3 + $0x68] sm:$0xff]  ;;  %v1010_v36 = vld [vmem:[%s2574_s3 + $0x60] sm:$0xff] }
  0x1c   : > { %1635 = vmatpush3.msk.msra.mxu1 %vm287_vm0, %v1518_v39  ;;  %v1753_v34 = vpack.c.bf16 %v1008_v29, %v1006_v28  ;;  %v1012_v37 = vld [vmem:[%s2574_s3 + $0x70] sm:$0xff]  ;;  %v1017_v39 = vld [vmem:[%s2574_s3 + $0x98] sm:$0xff]  ;;  %v1014_v43 = vld [vmem:[%s2574_s3 + $0x80] sm:$0xff] }
  0x1d   : > { %1637 = vmatmul.mubr.msk.f32.vlgmr.msra.gmra.mrb[4].mxu1 %vm271_vm1, %v250_v21  ;;  %1533 = vmatpush1.msk.msra.mxu0 %vm287_vm0, %v247_v45  ;;  %v1004_v21 = vld [vmem:[%s2574_s3 + $0x30] sm:$0xff]  ;;  %v694_v40 = vld [vmem:[%s1973_s17 + $0x1a] sm:$0xff]  ;;  %v1757_v41 = vpack.c.bf16 %v1012_v37, %v1010_v36  ;;  %v1019_v45 = vld [vmem:[%s2574_s3 + $0xa8] sm:$0xff] }
  0x1e   : > { %1534 = vmatmul.mubr.msk.f32.vlgmr.msra.gmra.mrb[0].mxu0 %vm271_vm1, %v2072_v48  ;;  %1639 = vmatprep.mubr.msk.f32.mxu1 %vm1898_vm2, %v1896_v7  ;;  %v1749_v26 = vpack.c.bf16 %v1004_v21, %v1002_v20  ;;  %v1016_v44 = vld [vmem:[%s2574_s3 + $0x90] sm:$0xff]  ;;  %v1021_v46 = vld [vmem:[%s2574_s3 + $0xb8] sm:$0xff]  ;;  %v695_v47 = vld [vmem:[%s1973_s17 + $0x22] sm:$0x3f] }
  0x1f   : > { %576 = vmatprep.mubr.f32.mxu0 %v1896_v7  ;;  %1723 = vmatprep.subr.bf16.mxu1 %v1897_v32  ;;  %v1020_v51 = vld [vmem:[%s2574_s3 + $0xb0] sm:$0xff]  ;;  %v1025_v53 = vld [vmem:[%s2574_s3 + $0xd8] sm:$0xff]  ;;  %v1022_v56 = vld [vmem:[%s2574_s3 + $0xc0] sm:$0xff] }
  0x20   : > { %1725 = vmatpush3.bf16.msra.mxu1 %v1724_v49  ;;  %1730 = vmatprep.subr.bf16.mxu0 %v1729_v50  ;;  %v1763_v49 = vpack.c.bf16 %v1021_v46, %v1019_v45  ;;  %v1018_v50 = vld [vmem:[%s2574_s3 + $0xa0] sm:$0xff]  ;;  %v1024_v57 = vld [vmem:[%s2574_s3 + $0xd0] sm:$0xff]  ;;  %v1031_v1 = vld [vmem:[%s2574_s3 + $0x108] sm:$0xff] }
  0x21   : > { %1640 = vmatmul.mubr.msk.f32.gmra.mrb[6].mxu1 %vm271_vm1, %v251_v33  ;;  %1732 = vmatpush1.bf16.msra.mxu0 %v1731_v52  ;;  %v1559_v33 = vld [vmem:[%s2572_s1 + $0x160] sm:$0x3f]  ;;  %v1023_v52 = vld [vmem:[%s2574_s3 + $0xc8] sm:$0xff]  ;;  %v1765_v54 = vpack.c.bf16 %v1020_v51, %v1018_v50  ;;  %v1033_v2 = vld [vmem:[%s2574_s3 + $0x118] sm:$0xff] }
  0x22   : > { %1535 = vmatmul.mubr.msk.f32.gmra.mrb[2].mxu0 %vm271_vm1, %v2101_v58  ;;  %1642 = vmatprep.mubr.msk.f32.mxu1 %vm1898_vm2, %v1896_v7  ;;  %v1767_v55 = vpack.c.bf16 %v1025_v53, %v1023_v52  ;;  %v1035_v8 = vld [vmem:[%s2574_s3 + $0x128] sm:$0xff]  ;;  %v1037_v9 = vld [vmem:[%s2574_s3 + $0x138] sm:$0xff]  ;;  %v1034_v11 = vld [vmem:[%s2574_s3 + $0x120] sm:$0xff] }
  0x23   : > { %582 = vmatprep.mubr.f32.mxu0 %v1896_v7  ;;  %1726 = vmatprep.subr.bf16.mxu1 %v1897_v32  ;;  %v1779_v10 = vpack.c.bf16 %v1037_v9, %v1035_v8  ;;  %v1036_v12 = vld [vmem:[%s2574_s3 + $0x130] sm:$0xff]  ;;  %v1038_v17 = vld [vmem:[%s2574_s3 + $0x140] sm:$0xff]  ;;  %v1043_v20 = vld [vmem:[%s2574_s3 + $0x168] sm:$0xff] }
  0x24   : > { %1728 = vmatpush3.bf16.msra.mxu1 %v1727_v59  ;;  %1734 = vmatprep.subr.bf16.mxu0 %v1733_v60  ;;  %v1027_v59 = vld [vmem:[%s2574_s3 + $0xe8] sm:$0xff]  ;;  %v1029_v60 = vld [vmem:[%s2574_s3 + $0xf8] sm:$0xff]  ;;  %v1781_v13 = vpack.c.bf16 %v1036_v12, %v1034_v11  ;;  %v1046_v29 = vld [vmem:[%s2574_s3 + $0x180] sm:$0xff] }
  0x25   : > { %1643 = vmatmul.mubr.msk.f32.gmra.mrb[8].mxu1 %vm271_vm1, %v252_v38  ;;  %1736 = vmatpush1.bf16.msra.mxu0 %v1735_v61  ;;  %v1015_v38 = vld [vmem:[%s2574_s3 + $0x88] sm:$0xff]  ;;  %v1771_v61 = vpack.c.bf16 %v1029_v60, %v1027_v59  ;;  %v1045_v21 = vld [vmem:[%s2574_s3 + $0x178] sm:$0xff]  ;;  %v1052_v36 = vld [vmem:[%s2574_s3 + $0x1b0] sm:$0xff] }
  0x26   : > { %1536 = vmatmul.mubr.msk.f32.gmra.mrb[4].mxu0 %vm271_vm1, %v2111_v62  ;;  %1645 = vmatprep.mubr.msk.f32.mxu1 %vm1898_vm2, %v1896_v7  ;;  %v1759_v42 = vpack.c.bf16 %v1017_v39, %v1015_v38  ;;  %v1055_v38 = vld [vmem:[%s2574_s3 + $0x1c8] sm:$0xff]  ;;  %v1057_v39 = vld [vmem:[%s2574_s3 + $0x1d8] sm:$0xff]  ;;  %v1062_v46 = vld [vmem:[%s2574_s3 + $0x200] sm:$0xff] }
  0x27   : > { %588 = vmatprep.mubr.f32.mxu0 %v1896_v7  ;;  %1659 = vmatprep.subr.mxu1 %v1896_v7  ;;  %v1065_v45 = vld [vmem:[%s2574_s3 + $0x218] sm:$0xff]  ;;  %v1059_v50 = vld [vmem:[%s2574_s3 + $0x1e8] sm:$0xff]  ;;  %v1058_v53 = vld [vmem:[%s2574_s3 + $0x1e0] sm:$0xff] }
  0x28   : > { %1660 = vmatpush3.msk.msra.mxu1 %vm287_vm0, %v249_v63  ;;  %1560 = vmatprep.subr.msk.mxu0 %vm287_vm0, %v1558_v0  ;;  %v1028_v63 = vld [vmem:[%s2574_s3 + $0xf0] sm:$0xff]  ;;  %v1061_v51 = vld [vmem:[%s2574_s3 + $0x1f8] sm:$0xff]  ;;  %v1074_v8 = vld [vmem:[%s2574_s3 + $0x260] sm:$0xff] }
  0x29   : > { %1646 = vmatmul.mubr.msk.f32.gmra.mrb[10].mxu1 %vm271_vm1, %v2000_v22  ;;  %1561 = vmatpush1.msk.msra.mxu0 %vm287_vm0, %v1557_v3  ;;  %v1007_v22 = vld [vmem:[%s2574_s3 + $0x48] sm:$0xff]  ;;  %v1775_v3 = vpack.c.bf16 %v1033_v2, %v1031_v1  ;;  %v1803_v52 = vpack.c.bf16 %v1061_v51, %v1059_v50  ;;  %v1068_v59 = vld [vmem:[%s2574_s3 + $0x230] sm:$0xff]  ;;  %v1070_v1 = vld [vmem:[%s2574_s3 + $0x240] sm:$0xff] }
  0x2a   : > { %1537 = vmatmul.mubr.msk.f32.gmra.mrb[6].mxu0 %vm271_vm1, %v2136_v4  ;;  %1648 = vmatprep.mubr.msk.f32.mxu1 %vm1898_vm2, %v1896_v7  ;;  %v1751_v27 = vpack.c.bf16 %v1009_v23, %v1007_v22  ;;  %v1787_v22 = vpack.c.bf16 %v1045_v21, %v1043_v20  ;;  %v1042_v23 = vld [vmem:[%s2574_s3 + $0x160] sm:$0xff]  ;;  %v1072_v2 = vld [vmem:[%s2574_s3 + $0x250] sm:$0xff]  ;;  %v1079_v11 = vld [vmem:[%s2574_s3 + $0x288] sm:$0xff] }
  0x2b   : > { %594 = vmatprep.mubr.f32.mxu0 %v1896_v7  ;;  %1737 = vmatprep.subr.bf16.mxu1 %v1897_v32  ;;  %v1076_v9 = vld [vmem:[%s2574_s3 + $0x270] sm:$0xff]  ;;  %v1081_v12 = vld [vmem:[%s2574_s3 + $0x298] sm:$0xff]  ;;  %v1082_v20 = vld [vmem:[%s2574_s3 + $0x2a0] sm:$0xff] }
  0x2c   : > { %1744 = vmatprep.subr.bf16.mxu0 %v1743_v5  ;;  %v1032_v5 = vld [vmem:[%s2574_s3 + $0x110] sm:$0xff] }
  0x2d   : > { %1649 = vmatmul.mubr.msk.f32.gmra.mrb[12].mxu1 %vm271_vm1, %v2029_v35  ;;  %v1755_v35 = vpack.c.bf16 %v1013_v31, %v1011_v30  ;;  %v1048_v30 = vld [vmem:[%s2574_s3 + $0x190] sm:$0xff] }
  0x2e   : > { %1538 = vmatmul.mubr.msk.f32.gmra.mrb[8].mxu0 %vm271_vm1, %v2150_v6  ;;  %1661 = vmatprep.mubr.msk.f32.mxu1 %vm1898_vm2, %v1896_v7  ;;  %v1793_v31 = vpack.c.bf16 %v1048_v30, %v1046_v29  ;;  %v1084_v21 = vld [vmem:[%s2574_s3 + $0x2b0] sm:$0xff] }
  0x2f   : > { %800 = vmatprep.mubr.f32.mxu0 %v1896_v7 }
  0x31   : > { %1662 = vmatmul.mubr.msk.f32.vlgmr.msra.gmra.mrb[14].mxu1 %vm271_vm1, %v2072_v48  ;;  %v1761_v48 = vpack.c.bf16 %v1016_v44, %v1014_v43  ;;  %v1063_v43 = vld [vmem:[%s2574_s3 + $0x208] sm:$0xff] }
  0x32   : > { %1562 = vmatmul.mubr.msk.f32.vlgmr.msra.gmra.mrb[0].mxu0 %vm271_vm1, %v2179_v14  ;;  %1664 = vmatprep.mubr.msk.f32.mxu1 %vm1898_vm2, %v1896_v7 }
  0x33   : > { %806 = vmatprep.mubr.f32.mxu0 %v1896_v7  ;;  %1739 = vmatpush3.bf16.msra.mxu1 %v1738_v15  ;;  %v1041_v15 = vld [vmem:[%s2574_s3 + $0x158] sm:$0xff] }
  0x34   : > { %1740 = vmatprep.subr.bf16.mxu1 %v1897_v32  ;;  %1746 = vmatpush1.bf16.msra.mxu0 %v1745_v18  ;;  %v693_v32 = vld [vmem:[%s1973_s17 + $0x12] sm:$0xff] }
  0x35   : > { %1665 = vmatmul.mubr.msk.f32.gmra.mrb[16].mxu1 %vm271_vm1, %v2101_v58  ;;  %1748 = vmatprep.subr.bf16.mxu0 %v1747_v19  ;;  %v1769_v58 = vpack.c.bf16 %v1024_v57, %v1022_v56  ;;  %v1040_v18 = vld [vmem:[%s2574_s3 + $0x150] sm:$0xff]  ;;  %v1069_v57 = vld [vmem:[%s2574_s3 + $0x238] sm:$0xff] }
  0x36   : > { %1563 = vmatmul.mubr.msk.f32.gmra.mrb[2].mxu0 %vm271_vm1, %v2207_v24  ;;  %1667 = vmatprep.mubr.msk.f32.mxu1 %vm1898_vm2, %v1896_v7  ;;  %v1785_v19 = vpack.c.bf16 %v1040_v18, %v1038_v17  ;;  %v1083_v17 = vld [vmem:[%s2574_s3 + $0x2a8] sm:$0xff]  ;;  %v1085_v18 = vld [vmem:[%s2574_s3 + $0x2b8] sm:$0xff] }
  0x37   : > { %812 = vmatprep.mubr.f32.mxu0 %v1896_v7  ;;  %1742 = vmatpush3.bf16.msra.mxu1 %v1741_v25 }
  0x38   : > { %1684 = vmatprep.subr.mxu1 %v1896_v7  ;;  %1750 = vmatpush1.bf16.msra.mxu0 %v1749_v26  ;;  %v1047_v26 = vld [vmem:[%s2574_s3 + $0x188] sm:$0xff] }
  0x39   : > { %1668 = vmatmul.mubr.msk.f32.gmra.mrb[18].mxu1 %vm271_vm1, %v2111_v62  ;;  %1752 = vmatprep.subr.bf16.mxu0 %v1751_v27  ;;  %v1026_v62 = vld [vmem:[%s2574_s3 + $0xe0] sm:$0xff]  ;;  %v1049_v27 = vld [vmem:[%s2574_s3 + $0x198] sm:$0xff] }
  0x3a   : > { %1564 = vmatmul.mubr.msk.f32.gmra.mrb[4].mxu0 %vm271_vm1, %v693_v32  ;;  %1670 = vmatprep.mubr.msk.f32.mxu1 %vm1898_vm2, %v1896_v7  ;;  %v1773_v0 = vpack.c.bf16 %v1028_v63, %v1026_v62  ;;  %v1791_v28 = vpack.c.bf16 %v1049_v27, %v1047_v26  ;;  %v1071_v62 = vld [vmem:[%s2574_s3 + $0x248] sm:$0xff]  ;;  %v1073_v63 = vld [vmem:[%s2574_s3 + $0x258] sm:$0xff] }
  0x3b   : > { %818 = vmatprep.mubr.f32.mxu0 %v1896_v7  ;;  %1685 = vmatpush3.msk.msra.mxu1 %vm287_vm0, %v1559_v33  ;;  %v1053_v33 = vld [vmem:[%s2574_s3 + $0x1b8] sm:$0xff] }
  0x3c   : > { %1754 = vmatpush1.bf16.msra.mxu0 %v1753_v34 }
  0x3d   : > { %1671 = vmatmul.mubr.msk.f32.gmra.mrb[20].mxu1 %vm271_vm1, %v2136_v4  ;;  %1756 = vmatprep.subr.bf16.mxu0 %v1755_v35  ;;  %v1030_v4 = vld [vmem:[%s2574_s3 + $0x100] sm:$0xff] }
  0x3e   : > { %1565 = vmatmul.mubr.msk.f32.gmra.mrb[6].mxu0 %vm271_vm1, %v694_v40  ;;  %1673 = vmatprep.mubr.msk.f32.mxu1 %vm1898_vm2, %v1896_v7  ;;  %v1050_v35 = vld [vmem:[%s2574_s3 + $0x1a0] sm:$0xff] }
  0x3f   : > { %824 = vmatprep.mubr.f32.mxu0 %v1896_v7  ;;  %v1797_v37 = vpack.c.bf16 %v1052_v36, %v1050_v35 }
  0x40   : > { %1758 = vmatpush1.bf16.msra.mxu0 %v1757_v41  ;;  %v1054_v41 = vld [vmem:[%s2574_s3 + $0x1c0] sm:$0xff] }
  0x41   : > { %1674 = vmatmul.mubr.msk.f32.gmra.mrb[22].mxu1 %vm271_vm1, %v2150_v6  ;;  %1760 = vmatprep.subr.bf16.mxu0 %v1759_v42  ;;  %v1777_v6 = vpack.c.bf16 %v1032_v5, %v1030_v4  ;;  %v1056_v42 = vld [vmem:[%s2574_s3 + $0x1d0] sm:$0xff]  ;;  %v1075_v4 = vld [vmem:[%s2574_s3 + $0x268] sm:$0xff]  ;;  %v1077_v5 = vld [vmem:[%s2574_s3 + $0x278] sm:$0xff] }
  0x42   : > { %1566 = vmatmul.mubr.msk.f32.gmra.mrb[8].mxu0 %vm271_vm1, %v695_v47  ;;  %1686 = vmatprep.mubr.msk.f32.mxu1 %vm1898_vm2, %v1896_v7  ;;  %v1801_v44 = vpack.c.bf16 %v1056_v42, %v1054_v41 }
  0x44   : > { %1762 = vmatpush1.bf16.msra.mxu0 %v1761_v48  ;;  %v1807_v48 = vpack.c.bf16 %v1065_v45, %v1063_v43 }
  0x45   : > { %1687 = vmatmul.mubr.msk.f32.vlgmr.msra.gmra.mrb[24].mxu1 %vm271_vm1, %v2179_v14  ;;  %1764 = vmatprep.subr.bf16.mxu0 %v1763_v49  ;;  %v1039_v14 = vld [vmem:[%s2574_s3 + $0x148] sm:$0xff] }
  0x46   : > { %1689 = vmatprep.mubr.msk.f32.mxu1 %vm1898_vm2, %v1896_v7  ;;  %v1783_v16 = vpack.c.bf16 %v1041_v15, %v1039_v14  ;;  %1808 = vmatprep.subr.bf16.mxu1 %v1807_v48  ;;  %v1078_v14 = vld [vmem:[%s2574_s3 + $0x280] sm:$0xff]  ;;  %v1080_v15 = vld [vmem:[%s2574_s3 + $0x290] sm:$0xff] }
  0x48   : > { %1766 = vmatpush1.bf16.msra.mxu0 %v1765_v54  ;;  %v1060_v54 = vld [vmem:[%s2574_s3 + $0x1f0] sm:$0xff] }
  0x49   : > { %1690 = vmatmul.mubr.msk.f32.gmra.mrb[26].mxu1 %vm271_vm1, %v2207_v24  ;;  %1768 = vmatprep.subr.bf16.mxu0 %v1767_v55  ;;  %v1044_v24 = vld [vmem:[%s2574_s3 + $0x170] sm:$0xff]  ;;  %v1067_v55 = vld [vmem:[%s2574_s3 + $0x228] sm:$0xff]  ;;  %v1805_v56 = vpack.c.bf16 %v1060_v54, %v1058_v53 }
  0x4a   : > { %1692 = vmatprep.mubr.msk.f32.mxu1 %vm1898_vm2, %v1896_v7  ;;  %v1789_v25 = vpack.c.bf16 %v1044_v24, %v1042_v23  ;;  %v1811_v60 = vpack.c.bf16 %v1069_v57, %v1067_v55  ;;  %v1087_v23 = vld [vmem:[%s2574_s3 + $0x2c8] sm:$0xff]  ;;  %v1086_v24 = vld [vmem:[%s2574_s3 + $0x2c0] sm:$0xff] }
  0x4c   : > { %1770 = vmatpush1.bf16.msra.mxu0 %v1769_v58  ;;  %v1066_v58 = vld [vmem:[%s2574_s3 + $0x220] sm:$0xff] }
  0x4d   : > { %1693 = vmatmul.mubr.msk.f32.gmra.mrb[28].mxu1 %vm271_vm1, %v693_v32  ;;  %1772 = vmatprep.subr.bf16.mxu0 %v1771_v61  ;;  %v1051_v32 = vld [vmem:[%s2574_s3 + $0x1a8] sm:$0xff]  ;;  %v1813_v61 = vpack.c.bf16 %v1068_v59, %v1066_v58  ;;  %v1899_v59 = vmov 1.0  }
  0x4e   : > { %1695 = vmatprep.mubr.msk.f32.mxu1 %vm1898_vm2, %v1896_v7  ;;  %v1795_v34 = vpack.c.bf16 %v1053_v33, %v1051_v32  ;;  %v938_v33 = vlaneseq }
  0x50   : > { %1774 = vmatpush1.bf16.msra.mxu0 %v1773_v0  ;;  %v1815_v0 = vpack.c.bf16 %v1073_v63, %v1071_v62  ;;  %v2502_v36 = vshrl.u32 %v938_v33, 7 }
  0x51   : > { %1696 = vmatmul.mubr.msk.f32.gmra.mrb[30].mxu1 %vm271_vm1, %v694_v40  ;;  %1776 = vmatprep.subr.bf16.mxu0 %v1775_v3  ;;  %v1799_v40 = vpack.c.bf16 %v1057_v39, %v1055_v38  ;;  %v1817_v3 = vpack.c.bf16 %v1072_v2, %v1070_v1 }
  0x52   : > { %1698 = vmatprep.mubr.msk.f32.mxu1 %vm1898_vm2, %v1896_v7  ;;  %v940_v39 = vsub.s32 0, %v2502_v36  ;;  %v944_v41 = vsub.s32 1, %v2502_v36 }
  0x54   : > { %1778 = vmatpush1.bf16.msra.mxu0 %v1777_v6  ;;  %v1819_v6 = vpack.c.bf16 %v1077_v5, %v1075_v4 }
  0x55   : > { %1699 = vmatmul.mubr.msk.f32.gmra.mrb[32].mxu1 %vm271_vm1, %v695_v47  ;;  %1780 = vmatprep.subr.bf16.mxu0 %v1779_v10  ;;  %v1064_v47 = vld [vmem:[%s2574_s3 + $0x210] sm:$0xff]  ;;  %v1821_v10 = vpack.c.bf16 %v1076_v9, %v1074_v8 }
  0x56   : > { %1263 = vmatprep.mubr.f32.mxu1 %v1896_v7  ;;  %v1809_v49 = vpack.c.bf16 %v1064_v47, %v1062_v46 }
  0x58   : > { %1782 = vmatpush1.bf16.msra.mxu0 %v1781_v13  ;;  %1810 = vmatpush1.bf16.msra.mxu1 %v1809_v49  ;;  %v1823_v13 = vpack.c.bf16 %v1081_v12, %v1079_v11  ;;  %v948_v12 = vsub.s32 2, %v2502_v36 }
  0x59   : > { %1784 = vmatprep.subr.bf16.mxu0 %v1783_v16  ;;  %1812 = vmatprep.subr.bf16.mxu1 %v1811_v60  ;;  %v1825_v16 = vpack.c.bf16 %v1080_v15, %v1078_v14 }
  0x5c   : > { %1786 = vmatpush1.bf16.msra.mxu0 %v1785_v19  ;;  %1814 = vmatpush1.bf16.msra.mxu1 %v1813_v61  ;;  %v1827_v19 = vpack.c.bf16 %v1085_v18, %v1083_v17 }
  0x5d   : > { %1788 = vmatprep.subr.bf16.mxu0 %v1787_v22  ;;  %1816 = vmatprep.subr.bf16.mxu1 %v1815_v0  ;;  %v1829_v22 = vpack.c.bf16 %v1084_v21, %v1082_v20 }
  0x60   : > { %1790 = vmatpush1.bf16.msra.mxu0 %v1789_v25  ;;  %1818 = vmatpush1.bf16.msra.mxu1 %v1817_v3 }
  0x61   : > { %1792 = vmatprep.subr.bf16.mxu0 %v1791_v28  ;;  %1820 = vmatprep.subr.bf16.mxu1 %v1819_v6 }
  0x64   : > { %1794 = vmatpush1.bf16.msra.mxu0 %v1793_v31  ;;  %1822 = vmatpush1.bf16.msra.mxu1 %v1821_v10 }
  0x65   : > { %1796 = vmatprep.subr.bf16.mxu0 %v1795_v34  ;;  %1824 = vmatprep.subr.bf16.mxu1 %v1823_v13 }
  0x68   : > { %1798 = vmatpush1.bf16.msra.mxu0 %v1797_v37  ;;  %1826 = vmatpush1.bf16.msra.mxu1 %v1825_v16 }
  0x69   : > { %1800 = vmatprep.subr.bf16.mxu0 %v1799_v40  ;;  %1828 = vmatprep.subr.bf16.mxu1 %v1827_v19  ;;  %v936_v40 = vld [vmem:[%s2573_s2] sm:$0x7] }
  0x6a   : > { %v945_v45 = vrot.slane %v936_v40, %v944_v41 }
  0x6c   : > { %1802 = vmatpush1.bf16.msra.mxu0 %v1801_v44  ;;  %1830 = vmatpush1.bf16.msra.mxu1 %v1829_v22  ;;  %v941_v44 = vrot.slane %v936_v40, %v940_v39  ;;  %v949_v22 = vrot.slane %v936_v40, %v948_v12 }
  0x6d   : > { %1804 = vmatprep.subr.bf16.mxu0 %v1803_v52  ;;  %1223 = vmatprep.subr.mxu1 %v1087_v23 }
  0x70   : > { %1806 = vmatpush1.bf16.msra.mxu0 %v1805_v56  ;;  %1224 = vmatpush1.msra.mxu1 %v1086_v24 }
  0xe5   : > { %v381_v25 = vpop.f32.mrb[0].mxu1 }
  0xe6   : > { %v383_v26 = vpop.f32.mrb[1].mxu1 }
  0xea   : > { %v2498_v27 = vpop.f32.mrb[2].mxu1 }
  0xeb   : > { %v2500_v28 = vpop.f32.mrb[3].mxu1 }
  0xf0   : > { %v458_v29 = vpop.f32.mrb[4].mxu1 }
  0xf1   : > { %v1638_v30 = vpop.f32.mrb[5].mxu1 }
  0xf4   : > { %v463_v31 = vpop.f32.mrb[6].mxu1 }
  0xf5   : > { %v1641_v32 = vpop.f32.mrb[7].mxu1 }
  0xf8   : > { %v468_v34 = vpop.f32.mrb[8].mxu1 }
  0xf9   : > { %v1644_v35 = vpop.f32.mrb[9].mxu1 }
  0xfc   : > { %v473_v37 = vpop.f32.mrb[10].mxu1 }
  0xfd   : > { %v1647_v38 = vpop.f32.mrb[11].mxu1 }
 0x100   : > { %v478_v42 = vpop.f32.mrb[12].mxu1 }
 0x101   : > { %v1650_v43 = vpop.f32.mrb[13].mxu1 }
 0x104   : > { %v667_v46 = vpop.f32.mrb[14].mxu1 }
 0x105   : > { %v668_v47 = vadd.f32 %v667_v46, %v458_v29  ;;  %v1663_v48 = vpop.f32.mrb[15].mxu1  ;;  %v802_v49 = vpop.f32.mrb[0].mxu0 }
 0x106   : > { %v953_v50 = vadd.f32 %v941_v44, %v802_v49  ;;  %v804_v51 = vpop.f32.mrb[1].mxu0 }
 0x107   : > { %v954_v52 = vadd.f32 %v945_v45, %v804_v51 }
 0x108   : > { %v672_v53 = vpop.f32.mrb[16].mxu1  ;;  %vm968_vm4 = vcmp.gt.f32.partialorder %v953_v50, 0.5 }
 0x109   : > { %vm969_vm3 = vcmp.gt.f32.partialorder %v954_v52, 0.5  ;;  %v673_v54 = vadd.f32 %v672_v53, %v463_v31  ;;  %v1666_v55 = vpop.f32.mrb[17].mxu1  ;;  %v808_v56 = vpop.f32.mrb[2].mxu0 }
 0x10a   : > { %v956_v57 = vadd.f32 %v941_v44, %v808_v56  ;;  %v810_v58 = vpop.f32.mrb[3].mxu0  ;;  %1573 = vmatprep.mubr.msk.f32.mxu0 %vm969_vm3, %v1899_v59 }
 0x10b   : > { %v957_v60 = vadd.f32 %v945_v45, %v810_v58  ;;  %1574 = vmatmul.mubr.msk.f32.vlgmr.msra.gmra.mrb[10].mxu0 %vm968_vm4, %v1899_v59 }
 0x10c   : > { %v677_v61 = vpop.f32.mrb[18].mxu1  ;;  %vm971_vm6 = vcmp.gt.f32.partialorder %v956_v57, 0.5 }
 0x10d   : > { %vm972_vm5 = vcmp.gt.f32.partialorder %v957_v60, 0.5  ;;  %v678_v62 = vadd.f32 %v677_v61, %v468_v34  ;;  %v1669_v63 = vpop.f32.mrb[19].mxu1  ;;  %v814_v0 = vpop.f32.mrb[4].mxu0 }
 0x10e   : > { %v959_v1 = vadd.f32 %v941_v44, %v814_v0  ;;  %v816_v2 = vpop.f32.mrb[5].mxu0  ;;  %1575 = vmatprep.mubr.msk.f32.mxu0 %vm972_vm5, %v1899_v59  ;;  %vm1420_vm5 = vcmask 80896  }
 0x10f   : > { %v960_v3 = vadd.f32 %v945_v45, %v816_v2  ;;  %1576 = vmatmul.mubr.msk.f32.gmra.mrb[12].mxu0 %vm971_vm6, %v1899_v59  ;;  %vm1432_vm6 = vcmask 506880  }
 0x110   : > { %v682_v4 = vpop.f32.mrb[20].mxu1  ;;  %vm974_vm8 = vcmp.gt.f32.partialorder %v959_v1, 0.5 }
 0x111   : > { %vm975_vm7 = vcmp.gt.f32.partialorder %v960_v3, 0.5  ;;  %v683_v5 = vadd.f32 %v682_v4, %v473_v37  ;;  %v1672_v6 = vpop.f32.mrb[21].mxu1  ;;  %v820_v8 = vpop.f32.mrb[6].mxu0 }
 0x112   : > { %v1845_v9 = vadd.f32 %v820_v8, %v381_v25  ;;  %v822_v10 = vpop.f32.mrb[7].mxu0  ;;  %1577 = vmatprep.mubr.msk.f32.mxu0 %vm975_vm7, %v1899_v59 }
 0x113   : > { %v1846_v11 = vadd.f32 %v822_v10, %v383_v26  ;;  %1578 = vmatmul.mubr.msk.f32.gmra.mrb[14].mxu0 %vm974_vm8, %v1899_v59 }
 0x114   : > { %v962_v13 = vadd.f32 %v1845_v9, %v941_v44  ;;  %v687_v14 = vpop.f32.mrb[22].mxu1 }
 0x115   : > { %v963_v15 = vadd.f32 %v1846_v11, %v945_v45  ;;  %v688_v16 = vadd.f32 %v687_v14, %v478_v42  ;;  %v1675_v17 = vpop.f32.mrb[23].mxu1  ;;  %v826_v18 = vpop.f32.mrb[8].mxu0 }
 0x116   : > { %v1847_v19 = vadd.f32 %v826_v18, %v2498_v27  ;;  %v828_v20 = vpop.f32.mrb[9].mxu0  ;;  %vm977_vm10 = vcmp.gt.f32.partialorder %v962_v13, 0.5 }
 0x117   : > { %vm978_vm9 = vcmp.gt.f32.partialorder %v963_v15, 0.5  ;;  %v1848_v21 = vadd.f32 %v828_v20, %v2500_v28 }
 0x118   : > { %v965_v23 = vadd.f32 %v1847_v19, %v941_v44  ;;  %v897_v24 = vpop.f32.mrb[24].mxu1  ;;  %1579 = vmatprep.mubr.msk.f32.mxu0 %vm978_vm9, %v1899_v59 }
 0x119   : > { %v966_v25 = vadd.f32 %v1848_v21, %v945_v45  ;;  %v923_v26 = vadd.f32 %v897_v24, %v668_v47  ;;  %v1688_v29 = vpop.f32.mrb[25].mxu1  ;;  %1580 = vmatmul.mubr.msk.f32.gmra.mrb[16].mxu0 %vm977_vm10, %v1899_v59  ;;  %v1294_v21 = vld [vmem:[%s2575_s4] sm:$0xff] }
 0x11a   : > { %vm980_vm12 = vcmp.gt.f32.partialorder %v965_v23, 0.5  ;;  %v1296_v23 = vld [vmem:[%s2575_s4 + $0x10] sm:$0xff] }
 0x11b   : > { %vm981_vm11 = vcmp.gt.f32.partialorder %v966_v25, 0.5  ;;  %v955_v30 = vadd.f32 %v949_v22, %v923_v26 }
 0x11c   : > { %v902_v31 = vpop.f32.mrb[26].mxu1  ;;  %1581 = vmatprep.mubr.msk.f32.mxu0 %vm981_vm11, %v1899_v59 }
 0x11d   : > { %vm970_vm14 = vcmp.gt.f32.partialorder %v955_v30, 0.5  ;;  %v926_v27 = vadd.f32 %v902_v31, %v673_v54  ;;  %v1691_v32 = vpop.f32.mrb[27].mxu1  ;;  %1582 = vmatmul.mubr.msk.f32.gmra.mrb[18].mxu0 %vm980_vm12, %v1899_v59 }
 0x11e   : > { %v985_v28 = vsel %vm970_vm14, 1.0, %v1896_v7 }
 0x11f   : > { %v958_v33 = vadd.f32 %v949_v22, %v926_v27  ;;  %1583 = vmatmul.mubr.msk.f32.vlgmr.msra.gmra.mrb[34].mxu1 %vm1088_vm13, %v985_v28 }
 0x120   : > { %v907_v34 = vpop.f32.mrb[28].mxu1  ;;  %1269 = vmatprep.mubr.f32.mxu1 %v1896_v7 }
 0x121   : > { %vm973_vm15 = vcmp.gt.f32.partialorder %v958_v33, 0.5  ;;  %v929_v35 = vadd.f32 %v907_v34, %v678_v62  ;;  %v1694_v36 = vpop.f32.mrb[29].mxu1 }
 0x122   : > { %v988_v37 = vsel %vm973_vm15, 1.0, %v1896_v7 }
 0x123   : > { %v961_v38 = vadd.f32 %v949_v22, %v929_v35  ;;  %1584 = vmatmul.mubr.msk.f32.gmra.mrb[36].mxu1 %vm1088_vm13, %v988_v37 }
 0x124   : > { %v912_v39 = vpop.f32.mrb[30].mxu1  ;;  %1275 = vmatprep.mubr.f32.mxu1 %v1896_v7 }
 0x125   : > { %vm976_vm2 = vcmp.gt.f32.partialorder %v961_v38, 0.5  ;;  %v932_v40 = vadd.f32 %v912_v39, %v683_v5  ;;  %v1697_v41 = vpop.f32.mrb[31].mxu1 }
 0x126   : > { %v991_v42 = vsel %vm976_vm2, 1.0, %v1896_v7 }
 0x127   : > { %v964_v43 = vadd.f32 %v949_v22, %v932_v40  ;;  %1585 = vmatmul.mubr.msk.f32.gmra.mrb[38].mxu1 %vm1088_vm13, %v991_v42 }
 0x128   : > { %v917_v44 = vpop.f32.mrb[32].mxu1  ;;  %1281 = vmatprep.mubr.f32.mxu1 %v1896_v7 }
 0x129   : > { %vm979_vm3 = vcmp.gt.f32.partialorder %v964_v43, 0.5  ;;  %v935_v45 = vadd.f32 %v917_v44, %v688_v16  ;;  %v1700_v46 = vpop.f32.mrb[33].mxu1 }
 0x12a   : > { %v994_v47 = vsel %vm979_vm3, 1.0, %v1896_v7 }
 0x12b   : > { %v967_v48 = vadd.f32 %v949_v22, %v935_v45  ;;  %1586 = vmatmul.mubr.msk.f32.gmra.mrb[40].mxu1 %vm1088_vm13, %v994_v47  ;;  %v1295_v22 = vld [vmem:[%s2575_s4 + $0x8] sm:$0xff] }
 0x12c   : > { %1287 = vmatprep.mubr.f32.mxu1 %v1896_v7 }
 0x12d   : > { %vm982_vm4 = vcmp.gt.f32.partialorder %v967_v48, 0.5 }
 0x12e   : > { %v997_v49 = vsel %vm982_vm4, 1.0, %v1896_v7 }
 0x12f   : > { %1587 = vmatmul.mubr.msk.f32.gmra.mrb[42].mxu1 %vm1088_vm13, %v997_v49 }
 0x130   : > { %1376 = vmatprep.mubr.f32.mxu1 %v1896_v7 }
 0x1de   : > { %v1170_v50 = vpop.f32.mrb[10].mxu0 }
 0x1df   : > { %v1172_v51 = vpop.f32.mrb[11].mxu0 }
 0x1e2   : > { %v1176_v52 = vpop.f32.mrb[12].mxu0 }
 0x1e3   : > { %v1178_v53 = vpop.f32.mrb[13].mxu0 }
 0x1e6   : > { %v1182_v54 = vpop.f32.mrb[14].mxu0 }
 0x1e7   : > { %v1184_v55 = vpop.f32.mrb[15].mxu0 }
 0x1ec   : > { %v1188_v56 = vpop.f32.mrb[16].mxu0 }
 0x1ed   : > { %v1190_v57 = vpop.f32.mrb[17].mxu0 }
 0x1f0   : > { %v1194_v58 = vpop.f32.mrb[18].mxu0 }
 0x1f1   : > { %v1196_v59 = vpop.f32.mrb[19].mxu0 }
 0x1f2   : > { %v1265_v60 = vpop.f32.mrb[34].mxu1 }
 0x1f3   : > { %v1266_v61 = vadd.f32 %v1265_v60, %v1170_v50  ;;  %v1267_v62 = vpop.f32.mrb[35].mxu1 }
 0x1f4   : > { %v1268_v63 = vadd.f32 %v1267_v62, %v1172_v51 }
 0x1f6   : > { %v1271_v0 = vpop.f32.mrb[36].mxu1 }
 0x1f7   : > { %v1272_v1 = vadd.f32 %v1271_v0, %v1176_v52  ;;  %v1273_v2 = vpop.f32.mrb[37].mxu1 }
 0x1f8   : > { %v1274_v3 = vadd.f32 %v1273_v2, %v1178_v53 }
 0x1f9   : > { %v1833_v4 = vpack.c.bf16 %v1272_v1, %v1266_v61 }
 0x1fa   : > { %v1831_v5 = vpack.c.bf16 %v1274_v3, %v1268_v63  ;;  %v1277_v6 = vpop.f32.mrb[38].mxu1 }
 0x1fb   : > { %v1278_v8 = vadd.f32 %v1277_v6, %v1182_v54  ;;  %v1279_v9 = vpop.f32.mrb[39].mxu1 }
 0x1fc   : > { %v1280_v10 = vadd.f32 %v1279_v9, %v1184_v55  ;;  %1832 = vmatprep.subr.bf16.mxu1 %v1831_v5 }
 0x1fd   : > { %1834 = vmatpush1.bf16.msra.mxu1 %v1833_v4 }
 0x1fe   : > { %v1283_v11 = vpop.f32.mrb[40].mxu1 }
 0x1ff   : > { %v1284_v12 = vadd.f32 %v1283_v11, %v1188_v56  ;;  %v1285_v13 = vpop.f32.mrb[41].mxu1 }
 0x200   : > { %v1286_v14 = vadd.f32 %v1285_v13, %v1190_v57 }
 0x201   : > { %v1837_v15 = vpack.c.bf16 %v1284_v12, %v1278_v8 }
 0x202   : > { %v1835_v16 = vpack.c.bf16 %v1286_v14, %v1280_v10  ;;  %v1289_v17 = vpop.f32.mrb[42].mxu1 }
 0x203   : > { %v1290_v18 = vadd.f32 %v1289_v17, %v1194_v58  ;;  %v1291_v19 = vpop.f32.mrb[43].mxu1 }
 0x204   : > { %v1292_v20 = vadd.f32 %v1291_v19, %v1196_v59  ;;  %1836 = vmatprep.subr.bf16.mxu1 %v1835_v16 }
 0x205   : > { %1838 = vmatpush1.bf16.msra.mxu1 %v1837_v15 }
 0x206   : > { %1588 = vmatprep.subr.msk.mxu1 %vm287_vm0, %v1292_v20 }
 0x209   : > { %1589 = vmatpush1.msk.msra.mxu1 %vm287_vm0, %v1290_v18  ;;  %vm1396_vm0 = vcmask 588800  }
 0x20a   : > { %1590 = vmatmul.mubr.msk.f32.vlgmr.msra.gmra.mrb[44].mxu1 %vm271_vm1, %v1294_v21  ;;  %1397 = vst.msk [vmem:[%s2548_s10 + $0x8] sm:$0xff] %vm1396_vm0, %v1896_v7  ;;  %1399 = vst.msk [vmem:[%s2548_s10 + $0x18] sm:$0xff] %vm1396_vm0, %v1896_v7 }
 0x20b   : > { %1382 = vmatprep.mubr.f32.mxu1 %v1896_v7  ;;  %1401 = vst.msk [vmem:[%s2548_s10 + $0x28] sm:$0xff] %vm1396_vm0, %v1896_v7 }
 0x20e   : > { %1591 = vmatmul.mubr.msk.f32.gmra.mrb[46].mxu1 %vm271_vm1, %v1295_v22 }
 0x20f   : > { %1388 = vmatprep.mubr.f32.mxu1 %v1896_v7 }
 0x212   : > { %1592 = vmatmul.mubr.msk.f32.gmra.mrb[48].mxu1 %vm271_vm1, %v1296_v23  ;;  %vm1430_vm1 = vcmask 1047632  }
 0x2dd   : > { %v1378_v24 = vpop.f32.mrb[44].mxu1 }
 0x2de   : > { %1408 = vrot.lane.b32.xlu0 %v1378_v24, %s1900_s19  ;;  %v1380_v25 = vpop.f32.mrb[45].mxu1 }
 0x2e1   : > { %v1384_v26 = vpop.f32.mrb[46].mxu1 }
 0x2e2   : > { %1410 = vrot.lane.b32.xlu0 %v1380_v25, %s1900_s19  ;;  %1412 = vrot.lane.b32.xlu1 %v1384_v26, %s1900_s19  ;;  %v1386_v29 = vpop.f32.mrb[47].mxu1 }
 0x2e5   : > { %v1390_v30 = vpop.f32.mrb[48].mxu1 }
 0x2e6   : > { %1414 = vrot.lane.b32.xlu1 %v1386_v29, %s1900_s19  ;;  %v1392_v31 = vpop.f32.mrb[49].mxu1  ;;  %1416 = vrot.lane.b32.xlu0 %v1390_v30, %s1900_s19 }
 0x2ea   : > { %1418 = vrot.lane.b32.xlu1 %v1392_v31, %s1900_s19 }
 0x350   : > { %v1409_v7 = vpop.permute.xlu0 %1408 }
 0x351   : > { %1431 = vst.msk [vmem:[%s2548_s10] sm:$0xff] %vm1430_vm1, %v1409_v7 }
 0x354   : > { %v1411_v27 = vpop.permute.xlu0 %1410  ;;  %v1413_v32 = vpop.permute.xlu1 %1412 }
 0x355   : > { %v1421_v28 = vsel %vm1420_vm5, %v1409_v7, %v1411_v27  ;;  %1434 = vst.msk [vmem:[%s2548_s10 + $0x10] sm:$0xff] %vm1430_vm1, %v1413_v32 }
 0x356   : > { %1433 = vst.msk [vmem:[%s2548_s10 + $0x8] sm:$0xff] %vm1432_vm6, %v1421_v28 }
 0x358   : > { %v1415_v33 = vpop.permute.xlu1 %1414  ;;  %v1417_v34 = vpop.permute.xlu0 %1416 }
 0x359   : > { %v1422_v35 = vsel %vm1420_vm5, %v1413_v32, %v1415_v33  ;;  %1436 = vst.msk [vmem:[%s2548_s10 + $0x20] sm:$0xff] %vm1430_vm1, %v1417_v34 }
 0x35a   : > { %1435 = vst.msk [vmem:[%s2548_s10 + $0x18] sm:$0xff] %vm1432_vm6, %v1422_v35 }
 0x35c   : > { %v1419_v36 = vpop.permute.xlu1 %1418 }
 0x35d   : > { %v1423_v37 = vsel %vm1420_vm5, %v1417_v34, %v1419_v36 }
 0x35e   : > { %1437 = vst.msk [vmem:[%s2548_s10 + $0x28] sm:$0xff] %vm1432_vm6, %v1423_v37 }
 0x35f PF: > { %s15_s18 = sadd.s32 1, %s1894_s18  }
 0x360   : > { %p12_p5 = scmp.ge.s32.totalorder %s15_s18, 4  }
 0x362   :  { %14 = sbr.rel (!%p12_p5) target bundleno = 1 (0x1), region = 72 }

// kernel: tile.18
= control target key start
LH: loop header
LB: loop body
LE: loop exit
PB: predicated region body
PF: predicated region fallthrough
CT: control target
= control target key end

     0   :  { %s34_s0 = inlined_call_operand.vmem [shape: f32[10], index: 0, kind: input, shape index: {}]   ;;  %s35_s1 = inlined_call_operand.vmem [shape: f32[18,10], index: 1, kind: output, shape index: {}]  }
   0x1   :  { %v4_v0 = vld [vmem:[%s34_s0] ss:$0 sm:$0xff] }
   0x2   :  { %5 = vst [vmem:[%s35_s1] sm:$0xff] %v4_v0  ;;  %10 = vst [vmem:[%s35_s1 + $0x8] sm:$0xff] %v4_v0 }
   0x3   :  { %11 = vst [vmem:[%s35_s1 + $0x10] sm:$0xff] %v4_v0 }

// kernel: tile.19
= control target key start
LH: loop header
LB: loop body
LE: loop exit
PB: predicated region body
PF: predicated region fallthrough
CT: control target
= control target key end

     0   :  { %vm9_vm0 = vcmask 64512   ;;  %s166_s12 = smov 120   ;;  %s167_s13 = smov 100   ;;  %vm3_vm1 = vcmask 80896   ;;  %vm13_vm2 = vcmask 15360   ;;  %vm16_vm3 = vcmask 1048512   ;;  %s256_s0 = inlined_call_operand.vmem [shape: f32[18,10], index: 0, kind: input, shape index: {}]   ;;  %s257_s1 = inlined_call_operand.vmem [shape: f32[1,180], index: 1, kind: output, shape index: {}]  }
   0x1   :  { %v130_v0 = vld [vmem:[%s256_s0 + $0xc] sm:$0x1]   ;;  %v133_v3 = vld [vmem:[%s256_s0 + $0xa] sm:$0x1]   ;;  %v132_v4 = vld [vmem:[%s256_s0 + $0xb] sm:$0x1]  }
   0x2   :  { %v131_v1 = vld [vmem:[%s256_s0 + $0xc] sm:$0x1]   ;;  %26 = vrot.lane.b32.xlu1 %v133_v3, %s167_s13  ;;  %v134_v5 = vld [vmem:[%s256_s0 + $0x9] sm:$0x1]   ;;  %s168_s18 = smov 110   ;;  %s169_s19 = smov 90  }
   0x3   :  { %v10_v2 = vsel %vm9_vm0, %v131_v1, %v130_v0  ;;  %v135_v6 = vld [vmem:[%s256_s0 + $0x8] sm:$0x1]   ;;  %v136_v7 = vld [vmem:[%s256_s0 + $0x7] sm:$0x1]   ;;  %v2_v8 = vld [vmem:[%s256_s0] sm:$0x1]  }
   0x4   :  { %11 = vrot.lane.b32.xlu0 %v10_v2, %s166_s12  ;;  %s170_s26 = smov 80   ;;  %s171_s27 = smov 70   ;;  %4 = vst.msk [vmem:[#allocation0] sm:$0x1] %vm3_vm1, %v2_v8   ;;  %v137_v9 = vld [vmem:[%s256_s0 + $0x6] sm:$0x1]  }
   0x5   :  { %v138_v10 = vld [vmem:[%s256_s0 + $0x5] sm:$0x1]   ;;  %s172_s3 = smov 60   ;;  %s173_s4 = smov 50   ;;  %v139_v11 = vld [vmem:[%s256_s0 + $0x11] sm:$0x1]  }
   0x6   :  { %32 = vrot.lane.b32.xlu1 %v134_v5, %s169_s19  ;;  %v140_v12 = vld [vmem:[%s256_s0 + $0x4] sm:$0x1]   ;;  %s174_s9 = smov 42   ;;  %s175_s10 = smov 40   ;;  %v141_v13 = vld [vmem:[%s256_s0 + $0x10] sm:$0x1]  }
   0x7   :  { %v142_v14 = vld [vmem:[%s256_s0 + $0x3] sm:$0x1]   ;;  %s176_s15 = smov 32   ;;  %s177_s16 = smov 30   ;;  %v143_v15 = vld [vmem:[%s256_s0 + $0xf] sm:$0x1]  }
   0x8   :  { %20 = vrot.lane.b32.xlu0 %v132_v4, %s168_s18  ;;  %v144_v16 = vld [vmem:[%s256_s0 + $0x2] sm:$0x1]   ;;  %s178_s21 = smov 22   ;;  %s179_s22 = smov 20   ;;  %v145_v17 = vld [vmem:[%s256_s0 + $0xe] sm:$0x1]  }
   0x9   :  { %v146_v18 = vld [vmem:[%s256_s0 + $0x1] sm:$0x1]   ;;  %s181_s28 = smov 10   ;;  %v147_v19 = vld [vmem:[%s256_s0 + $0xd] sm:$0x1]   ;;  %s182_s0 = smov 2  }
   0xa   :  { %44 = vrot.lane.b32.xlu1 %v136_v7, %s171_s27  ;;  %s180_s27 = smov 12   ;;  %vm22_vm4 = vcmask 982896   ;;  %vm28_vm5 = vcmask 900896   ;;  %vm34_vm6 = vcmask 818896   ;;  %vm40_vm7 = vcmask 736896  }
   0xb   :  { %vm46_vm8 = vcmask 654896   ;;  %vm52_vm9 = vcmask 572896   ;;  %vm58_vm10 = vcmask 490896   ;;  %vm64_vm11 = vcmask 425296  }
   0xc   :  { %38 = vrot.lane.b32.xlu0 %v135_v6, %s170_s26  ;;  %vm71_vm12 = vcmask 408896   ;;  %vm77_vm13 = vcmask 343296   ;;  %vm84_vm14 = vcmask 326896   ;;  %vm90_vm15 = vcmask 261296  }
   0xd   :  { %vm97_vm0 = vcmask 244896   ;;  %vm103_vm1 = vcmask 179296  }
   0xe   :  { %56 = vrot.lane.b32.xlu1 %v138_v10, %s173_s4 }
  0x10   :  { %50 = vrot.lane.b32.xlu0 %v137_v9, %s172_s3 }
  0x12   :  { %69 = vrot.lane.b32.xlu1 %v140_v12, %s175_s10 }
  0x14   :  { %62 = vrot.lane.b32.xlu0 %v139_v11, %s174_s9 }
  0x16   :  { %82 = vrot.lane.b32.xlu1 %v142_v14, %s177_s16 }
  0x18   :  { %75 = vrot.lane.b32.xlu0 %v141_v13, %s176_s15 }
  0x1a   :  { %95 = vrot.lane.b32.xlu1 %v144_v16, %s179_s22 }
  0x1c   :  { %88 = vrot.lane.b32.xlu0 %v143_v15, %s178_s21 }
  0x1e   :  { %108 = vrot.lane.b32.xlu1 %v146_v18, %s181_s28 }
  0x20   :  { %101 = vrot.lane.b32.xlu0 %v145_v17, %s180_s27 }
  0x24   :  { %114 = vrot.lane.b32.xlu0 %v147_v19, %s182_s0 }
  0x74   :  { %v27_v21 = vpop.permute.xlu1 %26  }
  0x76   :  { %v12_v20 = vpop.permute.xlu0 %11  }
  0x77   :  { %15 = vst.msk [vmem:[#allocation0 + $0x8] sm:$0x1] %vm13_vm2, %v12_v20   ;;  %vm110_vm2 = vcmask 162896  }
  0x78   :  { %17 = vst.msk [vmem:[#allocation0] sm:$0x1] %vm16_vm3, %v12_v20   ;;  %v33_v23 = vpop.permute.xlu1 %32   ;;  %vm116_vm3 = vcmask 97296  }
  0x7a   :  { %v21_v22 = vpop.permute.xlu0 %20  }
  0x7b   :  { %23 = vst.msk [vmem:[#allocation0] sm:$0x1] %vm22_vm4, %v21_v22  }
  0x7c   :  { %29 = vst.msk [vmem:[#allocation0] sm:$0x1] %vm28_vm5, %v27_v21   ;;  %v45_v25 = vpop.permute.xlu1 %44  }
  0x7d   :  { %35 = vst.msk [vmem:[#allocation0] sm:$0x1] %vm34_vm6, %v33_v23  }
  0x7e   :  { %v39_v24 = vpop.permute.xlu0 %38  }
  0x7f   :  { %41 = vst.msk [vmem:[#allocation0] sm:$0x1] %vm40_vm7, %v39_v24  }
  0x80   :  { %47 = vst.msk [vmem:[#allocation0] sm:$0x1] %vm46_vm8, %v45_v25   ;;  %v57_v27 = vpop.permute.xlu1 %56  }
  0x82   :  { %v51_v26 = vpop.permute.xlu0 %50  }
  0x83   :  { %53 = vst.msk [vmem:[#allocation0] sm:$0x1] %vm52_vm9, %v51_v26  }
  0x84   :  { %59 = vst.msk [vmem:[#allocation0] sm:$0x1] %vm58_vm10, %v57_v27   ;;  %v70_v29 = vpop.permute.xlu1 %69  }
  0x85   :  { %72 = vst.msk [vmem:[#allocation0] sm:$0x1] %vm71_vm12, %v70_v29  }
  0x86   :  { %v63_v28 = vpop.permute.xlu0 %62  }
  0x87   :  { %66 = vst.msk [vmem:[#allocation0 + $0x8] sm:$0x1] %vm64_vm11, %v63_v28  }
  0x88   :  { %v83_v31 = vpop.permute.xlu1 %82  }
  0x89   :  { %85 = vst.msk [vmem:[#allocation0] sm:$0x1] %vm84_vm14, %v83_v31  }
  0x8a   :  { %v76_v30 = vpop.permute.xlu0 %75  }
  0x8b   :  { %79 = vst.msk [vmem:[#allocation0 + $0x8] sm:$0x1] %vm77_vm13, %v76_v30  }
  0x8c   :  { %v96_v33 = vpop.permute.xlu1 %95  }
  0x8d   :  { %98 = vst.msk [vmem:[#allocation0] sm:$0x1] %vm97_vm0, %v96_v33  }
  0x8e   :  { %v89_v32 = vpop.permute.xlu0 %88  }
  0x8f   :  { %92 = vst.msk [vmem:[#allocation0 + $0x8] sm:$0x1] %vm90_vm15, %v89_v32  }
  0x90   :  { %v109_v35 = vpop.permute.xlu1 %108  }
  0x91   :  { %111 = vst.msk [vmem:[#allocation0] sm:$0x1] %vm110_vm2, %v109_v35  }
  0x92   :  { %v102_v34 = vpop.permute.xlu0 %101  }
  0x93   :  { %105 = vst.msk [vmem:[#allocation0 + $0x8] sm:$0x1] %vm103_vm1, %v102_v34  }
  0x96   :  { %v115_v36 = vpop.permute.xlu0 %114  }
  0x97   :  { %118 = vst.msk [vmem:[#allocation0 + $0x8] sm:$0x1] %vm116_vm3, %v115_v36  }
  0x98   :  { %v122_v37 = vld [vmem:[#allocation0] sm:$0x1] }
  0x99   :  { %124 = vst [vmem:[%s257_s1] sm:$0x1] %v122_v37 }
  0x9e   :  { %v126_v38 = vld [vmem:[#allocation0 + $0x8] sm:$0x1] }
  0x9f   :  { %148 = vst [vmem:[%s257_s1 + $0x1] sm:$0x1] %v126_v38 }

// kernel: cnn_model_forward.4
= control target key start
LH: loop header
LB: loop body
LE: loop exit
PB: predicated region body
PF: predicated region fallthrough
CT: control target
= control target key end

     0   :  { %s1394_s18 = smov 0   ;;  %s2010_s0 = inlined_call_operand.vmem [shape: f32[48,200], index: 0, kind: input, shape index: {}]   ;;  %s2011_s1 = inlined_call_operand.vmem [shape: f32[3,200,180], index: 1, kind: input, shape index: {}]   ;;  %s2012_s2 = inlined_call_operand.vmem [shape: f32[1,180], index: 2, kind: input, shape index: {}]   ;;  %s2013_s3 = inlined_call_operand.vmem [shape: f32[180,90], index: 3, kind: input, shape index: {}]   ;;  %s2014_s4 = inlined_call_operand.vmem [shape: f32[16,22], index: 4, kind: input, shape index: {}]   ;;  %s2015_s5 = inlined_call_operand.vmem [shape: f32[32,90], index: 5, kind: output, shape index: {}]  }
   0x1 LB: > { %s1004_s19 = sadd.s32 4294967295, %s1359_s18   ;;  %p1008_p0 = scmp.ge.s32.totalorder %s1359_s18, 1  ;;  %s1359_s18 = sphi %s1394_s18, %s15_s18  }
   0x2   : > { %p189_p1 = scmp.lt.s32.totalorder %s1359_s18, 3 }
   0x4   : > { %p190_p2 = pnand %p1008_p0, %p189_p1 }
   0x5   : > { %v238_v0 = vld [vmem:[%s2011_s1 + $0x8] sm:$0xff] (!%p190_p2)  ;;  %v240_v1 = vld [vmem:[%s2011_s1 + $0x18] sm:$0xff] (!%p190_p2)  ;;  %v237_v2 = vld [vmem:[%s2011_s1] sm:$0xff] (!%p190_p2)  ;;  %s218_s26 = smul.u32 (!%p190_p2), 3, %s1004_s19  ;;  %vm362_vm0 = vcmask (!%p190_p2), 588800   ;;  %vm348_vm1 = vcmask (!%p190_p2), 1046528  }
   0x6   : > { %193 = sbr.rel (%p190_p2) target bundleno = 766 (0x2fe), region = 40  ;;  %v1197_v3 = vpack.c.bf16 (!%p190_p2), %v240_v1, %v238_v0  ;;  %v239_v4 = vld [vmem:[%s2011_s1 + $0x10] sm:$0xff] (!%p190_p2)  ;;  %v242_v5 = vld [vmem:[%s2011_s1 + $0x28] sm:$0xff] (!%p190_p2)  ;;  %v244_v6 = vld [vmem:[%s2011_s1 + $0x38] sm:$0xff] (!%p190_p2)  ;;  %vm602_vm2 = vcmask (!%p190_p2), 1045504   ;;  %vm774_vm3 = vcmask (!%p190_p2), 1043456  }
   0x7   : > { %v1199_v7 = vpack.c.bf16 (!%p190_p2), %v239_v4, %v237_v2  ;;  %v1201_v8 = vpack.c.bf16 (!%p190_p2), %v244_v6, %v242_v5  ;;  %v241_v9 = vld [vmem:[%s2011_s1 + $0x20] sm:$0xff] (!%p190_p2)  ;;  %v243_v10 = vld [vmem:[%s2011_s1 + $0x30] sm:$0xff] (!%p190_p2)  ;;  %v246_v11 = vld [vmem:[%s2011_s1 + $0x48] sm:$0xff] (!%p190_p2)  ;;  %p219_p3 = scmp.lt.s32.totalorder (!%p190_p2), %s218_s26, 5  ;;  %vm764_vm4 = vcmask (!%p190_p2), 424960   ;;  %vm860_vm11 = vcmask (!%p190_p2), 179200  }
   0x8   : > { %1198 = vmatprep.subr.bf16.mxu0 (!%p190_p2), %v1197_v3  ;;  %v248_v12 = vld [vmem:[%s2011_s1 + $0x58] sm:$0xff] (!%p190_p2)  ;;  %v1203_v13 = vpack.c.bf16 (!%p190_p2), %v243_v10, %v241_v9  ;;  %v245_v15 = vld [vmem:[%s2011_s1 + $0x40] sm:$0xff] (!%p190_p2)  ;;  %v247_v16 = vld [vmem:[%s2011_s1 + $0x50] sm:$0xff] (!%p190_p2)  ;;  %vm945_vm12 = vcmask (!%p190_p2), 736256  }
   0x9   : > { %1200 = vmatpush1.bf16.msra.mxu0 (!%p190_p2), %v1199_v7  ;;  %v1205_v14 = vpack.c.bf16 (!%p190_p2), %v248_v12, %v246_v11  ;;  %v250_v17 = vld [vmem:[%s2011_s1 + $0x68] sm:$0xff] (!%p190_p2)  ;;  %v252_v18 = vld [vmem:[%s2011_s1 + $0x78] sm:$0xff] (!%p190_p2)  ;;  %v1207_v19 = vpack.c.bf16 (!%p190_p2), %v247_v16, %v245_v15  ;;  %v249_v21 = vld [vmem:[%s2011_s1 + $0x60] sm:$0xff] (!%p190_p2) }
   0xa   : > { %1202 = vmatprep.subr.bf16.mxu0 (!%p190_p2), %v1201_v8  ;;  %v1209_v20 = vpack.c.bf16 (!%p190_p2), %v252_v18, %v250_v17  ;;  %v251_v22 = vld [vmem:[%s2011_s1 + $0x70] sm:$0xff] (!%p190_p2)  ;;  %v254_v23 = vld [vmem:[%s2011_s1 + $0x88] sm:$0xff] (!%p190_p2)  ;;  %v256_v24 = vld [vmem:[%s2011_s1 + $0x98] sm:$0xff] (!%p190_p2) }
   0xb   : > { %v1211_v25 = vpack.c.bf16 (!%p190_p2), %v251_v22, %v249_v21  ;;  %v1213_v26 = vpack.c.bf16 (!%p190_p2), %v256_v24, %v254_v23  ;;  %v253_v27 = vld [vmem:[%s2011_s1 + $0x80] sm:$0xff] (!%p190_p2)  ;;  %v255_v28 = vld [vmem:[%s2011_s1 + $0x90] sm:$0xff] (!%p190_p2)  ;;  %v258_v29 = vld [vmem:[%s2011_s1 + $0xa8] sm:$0xff] (!%p190_p2) }
   0xc   : > { %v260_v30 = vld [vmem:[%s2011_s1 + $0xb8] sm:$0xff] (!%p190_p2)  ;;  %v1215_v31 = vpack.c.bf16 (!%p190_p2), %v255_v28, %v253_v27  ;;  %v257_v32 = vld [vmem:[%s2011_s1 + $0xa0] sm:$0xff] (!%p190_p2)  ;;  %v1016_v34 = vld [vmem:[%s2011_s1 + $0x1a8] sm:$0xff] (!%p190_p2) }
   0xd   : > { %1204 = vmatpush1.bf16.msra.mxu0 %v1203_v13  ;;  %s2017_s26 = smov (!%p219_p3, %s218_s26), 5  ;;  %v1014_v33 = vld [vmem:[%s2011_s1 + $0x198] sm:$0xff]  ;;  %v1217_v35 = vpack.c.bf16 %v260_v30, %v258_v29  ;;  %v259_v36 = vld [vmem:[%s2011_s1 + $0xb0] sm:$0xff]  ;;  %v1015_v39 = vld [vmem:[%s2011_s1 + $0x1a0] sm:$0xff] }
   0xe   : > { %1206 = vmatprep.subr.bf16.mxu0 %v1205_v14  ;;  %s1134_s10 = sshll.u32 %s2017_s26, 4  ;;  %v1149_v37 = vpack.c.bf16 %v1016_v34, %v1014_v33  ;;  %v1013_v38 = vld [vmem:[%s2011_s1 + $0x190] sm:$0xff]  ;;  %v262_v40 = vld [vmem:[%s2011_s1 + $0xc8] sm:$0xff]  ;;  %v264_v41 = vld [vmem:[%s2011_s1 + $0xd8] sm:$0xff]  ;;  %v1219_v44 = vpack.c.bf16 %v259_v36, %v257_v32  ;;  %s1011_s26 = sshll.u32 %s1004_s19, 1 }
   0xf   : > { %s1473_s22 = scalar_lea.vmem %s2010_s0, %s1134_s10  ;;  %v1151_v42 = vpack.c.bf16 %v1015_v39, %v1013_v38  ;;  %v1018_v45 = vld [vmem:[%s2011_s1 + $0x1b8] sm:$0xff]  ;;  %v1020_v46 = vld [vmem:[%s2011_s1 + $0x1c8] sm:$0xff]  ;;  %v1017_v47 = vld [vmem:[%s2011_s1 + $0x1b0] sm:$0xff]  ;;  %v1221_v48 = vpack.c.bf16 %v264_v41, %v262_v40  ;;  %p226_p4 = scmp.lt.s32.totalorder %s1011_s26, 3 }
  0x10   : > { %v232_v43 = vld [vmem:[%s1473_s22 + $0x8] sm:$0xff]  ;;  %1150 = vmatprep.subr.bf16.mxu1 %v1149_v37  ;;  %v261_v49 = vld [vmem:[%s2011_s1 + $0xc0] sm:$0xff]  ;;  %v263_v50 = vld [vmem:[%s2011_s1 + $0xd0] sm:$0xff]  ;;  %v1153_v51 = vpack.c.bf16 %v1020_v46, %v1018_v45 }
  0x11   : > { %1208 = vmatpush1.bf16.msra.mxu0 %v1207_v19  ;;  %1066 = vmatprep.mubr.msk.f32.mxu0 %vm362_vm0, %v232_v43  ;;  %v1019_v52 = vld [vmem:[%s2011_s1 + $0x1c0] sm:$0xff]  ;;  %v266_v53 = vld [vmem:[%s2011_s1 + $0xe8] sm:$0xff]  ;;  %v268_v54 = vld [vmem:[%s2011_s1 + $0xf8] sm:$0xff]  ;;  %v1223_v60 = vpack.c.bf16 %v263_v50, %v261_v49  ;;  %s2019_s26 = smov (!%p226_p4, %s1011_s26), 3 }
  0x12   : > { %1210 = vmatprep.subr.bf16.mxu0 %v1209_v20  ;;  %1152 = vmatpush1.bf16.msra.mxu1 %v1151_v42  ;;  %v1155_v55 = vpack.c.bf16 %v1019_v52, %v1017_v47  ;;  %v1022_v56 = vld [vmem:[%s2011_s1 + $0x1d8] sm:$0xff]  ;;  %v1024_v57 = vld [vmem:[%s2011_s1 + $0x1e8] sm:$0xff]  ;;  %v1021_v58 = vld [vmem:[%s2011_s1 + $0x1d0] sm:$0xff]  ;;  %v1225_v1 = vpack.c.bf16 %v268_v54, %v266_v53  ;;  %s1012_s23 = sshll.u32 %s2019_s26, 3 }
  0x13   : > { %1154 = vmatprep.subr.bf16.mxu1 %v1153_v51  ;;  %v1023_v59 = vld [vmem:[%s2011_s1 + $0x1e0] sm:$0xff]  ;;  %v267_v62 = vld [vmem:[%s2011_s1 + $0xf0] sm:$0xff]  ;;  %v1157_v63 = vpack.c.bf16 %v1024_v57, %v1022_v56  ;;  %v270_v2 = vld [vmem:[%s2011_s1 + $0x108] sm:$0xff]  ;;  %s229_s27 = scalar_lea.vmem %s2015_s5, %s1012_s23 }
  0x14   : > { %v265_v61 = vld [vmem:[%s2011_s1 + $0xe0] sm:$0xff]  ;;  %v1159_v0 = vpack.c.bf16 %v1023_v59, %v1021_v58  ;;  %v1026_v3 = vld [vmem:[%s2011_s1 + $0x1f8] sm:$0xff]  ;;  %v1028_v4 = vld [vmem:[%s2011_s1 + $0x208] sm:$0xff] }
  0x15   : > { %1212 = vmatpush1.bf16.msra.mxu0 %v1211_v25  ;;  %v272_v5 = vld [vmem:[%s2011_s1 + $0x118] sm:$0xff]  ;;  %v1161_v6 = vpack.c.bf16 %v1028_v4, %v1026_v3  ;;  %v1025_v7 = vld [vmem:[%s2011_s1 + $0x1f0] sm:$0xff]  ;;  %v1027_v8 = vld [vmem:[%s2011_s1 + $0x200] sm:$0xff]  ;;  %v1227_v9 = vpack.c.bf16 %v267_v62, %v265_v61 }
  0x16   : > { %1214 = vmatprep.subr.bf16.mxu0 %v1213_v26  ;;  %1156 = vmatpush1.bf16.msra.mxu1 %v1155_v55  ;;  %v269_v10 = vld [vmem:[%s2011_s1 + $0x100] sm:$0xff]  ;;  %v1163_v11 = vpack.c.bf16 %v1027_v8, %v1025_v7  ;;  %v1030_v12 = vld [vmem:[%s2011_s1 + $0x218] sm:$0xff]  ;;  %v1032_v13 = vld [vmem:[%s2011_s1 + $0x228] sm:$0xff]  ;;  %v1229_v14 = vpack.c.bf16 %v272_v5, %v270_v2 }
  0x17   : > { %1158 = vmatprep.subr.bf16.mxu1 %v1157_v63  ;;  %v271_v15 = vld [vmem:[%s2011_s1 + $0x110] sm:$0xff]  ;;  %v1165_v16 = vpack.c.bf16 %v1032_v13, %v1030_v12  ;;  %v1031_v18 = vld [vmem:[%s2011_s1 + $0x220] sm:$0xff]  ;;  %v274_v19 = vld [vmem:[%s2011_s1 + $0x128] sm:$0xff] }
  0x18   : > { %v1029_v17 = vld [vmem:[%s2011_s1 + $0x210] sm:$0xff]  ;;  %v276_v20 = vld [vmem:[%s2011_s1 + $0x138] sm:$0xff]  ;;  %v1036_v22 = vld [vmem:[%s2011_s1 + $0x248] sm:$0xff]  ;;  %v1231_v23 = vpack.c.bf16 %v271_v15, %v269_v10 }
  0x19   : > { %1216 = vmatpush1.bf16.msra.mxu0 %v1215_v31  ;;  %v1034_v21 = vld [vmem:[%s2011_s1 + $0x238] sm:$0xff]  ;;  %v273_v24 = vld [vmem:[%s2011_s1 + $0x120] sm:$0xff]  ;;  %v275_v25 = vld [vmem:[%s2011_s1 + $0x130] sm:$0xff]  ;;  %v1167_v26 = vpack.c.bf16 %v1031_v18, %v1029_v17  ;;  %v1233_v27 = vpack.c.bf16 %v276_v20, %v274_v19 }
  0x1a   : > { %1218 = vmatprep.subr.bf16.mxu0 %v1217_v35  ;;  %1160 = vmatpush1.bf16.msra.mxu1 %v1159_v0  ;;  %v278_v28 = vld [vmem:[%s2011_s1 + $0x148] sm:$0xff]  ;;  %v1169_v29 = vpack.c.bf16 %v1036_v22, %v1034_v21  ;;  %v1033_v30 = vld [vmem:[%s2011_s1 + $0x230] sm:$0xff]  ;;  %v1035_v31 = vld [vmem:[%s2011_s1 + $0x240] sm:$0xff]  ;;  %v1235_v35 = vpack.c.bf16 %v275_v25, %v273_v24 }
  0x1b   : > { %1162 = vmatprep.subr.bf16.mxu1 %v1161_v6  ;;  %v280_v32 = vld [vmem:[%s2011_s1 + $0x158] sm:$0xff]  ;;  %v1040_v34 = vld [vmem:[%s2011_s1 + $0x268] sm:$0xff]  ;;  %v277_v36 = vld [vmem:[%s2011_s1 + $0x140] sm:$0xff]  ;;  %v1171_v38 = vpack.c.bf16 %v1035_v31, %v1033_v30 }
  0x1c   : > { %v1038_v33 = vld [vmem:[%s2011_s1 + $0x258] sm:$0xff]  ;;  %v279_v37 = vld [vmem:[%s2011_s1 + $0x150] sm:$0xff]  ;;  %v1237_v39 = vpack.c.bf16 %v280_v32, %v278_v28  ;;  %v282_v40 = vld [vmem:[%s2011_s1 + $0x168] sm:$0xff] }
  0x1d   : > { %1220 = vmatpush1.bf16.msra.mxu0 %v1219_v44  ;;  %v1173_v41 = vpack.c.bf16 %v1040_v34, %v1038_v33  ;;  %v1037_v42 = vld [vmem:[%s2011_s1 + $0x250] sm:$0xff]  ;;  %v1039_v43 = vld [vmem:[%s2011_s1 + $0x260] sm:$0xff]  ;;  %v284_v44 = vld [vmem:[%s2011_s1 + $0x178] sm:$0xff]  ;;  %v1239_v47 = vpack.c.bf16 %v279_v37, %v277_v36 }
  0x1e   : > { %1222 = vmatprep.subr.bf16.mxu0 %v1221_v48  ;;  %1164 = vmatpush1.bf16.msra.mxu1 %v1163_v11  ;;  %v1042_v45 = vld [vmem:[%s2011_s1 + $0x278] sm:$0xff]  ;;  %v1044_v46 = vld [vmem:[%s2011_s1 + $0x288] sm:$0xff]  ;;  %v281_v48 = vld [vmem:[%s2011_s1 + $0x160] sm:$0xff]  ;;  %v1175_v49 = vpack.c.bf16 %v1039_v43, %v1037_v42  ;;  %v1241_v50 = vpack.c.bf16 %v284_v44, %v282_v40 }
  0x1f   : > { %1166 = vmatprep.subr.bf16.mxu1 %v1165_v16  ;;  %v283_v51 = vld [vmem:[%s2011_s1 + $0x170] sm:$0xff]  ;;  %v1177_v52 = vpack.c.bf16 %v1044_v46, %v1042_v45  ;;  %v1043_v54 = vld [vmem:[%s2011_s1 + $0x280] sm:$0xff]  ;;  %v1046_v55 = vld [vmem:[%s2011_s1 + $0x298] sm:$0xff] }
  0x20   : > { %v1041_v53 = vld [vmem:[%s2011_s1 + $0x270] sm:$0xff]  ;;  %v1048_v56 = vld [vmem:[%s2011_s1 + $0x2a8] sm:$0xff]  ;;  %v1243_v57 = vpack.c.bf16 %v283_v51, %v281_v48  ;;  %v1047_v62 = vld [vmem:[%s2011_s1 + $0x2a0] sm:$0xff] }
  0x21   : > { %1224 = vmatpush1.bf16.msra.mxu0 %v1223_v60  ;;  %v1179_v58 = vpack.c.bf16 %v1043_v54, %v1041_v53  ;;  %v286_v59 = vld [vmem:[%s2011_s1 + $0x188] sm:$0xff]  ;;  %v1181_v60 = vpack.c.bf16 %v1048_v56, %v1046_v55  ;;  %v1045_v61 = vld [vmem:[%s2011_s1 + $0x290] sm:$0xff]  ;;  %v1072_v0 = vld [vmem:[%s2011_s1 + $0x338] sm:$0xff] }
  0x22   : > { %1226 = vmatprep.subr.bf16.mxu0 %v1225_v1  ;;  %1168 = vmatpush1.bf16.msra.mxu1 %v1167_v26  ;;  %v1070_v63 = vld [vmem:[%s2011_s1 + $0x328] sm:$0xff]  ;;  %v1069_v1 = vld [vmem:[%s2011_s1 + $0x320] sm:$0xff]  ;;  %v1071_v2 = vld [vmem:[%s2011_s1 + $0x330] sm:$0xff]  ;;  %v1183_v8 = vpack.c.bf16 %v1047_v62, %v1045_v61 }
  0x23   : > { %1170 = vmatprep.subr.bf16.mxu1 %v1169_v29  ;;  %v1050_v3 = vld [vmem:[%s2011_s1 + $0x2b8] sm:$0xff]  ;;  %v1052_v4 = vld [vmem:[%s2011_s1 + $0x2c8] sm:$0xff]  ;;  %v285_v5 = vld [vmem:[%s2011_s1 + $0x180] sm:$0xff] }
  0x24   : > { %v1074_v6 = vld [vmem:[%s2011_s1 + $0x348] sm:$0xff]  ;;  %v1076_v7 = vld [vmem:[%s2011_s1 + $0x358] sm:$0xff]  ;;  %v1049_v10 = vld [vmem:[%s2011_s1 + $0x2b0] sm:$0xff]  ;;  %v1185_v15 = vpack.c.bf16 %v1052_v4, %v1050_v3 }
  0x25   : > { %1228 = vmatpush1.bf16.msra.mxu0 %v1227_v9  ;;  %v1245_v9 = vpack.c.bf16 %v1072_v0, %v1070_v63  ;;  %v1051_v11 = vld [vmem:[%s2011_s1 + $0x2c0] sm:$0xff]  ;;  %v1700_v12 = vld [vmem:[%s1473_s22 + $0x18] sm:$0xff]  ;;  %v1056_v17 = vld [vmem:[%s2011_s1 + $0x2e8] sm:$0xff]  ;;  %v1249_v19 = vpack.c.bf16 %v1076_v7, %v1074_v6 }
  0x26   : > { %1230 = vmatprep.subr.bf16.mxu0 %v1229_v14  ;;  %1172 = vmatpush1.bf16.msra.mxu1 %v1171_v38  ;;  %v231_v13 = vld [vmem:[%s1473_s22] sm:$0xff]  ;;  %v1247_v14 = vpack.c.bf16 %v1071_v2, %v1069_v1  ;;  %v1054_v16 = vld [vmem:[%s2011_s1 + $0x2d8] sm:$0xff]  ;;  %v353_v18 = vrot.slane %v1700_v12, 1  ;;  %v1075_v21 = vld [vmem:[%s2011_s1 + $0x350] sm:$0xff]  ;;  %v1187_v25 = vpack.c.bf16 %v1051_v11, %v1049_v10 }
  0x27   : > { %1174 = vmatprep.subr.bf16.mxu1 %v1173_v41  ;;  %v1073_v20 = vld [vmem:[%s2011_s1 + $0x340] sm:$0xff]  ;;  %v288_v22 = vld [vmem:[%s1473_s22 + $0x8] sm:$0xfe]  ;;  %v1080_v24 = vld [vmem:[%s2011_s1 + $0x378] sm:$0xff]  ;;  %v1189_v28 = vpack.c.bf16 %v1056_v17, %v1054_v16 }
  0x28   : > { %v352_v26 = vrot.slane %v288_v22, 1  ;;  %v1053_v29 = vld [vmem:[%s2011_s1 + $0x2d0] sm:$0xff]  ;;  %v1055_v30 = vld [vmem:[%s2011_s1 + $0x2e0] sm:$0xff]  ;;  %v1251_v31 = vpack.c.bf16 %v1075_v21, %v1073_v20  ;;  %v1058_v33 = vld [vmem:[%s2011_s1 + $0x2f8] sm:$0xff] }
  0x29   : > { %1232 = vmatpush1.bf16.msra.mxu0 %v1231_v23  ;;  %v1078_v23 = vld [vmem:[%s2011_s1 + $0x368] sm:$0xff]  ;;  %v1731_v32 = vld [vmem:[%s1473_s22 + $0x10] sm:$0xff]  ;;  %v1077_v37 = vld [vmem:[%s2011_s1 + $0x360] sm:$0xff]  ;;  %v1191_v44 = vpack.c.bf16 %v1055_v30, %v1053_v29 }
  0x2a   : > { %1234 = vmatprep.subr.bf16.mxu0 %v1233_v27  ;;  %1176 = vmatpush1.bf16.msra.mxu1 %v1175_v49  ;;  %v544_v27 = vld [vmem:[%s1473_s22 + $0x8] sm:$0xfc]  ;;  %v1253_v36 = vpack.c.bf16 %v1080_v24, %v1078_v23  ;;  %v1079_v38 = vld [vmem:[%s2011_s1 + $0x370] sm:$0xff]  ;;  %v1084_v43 = vld [vmem:[%s2011_s1 + $0x398] sm:$0xff]  ;;  %v350_v61 = vrot.slane %v1731_v32, 1  ;;  %v1361_v23 = vmov 0.0|0.0  }
  0x2b   : > { %1178 = vmatprep.subr.bf16.mxu1 %v1177_v52  ;;  %v1060_v34 = vld [vmem:[%s2011_s1 + $0x308] sm:$0xff]  ;;  %v606_v41 = vrot.slane %v544_v27, 2  ;;  %v1057_v46 = vld [vmem:[%s2011_s1 + $0x2f0] sm:$0xff]  ;;  %v1255_v48 = vpack.c.bf16 %v1079_v38, %v1077_v37  ;;  %v235_v49 = vld [vmem:[%s1473_s22 + $0x20] sm:$0x3f] }
  0x2c   : > { %v236_v40 = vld [vmem:[%s1473_s22 + $0x28] sm:$0x3f]  ;;  %v1193_v45 = vpack.c.bf16 %v1060_v34, %v1058_v33  ;;  %v1081_v51 = vld [vmem:[%s2011_s1 + $0x380] sm:$0xff]  ;;  %v1083_v52 = vld [vmem:[%s2011_s1 + $0x390] sm:$0xff] }
  0x2d   : > { %1236 = vmatpush1.bf16.msra.mxu0 %v1235_v35  ;;  %v354_v35 = vsel %vm348_vm1, %v352_v26, %v353_v18  ;;  %v1082_v42 = vld [vmem:[%s2011_s1 + $0x388] sm:$0xff]  ;;  %v287_v53 = vld [vmem:[%s1473_s22] sm:$0xfe]  ;;  %v1088_v56 = vld [vmem:[%s2011_s1 + $0x3b8] sm:$0xff] }
  0x2e   : > { %1238 = vmatprep.subr.bf16.mxu0 %v1237_v39  ;;  %1180 = vmatpush1.bf16.msra.mxu1 %v1179_v58  ;;  %v607_v39 = vrot.slane %v1700_v12, 2  ;;  %v1086_v55 = vld [vmem:[%s2011_s1 + $0x3a8] sm:$0xff]  ;;  %v1062_v62 = vld [vmem:[%s2011_s1 + $0x318] sm:$0xff]  ;;  %v349_v63 = vrot.slane %v287_v53, 1  ;;  %v1087_v1 = vld [vmem:[%s2011_s1 + $0x3b0] sm:$0xff] }
  0x2f   : > { %1182 = vmatprep.subr.bf16.mxu1 %v1181_v60  ;;  %1063 = vmatprep.mubr.msk.f32.mxu1 %vm362_vm0, %v354_v35  ;;  %v290_v58 = vld [vmem:[%s1473_s22 + $0x28] sm:$0x7f]  ;;  %v1085_v60 = vld [vmem:[%s2011_s1 + $0x3a0] sm:$0xff]  ;;  %v1261_v0 = vpack.c.bf16 %v1088_v56, %v1086_v55  ;;  %v1096_v20 = vld [vmem:[%s2011_s1 + $0x3f8] sm:$0xff] }
  0x30   : > { %v608_v54 = vsel %vm602_vm2, %v606_v41, %v607_v39  ;;  %v1090_v2 = vld [vmem:[%s2011_s1 + $0x3c8] sm:$0xff]  ;;  %v357_v3 = vrot.slane %v290_v58, 1  ;;  %v289_v4 = vld [vmem:[%s1473_s22 + $0x20] sm:$0x7f]  ;;  %v351_v10 = vsel %vm348_vm1, %v349_v63, %v350_v61  ;;  %v743_v21 = vld [vmem:[%s2013_s3 + $0x10] sm:$0xff] }
  0x31   : > { %1240 = vmatpush1.bf16.msra.mxu0 %v1239_v47  ;;  %v1059_v47 = vld [vmem:[%s2011_s1 + $0x300] sm:$0xff]  ;;  %v742_v7 = vld [vmem:[%s2013_s3 + $0x8] sm:$0xff]  ;;  %v355_v11 = vrot.slane %v289_v4, 1  ;;  %v744_v22 = vld [vmem:[%s2013_s3 + $0x18] sm:$0xff] }
  0x32   : > { %1242 = vmatprep.subr.bf16.mxu0 %v1241_v50  ;;  %1184 = vmatpush1.bf16.msra.mxu1 %v1183_v8  ;;  %v1257_v50 = vpack.c.bf16 %v1084_v43, %v1082_v42  ;;  %v741_v6 = vld [vmem:[%s2013_s3] sm:$0xff]  ;;  %v1061_v8 = vld [vmem:[%s2011_s1 + $0x310] sm:$0xff]  ;;  %v1094_v16 = vld [vmem:[%s2011_s1 + $0x3e8] sm:$0xff]  ;;  %v358_v17 = vsel %vm348_vm1, %v353_v18, %v357_v3  ;;  %v1297_v29 = vpack.c.bf16 %v744_v22, %v743_v21 }
  0x33   : > { %1186 = vmatprep.subr.bf16.mxu1 %v1185_v15  ;;  %v1091_v15 = vld [vmem:[%s2011_s1 + $0x3d0] sm:$0xff]  ;;  %v356_v24 = vsel %vm348_vm1, %v350_v61, %v355_v11  ;;  %v1093_v26 = vld [vmem:[%s2011_s1 + $0x3e0] sm:$0xff]  ;;  %v1100_v30 = vld [vmem:[%s2011_s1 + $0x418] sm:$0xff] }
  0x34   : > { %v1095_v27 = vld [vmem:[%s2011_s1 + $0x3f0] sm:$0xff]  ;;  %v746_v33 = vld [vmem:[%s2013_s3 + $0x28] sm:$0xff]  ;;  %v1104_v41 = vld [vmem:[%s2011_s1 + $0x438] sm:$0xff] }
  0x35   : > { %1244 = vmatpush1.bf16.msra.mxu0 %v1243_v57  ;;  %v1195_v57 = vpack.c.bf16 %v1059_v47, %v1057_v46  ;;  %v1271_v34 = vpack.c.bf16 %v1095_v27, %v1093_v26  ;;  %v1099_v37 = vld [vmem:[%s2011_s1 + $0x410] sm:$0xff]  ;;  %v1102_v38 = vld [vmem:[%s2011_s1 + $0x428] sm:$0xff]  ;;  %v748_v43 = vld [vmem:[%s2013_s3 + $0x38] sm:$0xff] }
  0x36   : > { %508 = vmatprep.subr.mxu0 %v286_v59  ;;  %1188 = vmatpush1.bf16.msra.mxu1 %v1187_v25  ;;  %v1259_v59 = vpack.c.bf16 %v1083_v52, %v1081_v51  ;;  %v1269_v25 = vpack.c.bf16 %v1096_v20, %v1094_v16  ;;  %v747_v42 = vld [vmem:[%s2013_s3 + $0x30] sm:$0xff]  ;;  %v1101_v46 = vld [vmem:[%s2011_s1 + $0x420] sm:$0xff]  ;;  %v750_v52 = vld [vmem:[%s2013_s3 + $0x48] sm:$0xff]  ;;  %v604_v20 = vrot.slane %v1731_v32, 2 }
  0x37   : > { %1190 = vmatprep.subr.bf16.mxu1 %v1189_v28  ;;  %v1098_v28 = vld [vmem:[%s2011_s1 + $0x408] sm:$0xff]  ;;  %v1103_v47 = vld [vmem:[%s2011_s1 + $0x430] sm:$0xff]  ;;  %v749_v51 = vld [vmem:[%s2013_s3 + $0x40] sm:$0xff] }
  0x38   : > { %v1273_v35 = vpack.c.bf16 %v1100_v30, %v1098_v28  ;;  %v1279_v53 = vpack.c.bf16 %v1103_v47, %v1101_v46  ;;  %v1105_v55 = vld [vmem:[%s2011_s1 + $0x440] sm:$0xff]  ;;  %v1107_v56 = vld [vmem:[%s2011_s1 + $0x450] sm:$0xff]  ;;  %v1306_v58 = vpack.c.bf16 %v750_v52, %v749_v51  ;;  %v752_v61 = vld [vmem:[%s2013_s3 + $0x58] sm:$0xff] }
  0x39   : > { %509 = vmatpush1.msra.mxu0 %v285_v5  ;;  %v1092_v5 = vld [vmem:[%s2011_s1 + $0x3d8] sm:$0xff]  ;;  %v1118_v21 = vld [vmem:[%s2011_s1 + $0x4a8] sm:$0xff]  ;;  %v545_v26 = vld [vmem:[%s1473_s22 + $0x20] sm:$0xff] }
  0x3a   : > { %1246 = vmatprep.subr.bf16.mxu0 %v1245_v9  ;;  %525 = vmatmul.mubr.f32.vlgmr.msra.gmra.mrb[0].mxu0 %v231_v13  ;;  %v1263_v9 = vpack.c.bf16 %v1087_v1, %v1085_v60  ;;  %v1265_v13 = vpack.c.bf16 %v1092_v5, %v1090_v2  ;;  %v751_v60 = vld [vmem:[%s2013_s3 + $0x50] sm:$0xff]  ;;  %v1114_v2 = vld [vmem:[%s2011_s1 + $0x488] sm:$0xff]  ;;  %v1116_v4 = vld [vmem:[%s2011_s1 + $0x498] sm:$0xff] }
  0x3b   : > { %1248 = vmatpush1.bf16.msra.mxu0 %v1247_v14  ;;  %1067 = vmatprep.mubr.msk.f32.mxu0 %vm362_vm0, %v1700_v12  ;;  %v1089_v14 = vld [vmem:[%s2011_s1 + $0x3c0] sm:$0xff]  ;;  %v1111_v1 = vld [vmem:[%s2011_s1 + $0x470] sm:$0xff]  ;;  %v760_v12 = vld [vmem:[%s2013_s3 + $0x98] sm:$0xff] }
  0x3c   : > { %1250 = vmatprep.subr.bf16.mxu0 %v1249_v19  ;;  %1192 = vmatpush1.bf16.msra.mxu1 %v1191_v44  ;;  %v1294_v19 = vpack.c.bf16 %v742_v7, %v741_v6  ;;  %v1267_v18 = vpack.c.bf16 %v1091_v15, %v1089_v14  ;;  %v753_v5 = vld [vmem:[%s2013_s3 + $0x60] sm:$0xff]  ;;  %v754_v6 = vld [vmem:[%s2013_s3 + $0x68] sm:$0xff]  ;;  %v756_v14 = vld [vmem:[%s2013_s3 + $0x78] sm:$0xff] }
  0x3d   : > { %1194 = vmatprep.subr.bf16.mxu1 %v1193_v45  ;;  %v1277_v45 = vpack.c.bf16 %v1104_v41, %v1102_v38  ;;  %v543_v15 = vld [vmem:[%s1473_s22] sm:$0xfc]  ;;  %v763_v38 = vld [vmem:[%s2013_s3 + $0xb0] sm:$0xf] }
  0x3e   : > { %531 = vmatmul.mubr.f32.gmra.mrb[2].mxu0 %v1731_v32  ;;  %v603_v22 = vrot.slane %v543_v15, 2  ;;  %v1117_v32 = vld [vmem:[%s2011_s1 + $0x4a0] sm:$0xff] }
  0x3f   : > { %1252 = vmatpush1.bf16.msra.mxu0 %v1251_v31  ;;  %1068 = vmatprep.mubr.msk.f32.mxu0 %vm362_vm0, %v236_v40  ;;  %v745_v31 = vld [vmem:[%s2013_s3 + $0x20] sm:$0xff] }
  0x40   : > { %1254 = vmatprep.subr.bf16.mxu0 %v1253_v36  ;;  %1196 = vmatpush1.bf16.msra.mxu1 %v1195_v57  ;;  %v1097_v36 = vld [vmem:[%s2011_s1 + $0x400] sm:$0xff]  ;;  %v1300_v40 = vpack.c.bf16 %v746_v33, %v745_v31  ;;  %v1110_v57 = vld [vmem:[%s2011_s1 + $0x468] sm:$0xff]  ;;  %v605_v28 = vsel %vm602_vm2, %v603_v22, %v604_v20  ;;  %v759_v33 = vld [vmem:[%s2013_s3 + $0x90] sm:$0xff] }
  0x41   : > { %417 = vmatprep.subr.mxu1 %v1062_v62  ;;  %v1275_v44 = vpack.c.bf16 %v1099_v37, %v1097_v36  ;;  %v1283_v62 = vpack.c.bf16 %v1107_v56, %v1105_v55  ;;  %v1362_v37 = vmov 0.0  }
  0x42   : > { %537 = vmatmul.mubr.f32.gmra.mrb[4].mxu0 %v235_v49  ;;  %v1303_v49 = vpack.c.bf16 %v748_v43, %v747_v42 }
  0x43   : > { %1256 = vmatpush1.bf16.msra.mxu0 %v1255_v48  ;;  %1119 = vmatprep.mubr.msk.f32.mxu0 %vm362_vm0, %v608_v54  ;;  %v1106_v48 = vld [vmem:[%s2011_s1 + $0x448] sm:$0xff] }
  0x44   : > { %1258 = vmatprep.subr.bf16.mxu0 %v1257_v50  ;;  %418 = vmatpush1.msra.mxu1 %v1061_v8  ;;  %v1108_v50 = vld [vmem:[%s2011_s1 + $0x458] sm:$0xff]  ;;  %v1289_v8 = vpack.c.bf16 %v1116_v4, %v1114_v2  ;;  %v1363_v4 = vmov 1.0  }
  0x45   : > { %434 = vmatmul.mubr.f32.vlgmr.msra.gmra.mrb[0].mxu1 %v351_v10  ;;  %1293 = vmatprep.subr.bf16.mxu1 %v1361_v23  ;;  %v1281_v54 = vpack.c.bf16 %v1108_v50, %v1106_v48  ;;  %v1115_v10 = vld [vmem:[%s2011_s1 + $0x490] sm:$0xff] }
  0x46   : > { %1064 = vmatprep.mubr.msk.f32.mxu1 %vm362_vm0, %v358_v17  ;;  %1295 = vmatpush1.bf16.msra.mxu1 %v1294_v19  ;;  %v546_v17 = vld [vmem:[%s1473_s22 + $0x28] sm:$0xff] }
  0x47   : > { %1260 = vmatpush1.bf16.msra.mxu0 %v1259_v59  ;;  %1296 = vmatprep.subr.bf16.mxu1 %v1361_v23  ;;  %v1112_v59 = vld [vmem:[%s2011_s1 + $0x478] sm:$0xff] }
  0x48   : > { %1262 = vmatprep.subr.bf16.mxu0 %v1261_v0  ;;  %v1285_v63 = vpack.c.bf16 %v1112_v59, %v1110_v57  ;;  %v1109_v0 = vld [vmem:[%s2011_s1 + $0x460] sm:$0xff] }
  0x49   : > { %440 = vmatmul.mubr.f32.gmra.mrb[2].mxu1 %v356_v24  ;;  %v1287_v7 = vpack.c.bf16 %v1111_v1, %v1109_v0  ;;  %v758_v24 = vld [vmem:[%s2013_s3 + $0x88] sm:$0xff] }
  0x4a   : > { %1065 = vmatprep.mubr.msk.f32.mxu1 %vm362_vm0, %v357_v3  ;;  %1298 = vmatpush1.bf16.msra.mxu1 %v1297_v29  ;;  %v1309_v3 = vpack.c.bf16 %v752_v61, %v751_v60  ;;  %v609_v29 = vrot.slane %v545_v26, 2 }
  0x4b   : > { %1264 = vmatpush1.bf16.msra.mxu0 %v1263_v9  ;;  %1299 = vmatprep.subr.bf16.mxu1 %v1361_v23  ;;  %v1113_v9 = vld [vmem:[%s2011_s1 + $0x480] sm:$0xff] }
  0x4c   : > { %1266 = vmatprep.subr.bf16.mxu0 %v1265_v13  ;;  %v755_v13 = vld [vmem:[%s2013_s3 + $0x70] sm:$0xff]  ;;  %v1291_v16 = vpack.c.bf16 %v1115_v10, %v1113_v9  ;;  %v610_v31 = vsel %vm602_vm2, %v604_v20, %v609_v29  ;;  %v858_v10 = vld [vmem:[%s2014_s4] sm:$0xff]  ;;  %v859_v20 = vld [vmem:[%s2014_s4 + $0x8] sm:$0xff] }
  0x4d   : > { %446 = vmatmul.mubr.f32.gmra.mrb[4].mxu1 %v355_v11  ;;  %v1312_v11 = vpack.c.bf16 %v754_v6, %v753_v5  ;;  %v1315_v19 = vpack.c.bf16 %v756_v14, %v755_v13 }
  0x4e   : > { %1301 = vmatpush1.bf16.msra.mxu1 %v1300_v40 }
  0x4f   : > { %1268 = vmatpush1.bf16.msra.mxu0 %v1267_v18  ;;  %1302 = vmatprep.subr.bf16.mxu1 %v1361_v23  ;;  %v757_v18 = vld [vmem:[%s2013_s3 + $0x80] sm:$0xff] }
  0x50   : > { %1270 = vmatprep.subr.bf16.mxu0 %v1269_v25  ;;  %v611_v25 = vrot.slane %v546_v17, 2  ;;  %v1318_v27 = vpack.c.bf16 %v758_v24, %v757_v18 }
  0x52   : > { %1304 = vmatpush1.bf16.msra.mxu1 %v1303_v49  ;;  %v612_v30 = vsel %vm602_vm2, %v607_v39, %v611_v25  ;;  %v1321_v39 = vpack.c.bf16 %v760_v12, %v759_v33  ;;  %v711_v49 = vld [vmem:[%s2012_s2] sm:$0x3] }
  0x53   : > { %1272 = vmatpush1.bf16.msra.mxu0 %v1271_v34  ;;  %1305 = vmatprep.subr.bf16.mxu1 %v1361_v23  ;;  %v761_v34 = vld [vmem:[%s2013_s3 + $0xa0] sm:$0xff] }
  0x54   : > { %1274 = vmatprep.subr.bf16.mxu0 %v1273_v35  ;;  %v762_v35 = vld [vmem:[%s2013_s3 + $0xa8] sm:$0xff] }
  0x55   : > { %v1324_v36 = vpack.c.bf16 %v762_v35, %v761_v34 }
  0x56   : > { %1307 = vmatpush1.bf16.msra.mxu1 %v1306_v58 }
  0x57   : > { %1276 = vmatpush1.bf16.msra.mxu0 %v1275_v44  ;;  %1308 = vmatprep.subr.bf16.mxu1 %v1361_v23 }
  0x58   : > { %1278 = vmatprep.subr.bf16.mxu0 %v1277_v45  ;;  %v713_v45 = vlaneseq }
  0x5a   : > { %1310 = vmatpush1.bf16.msra.mxu1 %v1309_v3  ;;  %v714_v46 = vshrl.u32 %v713_v45, 7 }
  0x5b   : > { %1280 = vmatpush1.bf16.msra.mxu0 %v1279_v53  ;;  %1311 = vmatprep.subr.bf16.mxu1 %v1361_v23 }
  0x5c   : > { %1282 = vmatprep.subr.bf16.mxu0 %v1281_v54  ;;  %v715_v47 = vsub.s32 0, %v714_v46  ;;  %v719_v48 = vsub.s32 1, %v714_v46 }
  0x5e   : > { %1313 = vmatpush1.bf16.msra.mxu1 %v1312_v11  ;;  %v716_v51 = vrot.slane %v711_v49, %v715_v47  ;;  %v720_v52 = vrot.slane %v711_v49, %v719_v48 }
  0x5f   : > { %1284 = vmatpush1.bf16.msra.mxu0 %v1283_v62  ;;  %1314 = vmatprep.subr.bf16.mxu1 %v1361_v23 }
  0x60   : > { %1286 = vmatprep.subr.bf16.mxu0 %v1285_v63 }
  0x62   : > { %1316 = vmatpush1.bf16.msra.mxu1 %v1315_v19 }
  0x63   : > { %1288 = vmatpush1.bf16.msra.mxu0 %v1287_v7  ;;  %1317 = vmatprep.subr.bf16.mxu1 %v1361_v23 }
  0x64   : > { %1290 = vmatprep.subr.bf16.mxu0 %v1289_v8 }
  0x66   : > { %1319 = vmatpush1.bf16.msra.mxu1 %v1318_v27 }
  0x67   : > { %1292 = vmatpush1.bf16.msra.mxu0 %v1291_v16  ;;  %1320 = vmatprep.subr.bf16.mxu1 %v1361_v23 }
  0x68   : > { %670 = vmatprep.subr.mxu0 %v1118_v21 }
  0x6a   : > { %1322 = vmatpush1.bf16.msra.mxu1 %v1321_v39 }
  0x6b   : > { %671 = vmatpush1.msra.mxu0 %v1117_v32  ;;  %1323 = vmatprep.subr.bf16.mxu1 %v1361_v23 }
  0x6c   : > { %687 = vmatmul.mubr.f32.vlgmr.msra.gmra.mrb[0].mxu0 %v605_v28 }
  0x6d   : > { %1120 = vmatprep.mubr.msk.f32.mxu0 %vm362_vm0, %v612_v30 }
  0x6e   : > { %1325 = vmatpush1.bf16.msra.mxu1 %v1324_v36 }
  0x6f   : > { %822 = vmatprep.subr.mxu1 %v1362_v37 }
  0x70   : > { %693 = vmatmul.mubr.f32.gmra.mrb[2].mxu0 %v610_v31 }
  0x71   : > { %1121 = vmatprep.mubr.msk.f32.mxu0 %vm362_vm0, %v611_v25 }
  0x72   : > { %1122 = vmatpush1.msk.msra.mxu1 %vm774_vm3, %v763_v38 }
  0x74   : > { %699 = vmatmul.mubr.f32.gmra.mrb[4].mxu0 %v609_v29 }
 0x118   : > { %v435_v40 = vpop.f32.mrb[0].mxu1 }
 0x119   : > { %v437_v23 = vpop.f32.mrb[1].mxu1 }
 0x11c   : > { %v441_v41 = vpop.f32.mrb[2].mxu1 }
 0x11d   : > { %v443_v42 = vpop.f32.mrb[3].mxu1 }
 0x120   : > { %v447_v43 = vpop.f32.mrb[4].mxu1 }
 0x121   : > { %v449_v44 = vpop.f32.mrb[5].mxu1 }
 0x13f   : > { %v688_v50 = vpop.f32.mrb[0].mxu0 }
 0x140   : > { %v1330_v53 = vadd.f32 %v688_v50, %v435_v40  ;;  %v690_v54 = vpop.f32.mrb[1].mxu0 }
 0x141   : > { %v1331_v55 = vadd.f32 %v690_v54, %v437_v23 }
 0x142   : > { %v723_v56 = vadd.f32 %v1330_v53, %v716_v51 }
 0x143   : > { %v724_v57 = vadd.f32 %v1331_v55, %v720_v52  ;;  %v694_v58 = vpop.f32.mrb[2].mxu0 }
 0x144   : > { %v1332_v59 = vadd.f32 %v694_v58, %v441_v41  ;;  %v696_v60 = vpop.f32.mrb[3].mxu0  ;;  %vm729_vm6 = vcmp.gt.f32.partialorder %v723_v56, 0.5 }
 0x145   : > { %vm730_vm5 = vcmp.gt.f32.partialorder %v724_v57, 0.5  ;;  %v1333_v61 = vadd.f32 %v696_v60, %v443_v42 }
 0x146   : > { %v736_v62 = vsel %vm730_vm5, 1.0, %v1362_v37  ;;  %v725_v63 = vadd.f32 %v1332_v59, %v716_v51 }
 0x147   : > { %v726_v0 = vadd.f32 %v1333_v61, %v720_v52  ;;  %v700_v1 = vpop.f32.mrb[4].mxu0  ;;  %1123 = vmatprep.mubr.msk.f32.mxu1 %vm764_vm4, %v736_v62 }
 0x148   : > { %v1334_v2 = vadd.f32 %v700_v1, %v447_v43  ;;  %v702_v3 = vpop.f32.mrb[5].mxu0  ;;  %1124 = vmatmul.mubr.msk.f32.vlgmr.msra.gmra.mrb[6].mxu1 %vm729_vm6, %v1363_v4  ;;  %vm731_vm8 = vcmp.gt.f32.partialorder %v725_v63, 0.5 }
 0x149   : > { %vm732_vm7 = vcmp.gt.f32.partialorder %v726_v0, 0.5  ;;  %v1335_v5 = vadd.f32 %v702_v3, %v449_v44 }
 0x14a   : > { %v738_v6 = vsel %vm732_vm7, 1.0, %v1362_v37  ;;  %v727_v7 = vadd.f32 %v1334_v2, %v716_v51 }
 0x14b   : > { %v728_v8 = vadd.f32 %v1335_v5, %v720_v52  ;;  %1125 = vmatprep.mubr.msk.f32.mxu1 %vm764_vm4, %v738_v6 }
 0x14c   : > { %1126 = vmatmul.mubr.msk.f32.gmra.mrb[8].mxu1 %vm731_vm8, %v1363_v4  ;;  %vm733_vm10 = vcmp.gt.f32.partialorder %v727_v7, 0.5 }
 0x14d   : > { %vm734_vm9 = vcmp.gt.f32.partialorder %v728_v8, 0.5 }
 0x14e   : > { %v740_v9 = vsel %vm734_vm9, 1.0, %v1362_v37 }
 0x14f   : > { %1127 = vmatprep.mubr.msk.f32.mxu1 %vm764_vm4, %v740_v9 }
 0x150   : > { %1128 = vmatmul.mubr.msk.f32.gmra.mrb[10].mxu1 %vm733_vm10, %v1363_v4 }
 0x151   : > { %1146 = vmatprep.mubr.msk.f32.mxu1 %vm860_vm11, %v858_v10 }
 0x21b   : > { %v844_v11 = vpop.f32.mrb[6].mxu1 }
 0x21c   : > { %v846_v13 = vpop.f32.mrb[7].mxu1 }
 0x21f   : > { %v849_v14 = vpop.f32.mrb[8].mxu1 }
 0x220   : > { %v1326_v15 = vpack.c.bf16 %v849_v14, %v844_v11  ;;  %v851_v16 = vpop.f32.mrb[9].mxu1 }
 0x222   : > { %1327 = vmatprep.subr.bf16.mxu1 %v1326_v15 }
 0x223   : > { %v854_v17 = vpop.f32.mrb[10].mxu1  ;;  %1329 = vmatpush3.bf16.msra.mxu1 %v1326_v15 }
 0x224   : > { %v856_v19 = vpop.f32.mrb[11].mxu1  ;;  %1144 = vmatprep.subr.msk.mxu1 %vm602_vm2, %v854_v17 }
 0x227   : > { %1145 = vmatpush3.msk.msra.mxu1 %vm602_vm2, %v854_v17 }
 0x228   : > { %1147 = vmatmul.mubr.msk.f32.vlgmr.msra.gmra.mrb[12].mxu1 %vm860_vm11, %v859_v20 }
 0x2fb   : > { %v1148_v21 = vpop.f32.mrb[12].mxu1 }
 0x2fc   : > { %v936_v22 = vpop.f32.mrb[13].mxu1  ;;  %947 = vst.msk [vmem:[%s229_s27 + $0x8] sm:$0xff] %vm945_vm12, %v1148_v21 }
 0x2fd   : > { %946 = vst.msk [vmem:[%s229_s27] sm:$0xff] %vm945_vm12, %v936_v22 }
 0x2fe PF: > { %s15_s18 = sadd.s32 1, %s1359_s18  }
 0x2ff   : > { %p12_p5 = scmp.ge.s32.totalorder %s15_s18, 4  }
 0x301   :  { %14 = sbr.rel (!%p12_p5) target bundleno = 1 (0x1), region = 72 }

// kernel: cnn_model_forward.5
= control target key start
LH: loop header
LB: loop body
LE: loop exit
PB: predicated region body
PF: predicated region fallthrough
CT: control target
= control target key end

     0   :  { %vm140_vm0 = vcmask 1041408   ;;  %vm799_vm1 = vmmov 0   ;;  %vm801_vm2 = vmmov 1   ;;  %vm136_vm4 = vcmask 343040   ;;  %s1202_s1 = inlined_call_operand.vmem [shape: f32[810,50], index: 1, kind: input, shape index: {}]   ;;  %s1203_s0 = inlined_call_operand.vmem [shape: f32[8,810], index: 0, kind: input, shape index: {}]   ;;  %s1204_s3 = inlined_call_operand.vmem [shape: f32[50,30], index: 3, kind: input, shape index: {}]   ;;  %s1205_s2 = inlined_call_operand.vmem [shape: f32[1,50], index: 2, kind: input, shape index: {}]   ;;  %s1206_s4 = inlined_call_operand.vmem [shape: f32[1,30], index: 4, kind: input, shape index: {}]   ;;  %s1207_s5 = inlined_call_operand.vmem [shape: f32[8,30], index: 5, kind: output, shape index: {}]  }
   0x1   :  { %v43_v0 = vld [vmem:[%s1202_s1 + $0x80] sm:$0xff]  ;;  %v44_v1 = vld [vmem:[%s1202_s1 + $0x88] sm:$0xff]  ;;  %v45_v11 = vld [vmem:[%s1202_s1 + $0x90] sm:$0xff]  ;;  %vm438_vm5 = vcmask 408576   ;;  %vm515_vm6 = vcmask 244736  }
   0x2   :  { %v27_v2 = vld [vmem:[%s1202_s1] sm:$0xff]  ;;  %v679_v3 = vpack.c.bf16 %v44_v1, %v43_v0  ;;  %v28_v4 = vld [vmem:[%s1202_s1 + $0x8] sm:$0xff]  ;;  %v46_v13 = vld [vmem:[%s1202_s1 + $0x98] sm:$0xff] }
   0x3   :  { %v75_v5 = vld [vmem:[%s1202_s1 + $0x180] sm:$0xff]  ;;  %v76_v6 = vld [vmem:[%s1202_s1 + $0x188] sm:$0xff]  ;;  %v681_v7 = vpack.c.bf16 %v28_v4, %v27_v2  ;;  %v29_v14 = vld [vmem:[%s1202_s1 + $0x10] sm:$0xff]  ;;  %v683_v16 = vpack.c.bf16 %v46_v13, %v45_v11 }
   0x4   :  { %v711_v8 = vpack.c.bf16 %v76_v6, %v75_v5  ;;  %v59_v9 = vld [vmem:[%s1202_s1 + $0x100] sm:$0xff]  ;;  %v60_v10 = vld [vmem:[%s1202_s1 + $0x108] sm:$0xff]  ;;  %680 = vmatprep.subr.bf16.mxu0 %v679_v3  ;;  %v30_v15 = vld [vmem:[%s1202_s1 + $0x18] sm:$0xff] }
   0x5   :  { %v713_v12 = vpack.c.bf16 %v60_v10, %v59_v9  ;;  %682 = vmatpush3.bf16.msra.mxu0 %v681_v7  ;;  %v685_v17 = vpack.c.bf16 %v30_v15, %v29_v14  ;;  %v77_v18 = vld [vmem:[%s1202_s1 + $0x190] sm:$0xff]  ;;  %v78_v19 = vld [vmem:[%s1202_s1 + $0x198] sm:$0xff]  ;;  %v47_v23 = vld [vmem:[%s1202_s1 + $0xa0] sm:$0xff] }
   0x6   :  { %712 = vmatprep.subr.bf16.mxu1 %v711_v8  ;;  %v61_v20 = vld [vmem:[%s1202_s1 + $0x110] sm:$0xff]  ;;  %v715_v21 = vpack.c.bf16 %v78_v19, %v77_v18  ;;  %v62_v22 = vld [vmem:[%s1202_s1 + $0x118] sm:$0xff]  ;;  %v48_v24 = vld [vmem:[%s1202_s1 + $0xa8] sm:$0xff]  ;;  %684 = vmatprep.subr.bf16.mxu0 %v683_v16 }
   0x7   :  { %714 = vmatpush3.bf16.msra.mxu1 %v713_v12  ;;  %v717_v25 = vpack.c.bf16 %v62_v22, %v61_v20  ;;  %v687_v26 = vpack.c.bf16 %v48_v24, %v47_v23  ;;  %v31_v27 = vld [vmem:[%s1202_s1 + $0x20] sm:$0xff]  ;;  %v32_v28 = vld [vmem:[%s1202_s1 + $0x28] sm:$0xff]  ;;  %v49_v35 = vld [vmem:[%s1202_s1 + $0xb0] sm:$0xff] }
   0x8   :  { %v79_v29 = vld [vmem:[%s1202_s1 + $0x1a0] sm:$0xff]  ;;  %716 = vmatprep.subr.bf16.mxu1 %v715_v21  ;;  %v80_v30 = vld [vmem:[%s1202_s1 + $0x1a8] sm:$0xff]  ;;  %v689_v33 = vpack.c.bf16 %v32_v28, %v31_v27  ;;  %v50_v36 = vld [vmem:[%s1202_s1 + $0xb8] sm:$0xff] }
   0x9   :  { %v63_v31 = vld [vmem:[%s1202_s1 + $0x120] sm:$0xff]  ;;  %v64_v32 = vld [vmem:[%s1202_s1 + $0x128] sm:$0xff]  ;;  %686 = vmatpush3.bf16.msra.mxu0 %v685_v17  ;;  %v719_v34 = vpack.c.bf16 %v80_v30, %v79_v29  ;;  %v33_v37 = vld [vmem:[%s1202_s1 + $0x30] sm:$0xff]  ;;  %v691_v39 = vpack.c.bf16 %v50_v36, %v49_v35 }
   0xa   :  { %688 = vmatprep.subr.bf16.mxu0 %v687_v26  ;;  %v721_v38 = vpack.c.bf16 %v64_v32, %v63_v31  ;;  %v34_v40 = vld [vmem:[%s1202_s1 + $0x38] sm:$0xff]  ;;  %v81_v41 = vld [vmem:[%s1202_s1 + $0x1b0] sm:$0xff]  ;;  %v51_v46 = vld [vmem:[%s1202_s1 + $0xc0] sm:$0xff] }
   0xb   :  { %718 = vmatpush3.bf16.msra.mxu1 %v717_v25  ;;  %v82_v42 = vld [vmem:[%s1202_s1 + $0x1b8] sm:$0xff]  ;;  %v65_v44 = vld [vmem:[%s1202_s1 + $0x130] sm:$0xff]  ;;  %v52_v47 = vld [vmem:[%s1202_s1 + $0xc8] sm:$0xff]  ;;  %v693_v48 = vpack.c.bf16 %v34_v40, %v33_v37 }
   0xc   :  { %720 = vmatprep.subr.bf16.mxu1 %v719_v34  ;;  %v723_v43 = vpack.c.bf16 %v82_v42, %v81_v41  ;;  %v66_v45 = vld [vmem:[%s1202_s1 + $0x138] sm:$0xff]  ;;  %v83_v49 = vld [vmem:[%s1202_s1 + $0x1c0] sm:$0xff]  ;;  %v84_v50 = vld [vmem:[%s1202_s1 + $0x1c8] sm:$0xff]  ;;  %v695_v52 = vpack.c.bf16 %v52_v47, %v51_v46 }
   0xd   :  { %690 = vmatpush3.bf16.msra.mxu0 %v689_v33  ;;  %v725_v51 = vpack.c.bf16 %v66_v45, %v65_v44  ;;  %v35_v53 = vld [vmem:[%s1202_s1 + $0x40] sm:$0xff]  ;;  %v36_v54 = vld [vmem:[%s1202_s1 + $0x48] sm:$0xff]  ;;  %v727_v56 = vpack.c.bf16 %v84_v50, %v83_v49  ;;  %v53_v58 = vld [vmem:[%s1202_s1 + $0xd0] sm:$0xff] }
   0xe   :  { %692 = vmatprep.subr.bf16.mxu0 %v691_v39  ;;  %v67_v55 = vld [vmem:[%s1202_s1 + $0x140] sm:$0xff]  ;;  %v68_v57 = vld [vmem:[%s1202_s1 + $0x148] sm:$0xff]  ;;  %v54_v59 = vld [vmem:[%s1202_s1 + $0xd8] sm:$0xff]  ;;  %v697_v62 = vpack.c.bf16 %v36_v54, %v35_v53 }
   0xf   :  { %722 = vmatpush3.bf16.msra.mxu1 %v721_v38  ;;  %v85_v60 = vld [vmem:[%s1202_s1 + $0x1d0] sm:$0xff]  ;;  %v86_v61 = vld [vmem:[%s1202_s1 + $0x1d8] sm:$0xff]  ;;  %v729_v63 = vpack.c.bf16 %v68_v57, %v67_v55  ;;  %v699_v0 = vpack.c.bf16 %v54_v59, %v53_v58  ;;  %v55_v6 = vld [vmem:[%s1202_s1 + $0xe0] sm:$0xff] }
  0x10   :  { %724 = vmatprep.subr.bf16.mxu1 %v723_v43  ;;  %v37_v1 = vld [vmem:[%s1202_s1 + $0x50] sm:$0xff]  ;;  %v38_v2 = vld [vmem:[%s1202_s1 + $0x58] sm:$0xff]  ;;  %v731_v4 = vpack.c.bf16 %v86_v61, %v85_v60  ;;  %v56_v7 = vld [vmem:[%s1202_s1 + $0xe8] sm:$0xff] }
  0x11   :  { %694 = vmatpush3.bf16.msra.mxu0 %v693_v48  ;;  %v69_v3 = vld [vmem:[%s1202_s1 + $0x150] sm:$0xff]  ;;  %v70_v5 = vld [vmem:[%s1202_s1 + $0x158] sm:$0xff]  ;;  %v87_v8 = vld [vmem:[%s1202_s1 + $0x1e0] sm:$0xff]  ;;  %v701_v10 = vpack.c.bf16 %v38_v2, %v37_v1  ;;  %v703_v14 = vpack.c.bf16 %v56_v7, %v55_v6  ;;  %v800_v1 = vmov 0.0  }
  0x12   :  { %696 = vmatprep.subr.bf16.mxu0 %v695_v52  ;;  %v88_v9 = vld [vmem:[%s1202_s1 + $0x1e8] sm:$0xff]  ;;  %v39_v11 = vld [vmem:[%s1202_s1 + $0x60] sm:$0xff]  ;;  %v733_v13 = vpack.c.bf16 %v70_v5, %v69_v3  ;;  %v57_v19 = vld [vmem:[%s1202_s1 + $0xf0] sm:$0xff]  ;;  %v798_v52 = vmov 0.0|0.0  }
  0x13   :  { %726 = vmatpush3.bf16.msra.mxu1 %v725_v51  ;;  %v21_v12 = vld [vmem:[%s1203_s0 + $0x8] sm:$0xff]  ;;  %v71_v16 = vld [vmem:[%s1202_s1 + $0x160] sm:$0xff]  ;;  %v735_v18 = vpack.c.bf16 %v88_v9, %v87_v8  ;;  %v58_v20 = vld [vmem:[%s1202_s1 + $0xf8] sm:$0xff] }
  0x14   :  { %728 = vmatprep.subr.bf16.mxu1 %v727_v56  ;;  %v40_v15 = vld [vmem:[%s1202_s1 + $0x68] sm:$0xff]  ;;  %208 = vmatprep.mubr.f32.mxu0 %v21_v12  ;;  %v23_v21 = vld [vmem:[%s1203_s0 + $0x18] sm:$0xff]  ;;  %v89_v22 = vld [vmem:[%s1202_s1 + $0x1f0] sm:$0xff]  ;;  %v707_v26 = vpack.c.bf16 %v58_v20, %v57_v19 }
  0x15   :  { %698 = vmatpush3.bf16.msra.mxu0 %v697_v62  ;;  %v72_v17 = vld [vmem:[%s1202_s1 + $0x168] sm:$0xff]  ;;  %v90_v23 = vld [vmem:[%s1202_s1 + $0x1f8] sm:$0xff]  ;;  %278 = vmatprep.mubr.f32.mxu1 %v23_v21  ;;  %v705_v24 = vpack.c.bf16 %v40_v15, %v39_v11  ;;  %v41_v27 = vld [vmem:[%s1202_s1 + $0x70] sm:$0xff] }
  0x16   :  { %700 = vmatprep.subr.bf16.mxu0 %v699_v0  ;;  %v737_v25 = vpack.c.bf16 %v72_v17, %v71_v16  ;;  %v42_v28 = vld [vmem:[%s1202_s1 + $0x78] sm:$0xff]  ;;  %v73_v29 = vld [vmem:[%s1202_s1 + $0x170] sm:$0xff]  ;;  %v739_v30 = vpack.c.bf16 %v90_v23, %v89_v22  ;;  %v107_v32 = vld [vmem:[%s1202_s1 + $0x280] sm:$0xff] }
  0x17   :  { %730 = vmatpush3.bf16.msra.mxu1 %v729_v63  ;;  %v74_v31 = vld [vmem:[%s1202_s1 + $0x178] sm:$0xff]  ;;  %v108_v33 = vld [vmem:[%s1202_s1 + $0x288] sm:$0xff]  ;;  %v709_v34 = vpack.c.bf16 %v42_v28, %v41_v27  ;;  %v91_v37 = vld [vmem:[%s1202_s1 + $0x200] sm:$0xff] }
  0x18   :  { %732 = vmatprep.subr.bf16.mxu1 %v731_v4  ;;  %v741_v35 = vpack.c.bf16 %v74_v31, %v73_v29  ;;  %v743_v36 = vpack.c.bf16 %v108_v33, %v107_v32  ;;  %v92_v38 = vld [vmem:[%s1202_s1 + $0x208] sm:$0xff]  ;;  %v109_v39 = vld [vmem:[%s1202_s1 + $0x290] sm:$0xff]  ;;  %v110_v40 = vld [vmem:[%s1202_s1 + $0x298] sm:$0xff] }
  0x19   :  { %702 = vmatpush3.bf16.msra.mxu0 %v701_v10  ;;  %v20_v41 = vld [vmem:[%s1203_s0] sm:$0xff]  ;;  %v745_v42 = vpack.c.bf16 %v92_v38, %v91_v37  ;;  %v22_v43 = vld [vmem:[%s1203_s0 + $0x10] sm:$0xff]  ;;  %v124_v45 = vld [vmem:[%s1202_s1 + $0x308] sm:$0xff]  ;;  %v747_v46 = vpack.c.bf16 %v110_v40, %v109_v39 }
  0x1a   :  { %704 = vmatprep.subr.bf16.mxu0 %v703_v14  ;;  %v123_v44 = vld [vmem:[%s1202_s1 + $0x300] sm:$0xff]  ;;  %v93_v47 = vld [vmem:[%s1202_s1 + $0x210] sm:$0xff]  ;;  %v94_v48 = vld [vmem:[%s1202_s1 + $0x218] sm:$0xff] }
  0x1b   :  { %734 = vmatpush3.bf16.msra.mxu1 %v733_v13  ;;  %v111_v49 = vld [vmem:[%s1202_s1 + $0x2a0] sm:$0xff]  ;;  %v776_v50 = vpack.c.bf16 %v124_v45, %v123_v44  ;;  %v112_v51 = vld [vmem:[%s1202_s1 + $0x2a8] sm:$0xff]  ;;  %v125_v53 = vld [vmem:[%s1202_s1 + $0x310] sm:$0xff]  ;;  %v749_v56 = vpack.c.bf16 %v94_v48, %v93_v47 }
  0x1c   :  { %736 = vmatprep.subr.bf16.mxu1 %v735_v18  ;;  %v126_v54 = vld [vmem:[%s1202_s1 + $0x318] sm:$0xff]  ;;  %v25_v55 = vld [vmem:[%s1203_s0 + $0x28] sm:$0xff]  ;;  %v751_v57 = vpack.c.bf16 %v112_v51, %v111_v49  ;;  %v95_v58 = vld [vmem:[%s1202_s1 + $0x220] sm:$0xff] }
  0x1d   :  { %706 = vmatpush3.bf16.msra.mxu0 %v705_v24  ;;  %v96_v59 = vld [vmem:[%s1202_s1 + $0x228] sm:$0xff]  ;;  %v113_v60 = vld [vmem:[%s1202_s1 + $0x2b0] sm:$0xff]  ;;  %v779_v61 = vpack.c.bf16 %v126_v54, %v125_v53  ;;  %v114_v62 = vld [vmem:[%s1202_s1 + $0x2b8] sm:$0xff] }
  0x1e   :  { %708 = vmatprep.subr.bf16.mxu0 %v707_v26  ;;  %v127_v63 = vld [vmem:[%s1202_s1 + $0x320] sm:$0xff]  ;;  %v128_v0 = vld [vmem:[%s1202_s1 + $0x328] sm:$0x3]  ;;  %v753_v2 = vpack.c.bf16 %v96_v59, %v95_v58  ;;  %v755_v3 = vpack.c.bf16 %v114_v62, %v113_v60  ;;  %v97_v4 = vld [vmem:[%s1202_s1 + $0x230] sm:$0xff] }
  0x1f   :  { %738 = vmatpush3.bf16.msra.mxu1 %v737_v25  ;;  %v98_v5 = vld [vmem:[%s1202_s1 + $0x238] sm:$0xff]  ;;  %v782_v6 = vpack.c.bf16 %v128_v0, %v127_v63  ;;  %v115_v7 = vld [vmem:[%s1202_s1 + $0x2c0] sm:$0xff]  ;;  %v116_v8 = vld [vmem:[%s1202_s1 + $0x2c8] sm:$0xff] }
  0x20   :  { %740 = vmatprep.subr.bf16.mxu1 %v739_v30  ;;  %vm783_vm3 = vmpackc.low %vm140_vm0, %vm801_vm2  ;;  %v757_v9 = vpack.c.bf16 %v98_v5, %v97_v4  ;;  %v759_v10 = vpack.c.bf16 %v116_v8, %v115_v7  ;;  %v99_v11 = vld [vmem:[%s1202_s1 + $0x240] sm:$0xff]  ;;  %v100_v12 = vld [vmem:[%s1202_s1 + $0x248] sm:$0xff] }
  0x21   :  { %710 = vmatpush3.bf16.msra.mxu0 %v709_v34  ;;  %v26_v13 = vld [vmem:[%s1203_s0 + $0x30] sm:$0xff]  ;;  %v118_v15 = vld [vmem:[%s1202_s1 + $0x2d8] sm:$0xff]  ;;  %v761_v16 = vpack.c.bf16 %v100_v12, %v99_v11  ;;  %v119_v20 = vld [vmem:[%s1202_s1 + $0x2e0] sm:$0xff] }
  0x22   :  { %744 = vmatprep.subr.bf16.mxu0 %v743_v36  ;;  %v117_v14 = vld [vmem:[%s1202_s1 + $0x2d0] sm:$0xff]  ;;  %v102_v19 = vld [vmem:[%s1202_s1 + $0x258] sm:$0xff]  ;;  %v120_v21 = vld [vmem:[%s1202_s1 + $0x2e8] sm:$0xff] }
  0x23   :  { %742 = vmatpush3.bf16.msra.mxu1 %v741_v35  ;;  %v763_v17 = vpack.c.bf16 %v118_v15, %v117_v14  ;;  %v101_v18 = vld [vmem:[%s1202_s1 + $0x250] sm:$0xff]  ;;  %v767_v23 = vpack.c.bf16 %v120_v21, %v119_v20  ;;  %v103_v24 = vld [vmem:[%s1202_s1 + $0x260] sm:$0xff]  ;;  %v104_v25 = vld [vmem:[%s1202_s1 + $0x268] sm:$0xff] }
  0x24   :  { %775 = vmatprep.subr.bf16.mxu1 %v798_v52  ;;  %209 = vmatmul.mubr.f32.vlgmr.msra.gmra.mrb[0].mxu0 %v20_v41  ;;  %v765_v22 = vpack.c.bf16 %v102_v19, %v101_v18  ;;  %v121_v26 = vld [vmem:[%s1202_s1 + $0x2f0] sm:$0xff]  ;;  %v122_v27 = vld [vmem:[%s1202_s1 + $0x2f8] sm:$0xff]  ;;  %v769_v28 = vpack.c.bf16 %v104_v25, %v103_v24  ;;  %v24_v33 = vld [vmem:[%s1203_s0 + $0x20] sm:$0xff] }
  0x25   :  { %746 = vmatpush3.bf16.msra.mxu0 %v745_v42  ;;  %348 = vmatprep.mubr.f32.mxu0 %v25_v55  ;;  %v771_v29 = vpack.c.bf16 %v122_v27, %v121_v26  ;;  %v105_v30 = vld [vmem:[%s1202_s1 + $0x270] sm:$0xff]  ;;  %v106_v31 = vld [vmem:[%s1202_s1 + $0x278] sm:$0xff]  ;;  %v424_v34 = vld [vmem:[%s1204_s3] sm:$0xff] }
  0x26   :  { %279 = vmatmul.mubr.f32.vlgmr.msra.gmra.mrb[0].mxu1 %v22_v43  ;;  %748 = vmatprep.subr.bf16.mxu0 %v747_v46  ;;  %v773_v32 = vpack.c.bf16 %v106_v31, %v105_v30  ;;  %v425_v35 = vld [vmem:[%s1204_s3 + $0x8] sm:$0xff]  ;;  %v426_v36 = vld [vmem:[%s1204_s3 + $0x10] sm:$0xff]  ;;  %v427_v38 = vld [vmem:[%s1204_s3 + $0x18] sm:$0xff] }
  0x27   :  { %777 = vmatpush3.bf16.msra.mxu1 %v776_v50  ;;  %659 = vmatprep.mubr.msk.f32.mxu1 %vm799_vm1, %v800_v1  ;;  %v786_v37 = vpack.c.bf16 %v425_v35, %v424_v34  ;;  %v789_v39 = vpack.c.bf16 %v427_v38, %v426_v36  ;;  %v428_v40 = vld [vmem:[%s1204_s3 + $0x20] sm:$0xff]  ;;  %v429_v41 = vld [vmem:[%s1204_s3 + $0x28] sm:$0xff]  ;;  %v430_v43 = vld [vmem:[%s1204_s3 + $0x30] sm:$0x3] }
  0x28   :  { %778 = vmatprep.subr.bf16.mxu1 %v798_v52  ;;  %v792_v42 = vpack.c.bf16 %v429_v41, %v428_v40  ;;  %v521_v45 = vld [vmem:[%s1205_s2] ss:$0 sm:$0xff] }
  0x29   :  { %750 = vmatpush3.bf16.msra.mxu0 %v749_v56  ;;  %v524_v60 = vld [vmem:[%s1206_s4] ss:$0 sm:$0xff] }
  0x2a   :  { %752 = vmatprep.subr.bf16.mxu0 %v751_v57 }
  0x2b   :  { %780 = vmatpush3.bf16.msra.mxu1 %v779_v61 }
  0x2c   :  { %781 = vmatprep.subr.bf16.mxu1 %v798_v52 }
  0x2d   :  { %754 = vmatpush3.bf16.msra.mxu0 %v753_v2 }
  0x2e   :  { %756 = vmatprep.subr.bf16.mxu0 %v755_v3 }
  0x2f   :  { %784 = vmatpush3.bf16.msk.msra.mxu1 %vm783_vm3, %v782_v6 }
  0x30   :  { %785 = vmatprep.subr.bf16.mxu1 %v798_v52 }
  0x31   :  { %758 = vmatpush3.bf16.msra.mxu0 %v757_v9 }
  0x32   :  { %660 = vmatmul.mubr.msk.f32.vlgmr.msra.gmra.mrb[2].mxu1 %vm136_vm4, %v26_v13  ;;  %760 = vmatprep.subr.bf16.mxu0 %v759_v10 }
  0x33   :  { %676 = vmatprep.mubr.msk.f32.mxu1 %vm799_vm1, %v800_v1  ;;  %787 = vmatpush3.bf16.msra.mxu1 %v786_v37 }
  0x34   :  { %788 = vmatprep.subr.bf16.mxu1 %v798_v52 }
  0x35   :  { %762 = vmatpush3.bf16.msra.mxu0 %v761_v16 }
  0x36   :  { %764 = vmatprep.subr.bf16.mxu0 %v763_v17 }
  0x37   :  { %790 = vmatpush3.bf16.msra.mxu1 %v789_v39 }
  0x38   :  { %791 = vmatprep.subr.bf16.mxu1 %v798_v52 }
  0x39   :  { %766 = vmatpush3.bf16.msra.mxu0 %v765_v22 }
  0x3a   :  { %768 = vmatprep.subr.bf16.mxu0 %v767_v23 }
  0x3b   :  { %793 = vmatpush3.bf16.msra.mxu1 %v792_v42 }
  0x3c   :  { %674 = vmatprep.subr.mxu1 %v800_v1 }
  0x3d   :  { %770 = vmatpush3.bf16.msra.mxu0 %v769_v28 }
  0x3e   :  { %772 = vmatprep.subr.bf16.mxu0 %v771_v29 }
  0x3f   :  { %675 = vmatpush3.msk.msra.mxu1 %vm140_vm0, %v430_v43 }
  0x41   :  { %774 = vmatpush3.bf16.msra.mxu0 %v773_v32 }
  0x44   :  { %349 = vmatmul.mubr.f32.vlgmr.msra.gmra.mrb[2].mxu0 %v24_v33 }
  0xf7   :  { %v559_v44 = vpop.f32.mrb[0].mxu0 }
  0xf8   :  { %v560_v46 = vpop.f32.mrb[1].mxu0 }
  0xf9   :  { %v594_v47 = vpop.f32.mrb[0].mxu1  ;;  %v561_v48 = vadd.f32 %v560_v46, %v559_v44 }
  0xfa   :  { %v595_v49 = vpop.f32.mrb[1].mxu1 }
  0xfb   :  { %v596_v50 = vadd.f32 %v595_v49, %v594_v47  ;;  %v211_v51 = vadd.f32 %v561_v48, %v521_v45 }
  0xfd   :  { %v281_v52 = vadd.f32 %v596_v50, %v211_v51 }
 0x105   :  { %v420_v53 = vpop.f32.mrb[2].mxu1 }
 0x106   :  { %v661_v54 = vpop.f32.mrb[3].mxu1 }
 0x117   :  { %v629_v55 = vpop.f32.mrb[2].mxu0 }
 0x118   :  { %v630_v56 = vpop.f32.mrb[3].mxu0 }
 0x119   :  { %v631_v57 = vadd.f32 %v630_v56, %v629_v55 }
 0x11b   :  { %v351_v58 = vadd.f32 %v631_v57, %v281_v52 }
 0x11d   :  { %v421_v59 = vadd.f32 %v420_v53, %v351_v58 }
 0x11f   :  { %677 = vmatmul.mubr.msk.f32.vlgmr.msra.gmra.mrb[4].mxu1 %vm438_vm5, %v421_v59 }
 0x1f2   :  { %v511_v61 = vpop.f32.mrb[4].mxu1 }
 0x1f3   :  { %v512_v62 = vadd.f32 %v524_v60, %v511_v61  ;;  %v678_v63 = vpop.f32.mrb[5].mxu1 }
 0x1f5   :  { %516 = vst.msk [vmem:[%s1207_s5] sm:$0xff] %vm515_vm6, %v512_v62 }

</bundles_post_ra>
